<compile_context>
chip_gen: v7x
topology: tpu7x:2x2x1
jax: 0.10.0
libtpu: 0.0.40
codegen_flags: <defaults>
</compile_context>

<pallas_src>
import functools

import jax
import jax.numpy as jnp
from jax import lax
from jax.experimental import pallas as pl
from jax.experimental.pallas import tpu as pltpu

_PLANE_WORKSET_F32 = 48   # ~ live f32 plane-equivalents per plane inside the kernel


@functools.lru_cache(maxsize=None)
def _vmem_limit_bytes():
    cap = 128 * 1024 * 1024
    try:
        info = pltpu.get_tpu_info()
        cap = int(getattr(info, "vmem_capacity_bytes", cap) or cap)
    except Exception:
        pass
    # leave headroom below physical VMEM (v7x has only 64 MiB per TensorCore)
    return int(min(cap // 2, 64 * 1024 * 1024))


def _largest_divisor_leq(n, cap):
    cap = int(max(1, min(n, cap)))
    for p in range(cap, 0, -1):
        if n % p == 0:
            return p
    return 1


def _pick_plane_block(n, unit_bytes):
    """Planes per grid step, bounded by the VMEM budget, keeping >=4 (>=2) steps."""
    budget = _vmem_limit_bytes() // 2
    cap = max(1, budget // max(int(unit_bytes), 1))
    if n >= 4:
        cap = min(cap, n // 4)
    elif n >= 2:
        cap = min(cap, n // 2)
    return _largest_divisor_leq(n, cap)


# ---------------------------------------------------------------------------
# Fused per-level Pallas kernel
# ---------------------------------------------------------------------------
def _lap_level_kernel(ph_in_ref, ph_tg_ref, dn_in_ref, dn_tg_ref, part_ref,
                      *, hp, wp):
    """One Laplacian-pyramid level for a block of P planes.

    ph_*_ref : (4, P, hp, wp) phase planes of the current (2*hp, 2*wp) level,
               phase k = 2*row_parity + col_parity.
    dn_*_ref : (P, hp, wp) down = conv2d(reflect_pad2(cur), gauss/256)[::2, ::2].
    part_ref : (1, 8, 128) per-block partial L1 sum (scalar broadcast).
    """

    # Reflect-pad-by-2 halos, expressed directly on the phase planes:
    #   even phase : low halo = row/col 1, high halo = last row/col
    #   odd  phase : low halo = row/col 0 (high halo never read by the conv)
    def pad_rows_e(x):
        return jnp.concatenate([x[:, 1:2, :], x, x[:, hp - 1:hp, :]], axis=1)

    def pad_rows_o(x):
        return jnp.concatenate([x[:, 0:1, :], x], axis=1)

    def pad_cols_e(x):
        return jnp.concatenate([x[:, :, 1:2], x, x[:, :, wp - 1:wp]], axis=2)

    def pad_cols_o(x):
        return jnp.concatenate([x[:, :, 0:1], x], axis=2)

    def vtap5(e, o):   # vertical [1,4,6,4,1] sampled at even output rows
        return (e[:, 0:hp, :] + 6.0 * e[:, 1:hp + 1, :] + e[:, 2:hp + 2, :]
                + 4.0 * o[:, 0:hp, :] + 4.0 * o[:, 1:hp + 1, :])

    def htap5(e, o):   # horizontal [1,4,6,4,1] sampled at even output cols
        return (e[:, :, 0:wp] + 6.0 * e[:, :, 1:wp + 1] + e[:, :, 2:wp + 2]
                + 4.0 * o[:, :, 0:wp] + 4.0 * o[:, :, 1:wp + 1])

    def gauss_down(ph):  # fused separable 5x5 gaussian (/256) + stride-2 decimation
        v0 = vtap5(pad_rows_e(ph[0]), pad_rows_o(ph[2]))   # column-phase 0
        v1 = vtap5(pad_rows_e(ph[1]), pad_rows_o(ph[3]))   # column-phase 1
        return htap5(pad_cols_e(v0), pad_cols_o(v1)) * (1.0 / 256.0)

    pi = [ph_in_ref[k] for k in range(4)]
    pt = [ph_tg_ref[k] for k in range(4)]

    dn_in = gauss_down(pi)
    dn_tg = gauss_down(pt)
    dn_in_ref[...] = dn_in
    dn_tg_ref[...] = dn_tg

    # Zero-insert upsample (conv with 4*gauss/256) applied ONCE to the
    # down-plane difference (linearity), in polyphase form.
    dd = dn_in - dn_tg
    dr = pad_rows_e(dd)                      # zero-insert pad: low = row1, high = last
    ve = (dr[:, 0:hp, :] + 6.0 * dr[:, 1:hp + 1, :] + dr[:, 2:hp + 2, :]) * 0.125
    vo = (dr[:, 1:hp + 1, :] + dr[:, 2:hp + 2, :]) * 0.5
    vep = pad_cols_e(ve)
    vop = pad_cols_e(vo)
    uee = (vep[:, :, 0:wp] + 6.0 * vep[:, :, 1:wp + 1] + vep[:, :, 2:wp + 2]) * 0.125
    ueo = (vep[:, :, 1:wp + 1] + vep[:, :, 2:wp + 2]) * 0.5
    uoe = (vop[:, :, 0:wp] + 6.0 * vop[:, :, 1:wp + 1] + vop[:, :, 2:wp + 2]) * 0.125
    uoo = (vop[:, :, 1:wp + 1] + vop[:, :, 2:wp + 2]) * 0.5

    # |(cur_in - up_in) - (cur_tg - up_tg)| accumulated elementwise per phase,
    # then ONE cross-lane/sublane reduce per grid step.
    a = (jnp.abs((pi[0] - pt[0]) - uee) + jnp.abs((pi[1] - pt[1]) - ueo)
         + jnp.abs((pi[2] - pt[2]) - uoe) + jnp.abs((pi[3] - pt[3]) - uoo))
    part_ref[...] = jnp.full(part_ref.shape, jnp.sum(a), dtype=part_ref.dtype)


# ---------------------------------------------------------------------------
# Wrappers / minimal XLA glue
# ---------------------------------------------------------------------------
def _phase_split(x):
    """(N, H, W) -> (4, N, H//2, W//2), phase k = 2*row_parity + col_parity."""
    n, h, w = x.shape
    t = x.reshape(n, h // 2, 2, w // 2, 2)
    t = jnp.transpose(t, (2, 4, 0, 1, 3))
    return t.reshape(4, n, h // 2, w // 2)


def _lap_level(ph_in, ph_tg):
    """One fused pyramid level. Returns (down_in, down_tg, level_abs_sum)."""
    _, n, hp, wp = ph_in.shape
    unit = _PLANE_WORKSET_F32 * hp * wp * 4
    pc = _pick_plane_block(n, unit)
    nblk = n // pc

    kern = functools.partial(_lap_level_kernel, hp=hp, wp=wp)
    dn_in, dn_tg, part = pl.pallas_call(
        kern,
        out_shape=(jax.ShapeDtypeStruct((n, hp, wp), jnp.float32),
                   jax.ShapeDtypeStruct((n, hp, wp), jnp.float32),
                   jax.ShapeDtypeStruct((nblk, 8, 128), jnp.float32)),
        grid=(nblk,),
        in_specs=[pl.BlockSpec((4, pc, hp, wp), lambda i: (0, i, 0, 0)),
                  pl.BlockSpec((4, pc, hp, wp), lambda i: (0, i, 0, 0))],
        out_specs=(pl.BlockSpec((pc, hp, wp), lambda i: (i, 0, 0)),
                   pl.BlockSpec((pc, hp, wp), lambda i: (i, 0, 0)),
                   pl.BlockSpec((1, 8, 128), lambda i: (i, 0, 0))),
        compiler_params=pltpu.CompilerParams(
            dimension_semantics=("parallel",),
            vmem_limit_bytes=_vmem_limit_bytes()),
    )(ph_in, ph_tg)
    return dn_in, dn_tg, jnp.sum(part[:, 0, 0])


def lap_loss(inp, tgt, max_levels=3):
    """LapLoss.forward: sum_l mean(|pyr_input[l] - pyr_target[l]|)."""
    b, c, h, w = inp.shape
    bc = b * c
    cur_in = inp.reshape(bc, h, w).astype(jnp.float32)
    cur_tg = tgt.reshape(bc, h, w).astype(jnp.float32)

    hc, wc = h, w
    assert hc % 2 == 0 and wc % 2 == 0 and hc >= 4 and wc >= 4, (
        "LapLoss kernel requires even spatial dims >= 4 at every level")
    ph_in = _phase_split(cur_in)
    ph_tg = _phase_split(cur_tg)

    total = jnp.float32(0.0)
    for lvl in range(max_levels):
        assert hc % 2 == 0 and wc % 2 == 0 and hc >= 4 and wc >= 4, (
            "LapLoss kernel requires even spatial dims >= 4 at every level")
        dn_in, dn_tg, s = _lap_level(ph_in, ph_tg)
        total = total + s / jnp.float32(bc * hc * wc)
        hc, wc = hc // 2, wc // 2
        if lvl + 1 < max_levels:
            ph_in = _phase_split(dn_in)   # 1/4-size glue pass per level
            ph_tg = _phase_split(dn_tg)
    return total


# ---------------------------------------------------------------------------
# Pure-JAX reference (lax.conv) for correctness checking
# ---------------------------------------------------------------------------
_GAUSS_5x5 = [
    [1.0, 4.0, 6.0, 4.0, 1.0],
    [4.0, 16.0, 24.0, 16.0, 4.0],
    [6.0, 24.0, 36.0, 24.0, 6.0],
    [4.0, 16.0, 24.0, 16.0, 4.0],
    [1.0, 4.0, 6.0, 4.0, 1.0],
]


def _ref_conv_gauss(img, kern):
    c = img.shape[1]
    pad = jnp.pad(img, ((0, 0), (0, 0), (2, 2), (2, 2)), mode="reflect")
    return lax.conv_general_dilated(
        pad, kern, window_strides=(1, 1), padding="VALID",
        dimension_numbers=("NCHW", "OIHW", "NCHW"),
        feature_group_count=c)


def _ref_lap_loss(x, y, max_levels=3):
    c = x.shape[1]
    k = jnp.asarray(_GAUSS_5x5, jnp.float32) / 256.0
    kern = jnp.tile(k[None, None], (c, 1, 1, 1))

    def pyramid(img):
        cur = img
        pyr = []
        for _ in range(max_levels):
            filt = _ref_conv_gauss(cur, kern)
            down = filt[:, :, ::2, ::2]
            up0 = jnp.zeros((down.shape[0], down.shape[1],
                             2 * down.shape[2], 2 * down.shape[3]), jnp.float32)
            up0 = up0.at[:, :, ::2, ::2].set(down)
            up = _ref_conv_gauss(up0, 4.0 * kern)
            pyr.append(cur - up)
            cur = down
        return pyr

    return sum(jnp.mean(jnp.abs(a - b)) for a, b in zip(pyramid(x), pyramid(y)))


if __name__ == "__main__":
    key = jax.random.PRNGKey(0)
    k1, k2 = jax.random.split(key)
    B, C, H, W = 2, 4, 16, 16
    x = jax.random.normal(k1, (B, C, H, W), dtype=jnp.float32)
    y = jax.random.normal(k2, (B, C, H, W), dtype=jnp.float32)

    lap_loss_jit = jax.jit(lap_loss, static_argnames=("max_levels",))
    loss = jax.block_until_ready(lap_loss_jit(x, y, max_levels=3))
    ref = jax.block_until_ready(_ref_lap_loss(x, y, max_levels=3))

    assert jnp.isfinite(loss), "loss is not finite"
    tol = 1e-4 * max(1.0, abs(float(ref)))
    assert abs(float(loss) - float(ref)) < tol, (float(loss), float(ref))
    print("KERNEL_OK")
</pallas_src>

<mosaic_0001>
module attributes {stable_mosaic.version = 11 : i64} {
  func.func @_lap_level_kernel(%arg0: i32, %arg1: memref<4x2x8x8xf32, #tpu.memory_space<vmem>>, %arg2: memref<4x2x8x8xf32, #tpu.memory_space<vmem>>, %arg3: memref<2x8x8xf32, #tpu.memory_space<vmem>>, %arg4: memref<2x8x8xf32, #tpu.memory_space<vmem>>, %arg5: memref<1x8x128xf32, #tpu.memory_space<vmem>>) attributes {dimension_semantics = [#tpu.dimension_semantics<parallel>], iteration_bounds = array<i64: 4>, scalar_prefetch = 0 : i64, scratch_operands = 0 : i64, tpu.core_type = #tpu.core_type<tc>, window_params = [{transform_indices = @transform_0, window_bounds = array<i64: 4, 2, 8, 8>}, {transform_indices = @transform_1, window_bounds = array<i64: 4, 2, 8, 8>}, {transform_indices = @transform_2, window_bounds = array<i64: 2, 8, 8>}, {transform_indices = @transform_3, window_bounds = array<i64: 2, 8, 8>}, {transform_indices = @transform_4, window_bounds = array<i64: 1, 8, 128>}]} {
    %c0 = arith.constant 0 : index
    %c0_0 = arith.constant 0 : index
    %c0_1 = arith.constant 0 : index
    %c0_2 = arith.constant 0 : index
    %0 = vector.load %arg1[%c0, %c0_0, %c0_1, %c0_2] : memref<4x2x8x8xf32, #tpu.memory_space<vmem>>, vector<1x2x8x8xf32>
    %1 = vector.shape_cast %0 : vector<1x2x8x8xf32> to vector<2x8x8xf32>
    %c1 = arith.constant 1 : index
    %c0_3 = arith.constant 0 : index
    %c0_4 = arith.constant 0 : index
    %c0_5 = arith.constant 0 : index
    %2 = vector.load %arg1[%c1, %c0_3, %c0_4, %c0_5] : memref<4x2x8x8xf32, #tpu.memory_space<vmem>>, vector<1x2x8x8xf32>
    %3 = vector.shape_cast %2 : vector<1x2x8x8xf32> to vector<2x8x8xf32>
    %c2 = arith.constant 2 : index
    %c0_6 = arith.constant 0 : index
    %c0_7 = arith.constant 0 : index
    %c0_8 = arith.constant 0 : index
    %4 = vector.load %arg1[%c2, %c0_6, %c0_7, %c0_8] : memref<4x2x8x8xf32, #tpu.memory_space<vmem>>, vector<1x2x8x8xf32>
    %5 = vector.shape_cast %4 : vector<1x2x8x8xf32> to vector<2x8x8xf32>
    %c3 = arith.constant 3 : index
    %c0_9 = arith.constant 0 : index
    %c0_10 = arith.constant 0 : index
    %c0_11 = arith.constant 0 : index
    %6 = vector.load %arg1[%c3, %c0_9, %c0_10, %c0_11] : memref<4x2x8x8xf32, #tpu.memory_space<vmem>>, vector<1x2x8x8xf32>
    %7 = vector.shape_cast %6 : vector<1x2x8x8xf32> to vector<2x8x8xf32>
    %c0_12 = arith.constant 0 : index
    %c0_13 = arith.constant 0 : index
    %c0_14 = arith.constant 0 : index
    %c0_15 = arith.constant 0 : index
    %8 = vector.load %arg2[%c0_12, %c0_13, %c0_14, %c0_15] : memref<4x2x8x8xf32, #tpu.memory_space<vmem>>, vector<1x2x8x8xf32>
    %9 = vector.shape_cast %8 : vector<1x2x8x8xf32> to vector<2x8x8xf32>
    %c1_16 = arith.constant 1 : index
    %c0_17 = arith.constant 0 : index
    %c0_18 = arith.constant 0 : index
    %c0_19 = arith.constant 0 : index
    %10 = vector.load %arg2[%c1_16, %c0_17, %c0_18, %c0_19] : memref<4x2x8x8xf32, #tpu.memory_space<vmem>>, vector<1x2x8x8xf32>
    %11 = vector.shape_cast %10 : vector<1x2x8x8xf32> to vector<2x8x8xf32>
    %c2_20 = arith.constant 2 : index
    %c0_21 = arith.constant 0 : index
    %c0_22 = arith.constant 0 : index
    %c0_23 = arith.constant 0 : index
    %12 = vector.load %arg2[%c2_20, %c0_21, %c0_22, %c0_23] : memref<4x2x8x8xf32, #tpu.memory_space<vmem>>, vector<1x2x8x8xf32>
    %13 = vector.shape_cast %12 : vector<1x2x8x8xf32> to vector<2x8x8xf32>
    %c3_24 = arith.constant 3 : index
    %c0_25 = arith.constant 0 : index
    %c0_26 = arith.constant 0 : index
    %c0_27 = arith.constant 0 : index
    %14 = vector.load %arg2[%c3_24, %c0_25, %c0_26, %c0_27] : memref<4x2x8x8xf32, #tpu.memory_space<vmem>>, vector<1x2x8x8xf32>
    %15 = vector.shape_cast %14 : vector<1x2x8x8xf32> to vector<2x8x8xf32>
    %16 = vector.extract_strided_slice %1 {offsets = [0, 1, 0], sizes = [2, 1, 8], strides = [1, 1, 1]} : vector<2x8x8xf32> to vector<2x1x8xf32>
    %17 = vector.extract_strided_slice %1 {offsets = [0, 7, 0], sizes = [2, 1, 8], strides = [1, 1, 1]} : vector<2x8x8xf32> to vector<2x1x8xf32>
    %18 = tpu.concatenate %16, %1, %17 in 1 : vector<2x1x8xf32>, vector<2x8x8xf32>, vector<2x1x8xf32> -> vector<2x10x8xf32>
    %19 = vector.extract_strided_slice %5 {offsets = [0, 0, 0], sizes = [2, 1, 8], strides = [1, 1, 1]} : vector<2x8x8xf32> to vector<2x1x8xf32>
    %20 = tpu.concatenate %19, %5 in 1 : vector<2x1x8xf32>, vector<2x8x8xf32> -> vector<2x9x8xf32>
    %21 = vector.extract_strided_slice %18 {offsets = [0, 0, 0], sizes = [2, 8, 8], strides = [1, 1, 1]} : vector<2x10x8xf32> to vector<2x8x8xf32>
    %22 = vector.extract_strided_slice %18 {offsets = [0, 1, 0], sizes = [2, 8, 8], strides = [1, 1, 1]} : vector<2x10x8xf32> to vector<2x8x8xf32>
    %cst = arith.constant 6.000000e+00 : f32
    %23 = vector.broadcast %cst : f32 to vector<2x8x8xf32>
    %24 = arith.mulf %23, %22 : vector<2x8x8xf32>
    %25 = arith.addf %21, %24 : vector<2x8x8xf32>
    %26 = vector.extract_strided_slice %18 {offsets = [0, 2, 0], sizes = [2, 8, 8], strides = [1, 1, 1]} : vector<2x10x8xf32> to vector<2x8x8xf32>
    %27 = arith.addf %25, %26 : vector<2x8x8xf32>
    %28 = vector.extract_strided_slice %20 {offsets = [0, 0, 0], sizes = [2, 8, 8], strides = [1, 1, 1]} : vector<2x9x8xf32> to vector<2x8x8xf32>
    %cst_28 = arith.constant 4.000000e+00 : f32
    %29 = vector.broadcast %cst_28 : f32 to vector<2x8x8xf32>
    %30 = arith.mulf %29, %28 : vector<2x8x8xf32>
    %31 = arith.addf %27, %30 : vector<2x8x8xf32>
    %32 = vector.extract_strided_slice %20 {offsets = [0, 1, 0], sizes = [2, 8, 8], strides = [1, 1, 1]} : vector<2x9x8xf32> to vector<2x8x8xf32>
    %cst_29 = arith.constant 4.000000e+00 : f32
    %33 = vector.broadcast %cst_29 : f32 to vector<2x8x8xf32>
    %34 = arith.mulf %33, %32 : vector<2x8x8xf32>
    %35 = arith.addf %31, %34 : vector<2x8x8xf32>
    %36 = vector.extract_strided_slice %3 {offsets = [0, 1, 0], sizes = [2, 1, 8], strides = [1, 1, 1]} : vector<2x8x8xf32> to vector<2x1x8xf32>
    %37 = vector.extract_strided_slice %3 {offsets = [0, 7, 0], sizes = [2, 1, 8], strides = [1, 1, 1]} : vector<2x8x8xf32> to vector<2x1x8xf32>
    %38 = tpu.concatenate %36, %3, %37 in 1 : vector<2x1x8xf32>, vector<2x8x8xf32>, vector<2x1x8xf32> -> vector<2x10x8xf32>
    %39 = vector.extract_strided_slice %7 {offsets = [0, 0, 0], sizes = [2, 1, 8], strides = [1, 1, 1]} : vector<2x8x8xf32> to vector<2x1x8xf32>
    %40 = tpu.concatenate %39, %7 in 1 : vector<2x1x8xf32>, vector<2x8x8xf32> -> vector<2x9x8xf32>
    %41 = vector.extract_strided_slice %38 {offsets = [0, 0, 0], sizes = [2, 8, 8], strides = [1, 1, 1]} : vector<2x10x8xf32> to vector<2x8x8xf32>
    %42 = vector.extract_strided_slice %38 {offsets = [0, 1, 0], sizes = [2, 8, 8], strides = [1, 1, 1]} : vector<2x10x8xf32> to vector<2x8x8xf32>
    %cst_30 = arith.constant 6.000000e+00 : f32
    %43 = vector.broadcast %cst_30 : f32 to vector<2x8x8xf32>
    %44 = arith.mulf %43, %42 : vector<2x8x8xf32>
    %45 = arith.addf %41, %44 : vector<2x8x8xf32>
    %46 = vector.extract_strided_slice %38 {offsets = [0, 2, 0], sizes = [2, 8, 8], strides = [1, 1, 1]} : vector<2x10x8xf32> to vector<2x8x8xf32>
    %47 = arith.addf %45, %46 : vector<2x8x8xf32>
    %48 = vector.extract_strided_slice %40 {offsets = [0, 0, 0], sizes = [2, 8, 8], strides = [1, 1, 1]} : vector<2x9x8xf32> to vector<2x8x8xf32>
    %cst_31 = arith.constant 4.000000e+00 : f32
    %49 = vector.broadcast %cst_31 : f32 to vector<2x8x8xf32>
    %50 = arith.mulf %49, %48 : vector<2x8x8xf32>
    %51 = arith.addf %47, %50 : vector<2x8x8xf32>
    %52 = vector.extract_strided_slice %40 {offsets = [0, 1, 0], sizes = [2, 8, 8], strides = [1, 1, 1]} : vector<2x9x8xf32> to vector<2x8x8xf32>
    %cst_32 = arith.constant 4.000000e+00 : f32
    %53 = vector.broadcast %cst_32 : f32 to vector<2x8x8xf32>
    %54 = arith.mulf %53, %52 : vector<2x8x8xf32>
    %55 = arith.addf %51, %54 : vector<2x8x8xf32>
    %56 = vector.extract_strided_slice %35 {offsets = [0, 0, 1], sizes = [2, 8, 1], strides = [1, 1, 1]} : vector<2x8x8xf32> to vector<2x8x1xf32>
    %57 = vector.extract_strided_slice %35 {offsets = [0, 0, 7], sizes = [2, 8, 1], strides = [1, 1, 1]} : vector<2x8x8xf32> to vector<2x8x1xf32>
    %58 = tpu.concatenate %56, %35, %57 in 2 : vector<2x8x1xf32>, vector<2x8x8xf32>, vector<2x8x1xf32> -> vector<2x8x10xf32>
    %59 = vector.extract_strided_slice %55 {offsets = [0, 0, 0], sizes = [2, 8, 1], strides = [1, 1, 1]} : vector<2x8x8xf32> to vector<2x8x1xf32>
    %60 = tpu.concatenate %59, %55 in 2 : vector<2x8x1xf32>, vector<2x8x8xf32> -> vector<2x8x9xf32>
    %61 = vector.extract_strided_slice %58 {offsets = [0, 0, 0], sizes = [2, 8, 8], strides = [1, 1, 1]} : vector<2x8x10xf32> to vector<2x8x8xf32>
    %62 = vector.extract_strided_slice %58 {offsets = [0, 0, 1], sizes = [2, 8, 8], strides = [1, 1, 1]} : vector<2x8x10xf32> to vector<2x8x8xf32>
    %cst_33 = arith.constant 6.000000e+00 : f32
    %63 = vector.broadcast %cst_33 : f32 to vector<2x8x8xf32>
    %64 = arith.mulf %63, %62 : vector<2x8x8xf32>
    %65 = arith.addf %61, %64 : vector<2x8x8xf32>
    %66 = vector.extract_strided_slice %58 {offsets = [0, 0, 2], sizes = [2, 8, 8], strides = [1, 1, 1]} : vector<2x8x10xf32> to vector<2x8x8xf32>
    %67 = arith.addf %65, %66 : vector<2x8x8xf32>
    %68 = vector.extract_strided_slice %60 {offsets = [0, 0, 0], sizes = [2, 8, 8], strides = [1, 1, 1]} : vector<2x8x9xf32> to vector<2x8x8xf32>
    %cst_34 = arith.constant 4.000000e+00 : f32
    %69 = vector.broadcast %cst_34 : f32 to vector<2x8x8xf32>
    %70 = arith.mulf %69, %68 : vector<2x8x8xf32>
    %71 = arith.addf %67, %70 : vector<2x8x8xf32>
    %72 = vector.extract_strided_slice %60 {offsets = [0, 0, 1], sizes = [2, 8, 8], strides = [1, 1, 1]} : vector<2x8x9xf32> to vector<2x8x8xf32>
    %cst_35 = arith.constant 4.000000e+00 : f32
    %73 = vector.broadcast %cst_35 : f32 to vector<2x8x8xf32>
    %74 = arith.mulf %73, %72 : vector<2x8x8xf32>
    %75 = arith.addf %71, %74 : vector<2x8x8xf32>
    %cst_36 = arith.constant 3.906250e-03 : f32
    %76 = vector.broadcast %cst_36 : f32 to vector<2x8x8xf32>
    %77 = arith.mulf %75, %76 : vector<2x8x8xf32>
    %78 = vector.extract_strided_slice %9 {offsets = [0, 1, 0], sizes = [2, 1, 8], strides = [1, 1, 1]} : vector<2x8x8xf32> to vector<2x1x8xf32>
    %79 = vector.extract_strided_slice %9 {offsets = [0, 7, 0], sizes = [2, 1, 8], strides = [1, 1, 1]} : vector<2x8x8xf32> to vector<2x1x8xf32>
    %80 = tpu.concatenate %78, %9, %79 in 1 : vector<2x1x8xf32>, vector<2x8x8xf32>, vector<2x1x8xf32> -> vector<2x10x8xf32>
    %81 = vector.extract_strided_slice %13 {offsets = [0, 0, 0], sizes = [2, 1, 8], strides = [1, 1, 1]} : vector<2x8x8xf32> to vector<2x1x8xf32>
    %82 = tpu.concatenate %81, %13 in 1 : vector<2x1x8xf32>, vector<2x8x8xf32> -> vector<2x9x8xf32>
    %83 = vector.extract_strided_slice %80 {offsets = [0, 0, 0], sizes = [2, 8, 8], strides = [1, 1, 1]} : vector<2x10x8xf32> to vector<2x8x8xf32>
    %84 = vector.extract_strided_slice %80 {offsets = [0, 1, 0], sizes = [2, 8, 8], strides = [1, 1, 1]} : vector<2x10x8xf32> to vector<2x8x8xf32>
    %cst_37 = arith.constant 6.000000e+00 : f32
    %85 = vector.broadcast %cst_37 : f32 to vector<2x8x8xf32>
    %86 = arith.mulf %85, %84 : vector<2x8x8xf32>
    %87 = arith.addf %83, %86 : vector<2x8x8xf32>
    %88 = vector.extract_strided_slice %80 {offsets = [0, 2, 0], sizes = [2, 8, 8], strides = [1, 1, 1]} : vector<2x10x8xf32> to vector<2x8x8xf32>
    %89 = arith.addf %87, %88 : vector<2x8x8xf32>
    %90 = vector.extract_strided_slice %82 {offsets = [0, 0, 0], sizes = [2, 8, 8], strides = [1, 1, 1]} : vector<2x9x8xf32> to vector<2x8x8xf32>
    %cst_38 = arith.constant 4.000000e+00 : f32
    %91 = vector.broadcast %cst_38 : f32 to vector<2x8x8xf32>
    %92 = arith.mulf %91, %90 : vector<2x8x8xf32>
    %93 = arith.addf %89, %92 : vector<2x8x8xf32>
    %94 = vector.extract_strided_slice %82 {offsets = [0, 1, 0], sizes = [2, 8, 8], strides = [1, 1, 1]} : vector<2x9x8xf32> to vector<2x8x8xf32>
    %cst_39 = arith.constant 4.000000e+00 : f32
    %95 = vector.broadcast %cst_39 : f32 to vector<2x8x8xf32>
    %96 = arith.mulf %95, %94 : vector<2x8x8xf32>
    %97 = arith.addf %93, %96 : vector<2x8x8xf32>
    %98 = vector.extract_strided_slice %11 {offsets = [0, 1, 0], sizes = [2, 1, 8], strides = [1, 1, 1]} : vector<2x8x8xf32> to vector<2x1x8xf32>
    %99 = vector.extract_strided_slice %11 {offsets = [0, 7, 0], sizes = [2, 1, 8], strides = [1, 1, 1]} : vector<2x8x8xf32> to vector<2x1x8xf32>
    %100 = tpu.concatenate %98, %11, %99 in 1 : vector<2x1x8xf32>, vector<2x8x8xf32>, vector<2x1x8xf32> -> vector<2x10x8xf32>
    %101 = vector.extract_strided_slice %15 {offsets = [0, 0, 0], sizes = [2, 1, 8], strides = [1, 1, 1]} : vector<2x8x8xf32> to vector<2x1x8xf32>
    %102 = tpu.concatenate %101, %15 in 1 : vector<2x1x8xf32>, vector<2x8x8xf32> -> vector<2x9x8xf32>
    %103 = vector.extract_strided_slice %100 {offsets = [0, 0, 0], sizes = [2, 8, 8], strides = [1, 1, 1]} : vector<2x10x8xf32> to vector<2x8x8xf32>
    %104 = vector.extract_strided_slice %100 {offsets = [0, 1, 0], sizes = [2, 8, 8], strides = [1, 1, 1]} : vector<2x10x8xf32> to vector<2x8x8xf32>
    %cst_40 = arith.constant 6.000000e+00 : f32
    %105 = vector.broadcast %cst_40 : f32 to vector<2x8x8xf32>
    %106 = arith.mulf %105, %104 : vector<2x8x8xf32>
    %107 = arith.addf %103, %106 : vector<2x8x8xf32>
    %108 = vector.extract_strided_slice %100 {offsets = [0, 2, 0], sizes = [2, 8, 8], strides = [1, 1, 1]} : vector<2x10x8xf32> to vector<2x8x8xf32>
    %109 = arith.addf %107, %108 : vector<2x8x8xf32>
    %110 = vector.extract_strided_slice %102 {offsets = [0, 0, 0], sizes = [2, 8, 8], strides = [1, 1, 1]} : vector<2x9x8xf32> to vector<2x8x8xf32>
    %cst_41 = arith.constant 4.000000e+00 : f32
    %111 = vector.broadcast %cst_41 : f32 to vector<2x8x8xf32>
    %112 = arith.mulf %111, %110 : vector<2x8x8xf32>
    %113 = arith.addf %109, %112 : vector<2x8x8xf32>
    %114 = vector.extract_strided_slice %102 {offsets = [0, 1, 0], sizes = [2, 8, 8], strides = [1, 1, 1]} : vector<2x9x8xf32> to vector<2x8x8xf32>
    %cst_42 = arith.constant 4.000000e+00 : f32
    %115 = vector.broadcast %cst_42 : f32 to vector<2x8x8xf32>
    %116 = arith.mulf %115, %114 : vector<2x8x8xf32>
    %117 = arith.addf %113, %116 : vector<2x8x8xf32>
    %118 = vector.extract_strided_slice %97 {offsets = [0, 0, 1], sizes = [2, 8, 1], strides = [1, 1, 1]} : vector<2x8x8xf32> to vector<2x8x1xf32>
    %119 = vector.extract_strided_slice %97 {offsets = [0, 0, 7], sizes = [2, 8, 1], strides = [1, 1, 1]} : vector<2x8x8xf32> to vector<2x8x1xf32>
    %120 = tpu.concatenate %118, %97, %119 in 2 : vector<2x8x1xf32>, vector<2x8x8xf32>, vector<2x8x1xf32> -> vector<2x8x10xf32>
    %121 = vector.extract_strided_slice %117 {offsets = [0, 0, 0], sizes = [2, 8, 1], strides = [1, 1, 1]} : vector<2x8x8xf32> to vector<2x8x1xf32>
    %122 = tpu.concatenate %121, %117 in 2 : vector<2x8x1xf32>, vector<2x8x8xf32> -> vector<2x8x9xf32>
    %123 = vector.extract_strided_slice %120 {offsets = [0, 0, 0], sizes = [2, 8, 8], strides = [1, 1, 1]} : vector<2x8x10xf32> to vector<2x8x8xf32>
    %124 = vector.extract_strided_slice %120 {offsets = [0, 0, 1], sizes = [2, 8, 8], strides = [1, 1, 1]} : vector<2x8x10xf32> to vector<2x8x8xf32>
    %cst_43 = arith.constant 6.000000e+00 : f32
    %125 = vector.broadcast %cst_43 : f32 to vector<2x8x8xf32>
    %126 = arith.mulf %125, %124 : vector<2x8x8xf32>
    %127 = arith.addf %123, %126 : vector<2x8x8xf32>
    %128 = vector.extract_strided_slice %120 {offsets = [0, 0, 2], sizes = [2, 8, 8], strides = [1, 1, 1]} : vector<2x8x10xf32> to vector<2x8x8xf32>
    %129 = arith.addf %127, %128 : vector<2x8x8xf32>
    %130 = vector.extract_strided_slice %122 {offsets = [0, 0, 0], sizes = [2, 8, 8], strides = [1, 1, 1]} : vector<2x8x9xf32> to vector<2x8x8xf32>
    %cst_44 = arith.constant 4.000000e+00 : f32
    %131 = vector.broadcast %cst_44 : f32 to vector<2x8x8xf32>
    %132 = arith.mulf %131, %130 : vector<2x8x8xf32>
    %133 = arith.addf %129, %132 : vector<2x8x8xf32>
    %134 = vector.extract_strided_slice %122 {offsets = [0, 0, 1], sizes = [2, 8, 8], strides = [1, 1, 1]} : vector<2x8x9xf32> to vector<2x8x8xf32>
    %cst_45 = arith.constant 4.000000e+00 : f32
    %135 = vector.broadcast %cst_45 : f32 to vector<2x8x8xf32>
    %136 = arith.mulf %135, %134 : vector<2x8x8xf32>
    %137 = arith.addf %133, %136 : vector<2x8x8xf32>
    %cst_46 = arith.constant 3.906250e-03 : f32
    %138 = vector.broadcast %cst_46 : f32 to vector<2x8x8xf32>
    %139 = arith.mulf %137, %138 : vector<2x8x8xf32>
    %c0_47 = arith.constant 0 : index
    %c0_48 = arith.constant 0 : index
    %c0_49 = arith.constant 0 : index
    %140 = vector.load %arg3[%c0_47, %c0_48, %c0_49] : memref<2x8x8xf32, #tpu.memory_space<vmem>>, vector<2x8x8xf32>
    tpu.vector_store %arg3[%c0_47, %c0_48, %c0_49], %77 {strides = array<i32>} : memref<2x8x8xf32, #tpu.memory_space<vmem>>, vector<2x8x8xf32>,
    %c0_50 = arith.constant 0 : index
    %c0_51 = arith.constant 0 : index
    %c0_52 = arith.constant 0 : index
    %141 = vector.load %arg4[%c0_50, %c0_51, %c0_52] : memref<2x8x8xf32, #tpu.memory_space<vmem>>, vector<2x8x8xf32>
    tpu.vector_store %arg4[%c0_50, %c0_51, %c0_52], %139 {strides = array<i32>} : memref<2x8x8xf32, #tpu.memory_space<vmem>>, vector<2x8x8xf32>,
    %142 = arith.subf %77, %139 : vector<2x8x8xf32>
    %143 = vector.extract_strided_slice %142 {offsets = [0, 1, 0], sizes = [2, 1, 8], strides = [1, 1, 1]} : vector<2x8x8xf32> to vector<2x1x8xf32>
    %144 = vector.extract_strided_slice %142 {offsets = [0, 7, 0], sizes = [2, 1, 8], strides = [1, 1, 1]} : vector<2x8x8xf32> to vector<2x1x8xf32>
    %145 = tpu.concatenate %143, %142, %144 in 1 : vector<2x1x8xf32>, vector<2x8x8xf32>, vector<2x1x8xf32> -> vector<2x10x8xf32>
    %146 = vector.extract_strided_slice %145 {offsets = [0, 0, 0], sizes = [2, 8, 8], strides = [1, 1, 1]} : vector<2x10x8xf32> to vector<2x8x8xf32>
    %147 = vector.extract_strided_slice %145 {offsets = [0, 1, 0], sizes = [2, 8, 8], strides = [1, 1, 1]} : vector<2x10x8xf32> to vector<2x8x8xf32>
    %cst_53 = arith.constant 6.000000e+00 : f32
    %148 = vector.broadcast %cst_53 : f32 to vector<2x8x8xf32>
    %149 = arith.mulf %148, %147 : vector<2x8x8xf32>
    %150 = arith.addf %146, %149 : vector<2x8x8xf32>
    %151 = vector.extract_strided_slice %145 {offsets = [0, 2, 0], sizes = [2, 8, 8], strides = [1, 1, 1]} : vector<2x10x8xf32> to vector<2x8x8xf32>
    %152 = arith.addf %150, %151 : vector<2x8x8xf32>
    %cst_54 = arith.constant 1.250000e-01 : f32
    %153 = vector.broadcast %cst_54 : f32 to vector<2x8x8xf32>
    %154 = arith.mulf %152, %153 : vector<2x8x8xf32>
    %155 = vector.extract_strided_slice %145 {offsets = [0, 1, 0], sizes = [2, 8, 8], strides = [1, 1, 1]} : vector<2x10x8xf32> to vector<2x8x8xf32>
    %156 = vector.extract_strided_slice %145 {offsets = [0, 2, 0], sizes = [2, 8, 8], strides = [1, 1, 1]} : vector<2x10x8xf32> to vector<2x8x8xf32>
    %157 = arith.addf %155, %156 : vector<2x8x8xf32>
    %cst_55 = arith.constant 5.000000e-01 : f32
    %158 = vector.broadcast %cst_55 : f32 to vector<2x8x8xf32>
    %159 = arith.mulf %157, %158 : vector<2x8x8xf32>
    %160 = vector.extract_strided_slice %154 {offsets = [0, 0, 1], sizes = [2, 8, 1], strides = [1, 1, 1]} : vector<2x8x8xf32> to vector<2x8x1xf32>
    %161 = vector.extract_strided_slice %154 {offsets = [0, 0, 7], sizes = [2, 8, 1], strides = [1, 1, 1]} : vector<2x8x8xf32> to vector<2x8x1xf32>
    %162 = tpu.concatenate %160, %154, %161 in 2 : vector<2x8x1xf32>, vector<2x8x8xf32>, vector<2x8x1xf32> -> vector<2x8x10xf32>
    %163 = vector.extract_strided_slice %159 {offsets = [0, 0, 1], sizes = [2, 8, 1], strides = [1, 1, 1]} : vector<2x8x8xf32> to vector<2x8x1xf32>
    %164 = vector.extract_strided_slice %159 {offsets = [0, 0, 7], sizes = [2, 8, 1], strides = [1, 1, 1]} : vector<2x8x8xf32> to vector<2x8x1xf32>
    %165 = tpu.concatenate %163, %159, %164 in 2 : vector<2x8x1xf32>, vector<2x8x8xf32>, vector<2x8x1xf32> -> vector<2x8x10xf32>
    %166 = vector.extract_strided_slice %162 {offsets = [0, 0, 0], sizes = [2, 8, 8], strides = [1, 1, 1]} : vector<2x8x10xf32> to vector<2x8x8xf32>
    %167 = vector.extract_strided_slice %162 {offsets = [0, 0, 1], sizes = [2, 8, 8], strides = [1, 1, 1]} : vector<2x8x10xf32> to vector<2x8x8xf32>
    %cst_56 = arith.constant 6.000000e+00 : f32
    %168 = vector.broadcast %cst_56 : f32 to vector<2x8x8xf32>
    %169 = arith.mulf %168, %167 : vector<2x8x8xf32>
    %170 = arith.addf %166, %169 : vector<2x8x8xf32>
    %171 = vector.extract_strided_slice %162 {offsets = [0, 0, 2], sizes = [2, 8, 8], strides = [1, 1, 1]} : vector<2x8x10xf32> to vector<2x8x8xf32>
    %172 = arith.addf %170, %171 : vector<2x8x8xf32>
    %cst_57 = arith.constant 1.250000e-01 : f32
    %173 = vector.broadcast %cst_57 : f32 to vector<2x8x8xf32>
    %174 = arith.mulf %172, %173 : vector<2x8x8xf32>
    %175 = vector.extract_strided_slice %162 {offsets = [0, 0, 1], sizes = [2, 8, 8], strides = [1, 1, 1]} : vector<2x8x10xf32> to vector<2x8x8xf32>
    %176 = vector.extract_strided_slice %162 {offsets = [0, 0, 2], sizes = [2, 8, 8], strides = [1, 1, 1]} : vector<2x8x10xf32> to vector<2x8x8xf32>
    %177 = arith.addf %175, %176 : vector<2x8x8xf32>
    %cst_58 = arith.constant 5.000000e-01 : f32
    %178 = vector.broadcast %cst_58 : f32 to vector<2x8x8xf32>
    %179 = arith.mulf %177, %178 : vector<2x8x8xf32>
    %180 = vector.extract_strided_slice %165 {offsets = [0, 0, 0], sizes = [2, 8, 8], strides = [1, 1, 1]} : vector<2x8x10xf32> to vector<2x8x8xf32>
    %181 = vector.extract_strided_slice %165 {offsets = [0, 0, 1], sizes = [2, 8, 8], strides = [1, 1, 1]} : vector<2x8x10xf32> to vector<2x8x8xf32>
    %cst_59 = arith.constant 6.000000e+00 : f32
    %182 = vector.broadcast %cst_59 : f32 to vector<2x8x8xf32>
    %183 = arith.mulf %182, %181 : vector<2x8x8xf32>
    %184 = arith.addf %180, %183 : vector<2x8x8xf32>
    %185 = vector.extract_strided_slice %165 {offsets = [0, 0, 2], sizes = [2, 8, 8], strides = [1, 1, 1]} : vector<2x8x10xf32> to vector<2x8x8xf32>
    %186 = arith.addf %184, %185 : vector<2x8x8xf32>
    %cst_60 = arith.constant 1.250000e-01 : f32
    %187 = vector.broadcast %cst_60 : f32 to vector<2x8x8xf32>
    %188 = arith.mulf %186, %187 : vector<2x8x8xf32>
    %189 = vector.extract_strided_slice %165 {offsets = [0, 0, 1], sizes = [2, 8, 8], strides = [1, 1, 1]} : vector<2x8x10xf32> to vector<2x8x8xf32>
    %190 = vector.extract_strided_slice %165 {offsets = [0, 0, 2], sizes = [2, 8, 8], strides = [1, 1, 1]} : vector<2x8x10xf32> to vector<2x8x8xf32>
    %191 = arith.addf %189, %190 : vector<2x8x8xf32>
    %cst_61 = arith.constant 5.000000e-01 : f32
    %192 = vector.broadcast %cst_61 : f32 to vector<2x8x8xf32>
    %193 = arith.mulf %191, %192 : vector<2x8x8xf32>
    %194 = arith.subf %1, %9 : vector<2x8x8xf32>
    %195 = arith.subf %194, %174 : vector<2x8x8xf32>
    %196 = math.absf %195 : vector<2x8x8xf32>
    %197 = arith.subf %3, %11 : vector<2x8x8xf32>
    %198 = arith.subf %197, %179 : vector<2x8x8xf32>
    %199 = math.absf %198 : vector<2x8x8xf32>
    %200 = arith.addf %196, %199 : vector<2x8x8xf32>
    %201 = arith.subf %5, %13 : vector<2x8x8xf32>
    %202 = arith.subf %201, %188 : vector<2x8x8xf32>
    %203 = math.absf %202 : vector<2x8x8xf32>
    %204 = arith.addf %200, %203 : vector<2x8x8xf32>
    %205 = arith.subf %7, %15 : vector<2x8x8xf32>
    %206 = arith.subf %205, %193 : vector<2x8x8xf32>
    %207 = math.absf %206 : vector<2x8x8xf32>
    %208 = arith.addf %204, %207 : vector<2x8x8xf32>
    %209 = vector.shape_cast %208 : vector<2x8x8xf32> to vector<1x2x8x8xf32>
    %cst_62 = arith.constant dense<0.000000e+00> : vector<1xf32>
    %210 = vector.multi_reduction <add>, %209, %cst_62 [1, 2, 3] : vector<1x2x8x8xf32> to vector<1xf32>
    %211 = vector.shape_cast %210 : vector<1xf32> to vector<1x1x1x1xf32>
    %212 = vector.extract %211[0, 0, 0, 0] : f32 from vector<1x1x1x1xf32>
    %213 = vector.broadcast %212 : f32 to vector<1x8x128xf32>
    %c0_63 = arith.constant 0 : index
    %c0_64 = arith.constant 0 : index
    %c0_65 = arith.constant 0 : index
    %214 = vector.load %arg5[%c0_63, %c0_64, %c0_65] : memref<1x8x128xf32, #tpu.memory_space<vmem>>, vector<1x8x128xf32>
    tpu.vector_store %arg5[%c0_63, %c0_64, %c0_65], %213 {strides = array<i32>} : memref<1x8x128xf32, #tpu.memory_space<vmem>>, vector<1x8x128xf32>,
    return
  }
  func.func @transform_0(%arg0: i32) -> (i32, i32, i32, i32) {
    %c0_i32 = arith.constant 0 : i32
    %c0_i32_0 = arith.constant 0 : i32
    %c0_i32_1 = arith.constant 0 : i32
    %c0_i32_2 = arith.constant 0 : i32
    return %c0_i32, %arg0, %c0_i32_0, %c0_i32_1 : i32, i32, i32, i32
  }
  func.func @transform_1(%arg0: i32) -> (i32, i32, i32, i32) {
    %c0_i32 = arith.constant 0 : i32
    %c0_i32_0 = arith.constant 0 : i32
    %c0_i32_1 = arith.constant 0 : i32
    %c0_i32_2 = arith.constant 0 : i32
    return %c0_i32, %arg0, %c0_i32_0, %c0_i32_1 : i32, i32, i32, i32
  }
  func.func @transform_2(%arg0: i32) -> (i32, i32, i32) {
    %c0_i32 = arith.constant 0 : i32
    %c0_i32_0 = arith.constant 0 : i32
    %c0_i32_1 = arith.constant 0 : i32
    return %arg0, %c0_i32, %c0_i32_0 : i32, i32, i32
  }
  func.func @transform_3(%arg0: i32) -> (i32, i32, i32) {
    %c0_i32 = arith.constant 0 : i32
    %c0_i32_0 = arith.constant 0 : i32
    %c0_i32_1 = arith.constant 0 : i32
    return %arg0, %c0_i32, %c0_i32_0 : i32, i32, i32
  }
  func.func @transform_4(%arg0: i32) -> (i32, i32, i32) {
    %c0_i32 = arith.constant 0 : i32
    %c0_i32_0 = arith.constant 0 : i32
    %c0_i32_1 = arith.constant 0 : i32
    return %arg0, %c0_i32, %c0_i32_0 : i32, i32, i32
  }
}

module attributes {stable_mosaic.version = 11 : i64} {
  func.func @_lap_level_kernel(%arg0: i32, %arg1: memref<4x2x4x4xf32, #tpu.memory_space<vmem>>, %arg2: memref<4x2x4x4xf32, #tpu.memory_space<vmem>>, %arg3: memref<2x4x4xf32, #tpu.memory_space<vmem>>, %arg4: memref<2x4x4xf32, #tpu.memory_space<vmem>>, %arg5: memref<1x8x128xf32, #tpu.memory_space<vmem>>) attributes {dimension_semantics = [#tpu.dimension_semantics<parallel>], iteration_bounds = array<i64: 4>, scalar_prefetch = 0 : i64, scratch_operands = 0 : i64, tpu.core_type = #tpu.core_type<tc>, window_params = [{transform_indices = @transform_0, window_bounds = array<i64: 4, 2, 4, 4>}, {transform_indices = @transform_1, window_bounds = array<i64: 4, 2, 4, 4>}, {transform_indices = @transform_2, window_bounds = array<i64: 2, 4, 4>}, {transform_indices = @transform_3, window_bounds = array<i64: 2, 4, 4>}, {transform_indices = @transform_4, window_bounds = array<i64: 1, 8, 128>}]} {
    %c0 = arith.constant 0 : index
    %c0_0 = arith.constant 0 : index
    %c0_1 = arith.constant 0 : index
    %c0_2 = arith.constant 0 : index
    %0 = vector.load %arg1[%c0, %c0_0, %c0_1, %c0_2] : memref<4x2x4x4xf32, #tpu.memory_space<vmem>>, vector<1x2x4x4xf32>
    %1 = vector.shape_cast %0 : vector<1x2x4x4xf32> to vector<2x4x4xf32>
    %c1 = arith.constant 1 : index
    %c0_3 = arith.constant 0 : index
    %c0_4 = arith.constant 0 : index
    %c0_5 = arith.constant 0 : index
    %2 = vector.load %arg1[%c1, %c0_3, %c0_4, %c0_5] : memref<4x2x4x4xf32, #tpu.memory_space<vmem>>, vector<1x2x4x4xf32>
    %3 = vector.shape_cast %2 : vector<1x2x4x4xf32> to vector<2x4x4xf32>
    %c2 = arith.constant 2 : index
    %c0_6 = arith.constant 0 : index
    %c0_7 = arith.constant 0 : index
    %c0_8 = arith.constant 0 : index
    %4 = vector.load %arg1[%c2, %c0_6, %c0_7, %c0_8] : memref<4x2x4x4xf32, #tpu.memory_space<vmem>>, vector<1x2x4x4xf32>
    %5 = vector.shape_cast %4 : vector<1x2x4x4xf32> to vector<2x4x4xf32>
    %c3 = arith.constant 3 : index
    %c0_9 = arith.constant 0 : index
    %c0_10 = arith.constant 0 : index
    %c0_11 = arith.constant 0 : index
    %6 = vector.load %arg1[%c3, %c0_9, %c0_10, %c0_11] : memref<4x2x4x4xf32, #tpu.memory_space<vmem>>, vector<1x2x4x4xf32>
    %7 = vector.shape_cast %6 : vector<1x2x4x4xf32> to vector<2x4x4xf32>
    %c0_12 = arith.constant 0 : index
    %c0_13 = arith.constant 0 : index
    %c0_14 = arith.constant 0 : index
    %c0_15 = arith.constant 0 : index
    %8 = vector.load %arg2[%c0_12, %c0_13, %c0_14, %c0_15] : memref<4x2x4x4xf32, #tpu.memory_space<vmem>>, vector<1x2x4x4xf32>
    %9 = vector.shape_cast %8 : vector<1x2x4x4xf32> to vector<2x4x4xf32>
    %c1_16 = arith.constant 1 : index
    %c0_17 = arith.constant 0 : index
    %c0_18 = arith.constant 0 : index
    %c0_19 = arith.constant 0 : index
    %10 = vector.load %arg2[%c1_16, %c0_17, %c0_18, %c0_19] : memref<4x2x4x4xf32, #tpu.memory_space<vmem>>, vector<1x2x4x4xf32>
    %11 = vector.shape_cast %10 : vector<1x2x4x4xf32> to vector<2x4x4xf32>
    %c2_20 = arith.constant 2 : index
    %c0_21 = arith.constant 0 : index
    %c0_22 = arith.constant 0 : index
    %c0_23 = arith.constant 0 : index
    %12 = vector.load %arg2[%c2_20, %c0_21, %c0_22, %c0_23] : memref<4x2x4x4xf32, #tpu.memory_space<vmem>>, vector<1x2x4x4xf32>
    %13 = vector.shape_cast %12 : vector<1x2x4x4xf32> to vector<2x4x4xf32>
    %c3_24 = arith.constant 3 : index
    %c0_25 = arith.constant 0 : index
    %c0_26 = arith.constant 0 : index
    %c0_27 = arith.constant 0 : index
    %14 = vector.load %arg2[%c3_24, %c0_25, %c0_26, %c0_27] : memref<4x2x4x4xf32, #tpu.memory_space<vmem>>, vector<1x2x4x4xf32>
    %15 = vector.shape_cast %14 : vector<1x2x4x4xf32> to vector<2x4x4xf32>
    %16 = vector.extract_strided_slice %1 {offsets = [0, 1, 0], sizes = [2, 1, 4], strides = [1, 1, 1]} : vector<2x4x4xf32> to vector<2x1x4xf32>
    %17 = vector.extract_strided_slice %1 {offsets = [0, 3, 0], sizes = [2, 1, 4], strides = [1, 1, 1]} : vector<2x4x4xf32> to vector<2x1x4xf32>
    %18 = tpu.concatenate %16, %1, %17 in 1 : vector<2x1x4xf32>, vector<2x4x4xf32>, vector<2x1x4xf32> -> vector<2x6x4xf32>
    %19 = vector.extract_strided_slice %5 {offsets = [0, 0, 0], sizes = [2, 1, 4], strides = [1, 1, 1]} : vector<2x4x4xf32> to vector<2x1x4xf32>
    %20 = tpu.concatenate %19, %5 in 1 : vector<2x1x4xf32>, vector<2x4x4xf32> -> vector<2x5x4xf32>
    %21 = vector.extract_strided_slice %18 {offsets = [0, 0, 0], sizes = [2, 4, 4], strides = [1, 1, 1]} : vector<2x6x4xf32> to vector<2x4x4xf32>
    %22 = vector.extract_strided_slice %18 {offsets = [0, 1, 0], sizes = [2, 4, 4], strides = [1, 1, 1]} : vector<2x6x4xf32> to vector<2x4x4xf32>
    %cst = arith.constant 6.000000e+00 : f32
    %23 = vector.broadcast %cst : f32 to vector<2x4x4xf32>
    %24 = arith.mulf %23, %22 : vector<2x4x4xf32>
    %25 = arith.addf %21, %24 : vector<2x4x4xf32>
    %26 = vector.extract_strided_slice %18 {offsets = [0, 2, 0], sizes = [2, 4, 4], strides = [1, 1, 1]} : vector<2x6x4xf32> to vector<2x4x4xf32>
    %27 = arith.addf %25, %26 : vector<2x4x4xf32>
    %28 = vector.extract_strided_slice %20 {offsets = [0, 0, 0], sizes = [2, 4, 4], strides = [1, 1, 1]} : vector<2x5x4xf32> to vector<2x4x4xf32>
    %cst_28 = arith.constant 4.000000e+00 : f32
    %29 = vector.broadcast %cst_28 : f32 to vector<2x4x4xf32>
    %30 = arith.mulf %29, %28 : vector<2x4x4xf32>
    %31 = arith.addf %27, %30 : vector<2x4x4xf32>
    %32 = vector.extract_strided_slice %20 {offsets = [0, 1, 0], sizes = [2, 4, 4], strides = [1, 1, 1]} : vector<2x5x4xf32> to vector<2x4x4xf32>
    %cst_29 = arith.constant 4.000000e+00 : f32
    %33 = vector.broadcast %cst_29 : f32 to vector<2x4x4xf32>
    %34 = arith.mulf %33, %32 : vector<2x4x4xf32>
    %35 = arith.addf %31, %34 : vector<2x4x4xf32>
    %36 = vector.extract_strided_slice %3 {offsets = [0, 1, 0], sizes = [2, 1, 4], strides = [1, 1, 1]} : vector<2x4x4xf32> to vector<2x1x4xf32>
    %37 = vector.extract_strided_slice %3 {offsets = [0, 3, 0], sizes = [2, 1, 4], strides = [1, 1, 1]} : vector<2x4x4xf32> to vector<2x1x4xf32>
    %38 = tpu.concatenate %36, %3, %37 in 1 : vector<2x1x4xf32>, vector<2x4x4xf32>, vector<2x1x4xf32> -> vector<2x6x4xf32>
    %39 = vector.extract_strided_slice %7 {offsets = [0, 0, 0], sizes = [2, 1, 4], strides = [1, 1, 1]} : vector<2x4x4xf32> to vector<2x1x4xf32>
    %40 = tpu.concatenate %39, %7 in 1 : vector<2x1x4xf32>, vector<2x4x4xf32> -> vector<2x5x4xf32>
    %41 = vector.extract_strided_slice %38 {offsets = [0, 0, 0], sizes = [2, 4, 4], strides = [1, 1, 1]} : vector<2x6x4xf32> to vector<2x4x4xf32>
    %42 = vector.extract_strided_slice %38 {offsets = [0, 1, 0], sizes = [2, 4, 4], strides = [1, 1, 1]} : vector<2x6x4xf32> to vector<2x4x4xf32>
    %cst_30 = arith.constant 6.000000e+00 : f32
    %43 = vector.broadcast %cst_30 : f32 to vector<2x4x4xf32>
    %44 = arith.mulf %43, %42 : vector<2x4x4xf32>
    %45 = arith.addf %41, %44 : vector<2x4x4xf32>
    %46 = vector.extract_strided_slice %38 {offsets = [0, 2, 0], sizes = [2, 4, 4], strides = [1, 1, 1]} : vector<2x6x4xf32> to vector<2x4x4xf32>
    %47 = arith.addf %45, %46 : vector<2x4x4xf32>
    %48 = vector.extract_strided_slice %40 {offsets = [0, 0, 0], sizes = [2, 4, 4], strides = [1, 1, 1]} : vector<2x5x4xf32> to vector<2x4x4xf32>
    %cst_31 = arith.constant 4.000000e+00 : f32
    %49 = vector.broadcast %cst_31 : f32 to vector<2x4x4xf32>
    %50 = arith.mulf %49, %48 : vector<2x4x4xf32>
    %51 = arith.addf %47, %50 : vector<2x4x4xf32>
    %52 = vector.extract_strided_slice %40 {offsets = [0, 1, 0], sizes = [2, 4, 4], strides = [1, 1, 1]} : vector<2x5x4xf32> to vector<2x4x4xf32>
    %cst_32 = arith.constant 4.000000e+00 : f32
    %53 = vector.broadcast %cst_32 : f32 to vector<2x4x4xf32>
    %54 = arith.mulf %53, %52 : vector<2x4x4xf32>
    %55 = arith.addf %51, %54 : vector<2x4x4xf32>
    %56 = vector.extract_strided_slice %35 {offsets = [0, 0, 1], sizes = [2, 4, 1], strides = [1, 1, 1]} : vector<2x4x4xf32> to vector<2x4x1xf32>
    %57 = vector.extract_strided_slice %35 {offsets = [0, 0, 3], sizes = [2, 4, 1], strides = [1, 1, 1]} : vector<2x4x4xf32> to vector<2x4x1xf32>
    %58 = tpu.concatenate %56, %35, %57 in 2 : vector<2x4x1xf32>, vector<2x4x4xf32>, vector<2x4x1xf32> -> vector<2x4x6xf32>
    %59 = vector.extract_strided_slice %55 {offsets = [0, 0, 0], sizes = [2, 4, 1], strides = [1, 1, 1]} : vector<2x4x4xf32> to vector<2x4x1xf32>
    %60 = tpu.concatenate %59, %55 in 2 : vector<2x4x1xf32>, vector<2x4x4xf32> -> vector<2x4x5xf32>
    %61 = vector.extract_strided_slice %58 {offsets = [0, 0, 0], sizes = [2, 4, 4], strides = [1, 1, 1]} : vector<2x4x6xf32> to vector<2x4x4xf32>
    %62 = vector.extract_strided_slice %58 {offsets = [0, 0, 1], sizes = [2, 4, 4], strides = [1, 1, 1]} : vector<2x4x6xf32> to vector<2x4x4xf32>
    %cst_33 = arith.constant 6.000000e+00 : f32
    %63 = vector.broadcast %cst_33 : f32 to vector<2x4x4xf32>
    %64 = arith.mulf %63, %62 : vector<2x4x4xf32>
    %65 = arith.addf %61, %64 : vector<2x4x4xf32>
    %66 = vector.extract_strided_slice %58 {offsets = [0, 0, 2], sizes = [2, 4, 4], strides = [1, 1, 1]} : vector<2x4x6xf32> to vector<2x4x4xf32>
    %67 = arith.addf %65, %66 : vector<2x4x4xf32>
    %68 = vector.extract_strided_slice %60 {offsets = [0, 0, 0], sizes = [2, 4, 4], strides = [1, 1, 1]} : vector<2x4x5xf32> to vector<2x4x4xf32>
    %cst_34 = arith.constant 4.000000e+00 : f32
    %69 = vector.broadcast %cst_34 : f32 to vector<2x4x4xf32>
    %70 = arith.mulf %69, %68 : vector<2x4x4xf32>
    %71 = arith.addf %67, %70 : vector<2x4x4xf32>
    %72 = vector.extract_strided_slice %60 {offsets = [0, 0, 1], sizes = [2, 4, 4], strides = [1, 1, 1]} : vector<2x4x5xf32> to vector<2x4x4xf32>
    %cst_35 = arith.constant 4.000000e+00 : f32
    %73 = vector.broadcast %cst_35 : f32 to vector<2x4x4xf32>
    %74 = arith.mulf %73, %72 : vector<2x4x4xf32>
    %75 = arith.addf %71, %74 : vector<2x4x4xf32>
    %cst_36 = arith.constant 3.906250e-03 : f32
    %76 = vector.broadcast %cst_36 : f32 to vector<2x4x4xf32>
    %77 = arith.mulf %75, %76 : vector<2x4x4xf32>
    %78 = vector.extract_strided_slice %9 {offsets = [0, 1, 0], sizes = [2, 1, 4], strides = [1, 1, 1]} : vector<2x4x4xf32> to vector<2x1x4xf32>
    %79 = vector.extract_strided_slice %9 {offsets = [0, 3, 0], sizes = [2, 1, 4], strides = [1, 1, 1]} : vector<2x4x4xf32> to vector<2x1x4xf32>
    %80 = tpu.concatenate %78, %9, %79 in 1 : vector<2x1x4xf32>, vector<2x4x4xf32>, vector<2x1x4xf32> -> vector<2x6x4xf32>
    %81 = vector.extract_strided_slice %13 {offsets = [0, 0, 0], sizes = [2, 1, 4], strides = [1, 1, 1]} : vector<2x4x4xf32> to vector<2x1x4xf32>
    %82 = tpu.concatenate %81, %13 in 1 : vector<2x1x4xf32>, vector<2x4x4xf32> -> vector<2x5x4xf32>
    %83 = vector.extract_strided_slice %80 {offsets = [0, 0, 0], sizes = [2, 4, 4], strides = [1, 1, 1]} : vector<2x6x4xf32> to vector<2x4x4xf32>
    %84 = vector.extract_strided_slice %80 {offsets = [0, 1, 0], sizes = [2, 4, 4], strides = [1, 1, 1]} : vector<2x6x4xf32> to vector<2x4x4xf32>
    %cst_37 = arith.constant 6.000000e+00 : f32
    %85 = vector.broadcast %cst_37 : f32 to vector<2x4x4xf32>
    %86 = arith.mulf %85, %84 : vector<2x4x4xf32>
    %87 = arith.addf %83, %86 : vector<2x4x4xf32>
    %88 = vector.extract_strided_slice %80 {offsets = [0, 2, 0], sizes = [2, 4, 4], strides = [1, 1, 1]} : vector<2x6x4xf32> to vector<2x4x4xf32>
    %89 = arith.addf %87, %88 : vector<2x4x4xf32>
    %90 = vector.extract_strided_slice %82 {offsets = [0, 0, 0], sizes = [2, 4, 4], strides = [1, 1, 1]} : vector<2x5x4xf32> to vector<2x4x4xf32>
    %cst_38 = arith.constant 4.000000e+00 : f32
    %91 = vector.broadcast %cst_38 : f32 to vector<2x4x4xf32>
    %92 = arith.mulf %91, %90 : vector<2x4x4xf32>
    %93 = arith.addf %89, %92 : vector<2x4x4xf32>
    %94 = vector.extract_strided_slice %82 {offsets = [0, 1, 0], sizes = [2, 4, 4], strides = [1, 1, 1]} : vector<2x5x4xf32> to vector<2x4x4xf32>
    %cst_39 = arith.constant 4.000000e+00 : f32
    %95 = vector.broadcast %cst_39 : f32 to vector<2x4x4xf32>
    %96 = arith.mulf %95, %94 : vector<2x4x4xf32>
    %97 = arith.addf %93, %96 : vector<2x4x4xf32>
    %98 = vector.extract_strided_slice %11 {offsets = [0, 1, 0], sizes = [2, 1, 4], strides = [1, 1, 1]} : vector<2x4x4xf32> to vector<2x1x4xf32>
    %99 = vector.extract_strided_slice %11 {offsets = [0, 3, 0], sizes = [2, 1, 4], strides = [1, 1, 1]} : vector<2x4x4xf32> to vector<2x1x4xf32>
    %100 = tpu.concatenate %98, %11, %99 in 1 : vector<2x1x4xf32>, vector<2x4x4xf32>, vector<2x1x4xf32> -> vector<2x6x4xf32>
    %101 = vector.extract_strided_slice %15 {offsets = [0, 0, 0], sizes = [2, 1, 4], strides = [1, 1, 1]} : vector<2x4x4xf32> to vector<2x1x4xf32>
    %102 = tpu.concatenate %101, %15 in 1 : vector<2x1x4xf32>, vector<2x4x4xf32> -> vector<2x5x4xf32>
    %103 = vector.extract_strided_slice %100 {offsets = [0, 0, 0], sizes = [2, 4, 4], strides = [1, 1, 1]} : vector<2x6x4xf32> to vector<2x4x4xf32>
    %104 = vector.extract_strided_slice %100 {offsets = [0, 1, 0], sizes = [2, 4, 4], strides = [1, 1, 1]} : vector<2x6x4xf32> to vector<2x4x4xf32>
    %cst_40 = arith.constant 6.000000e+00 : f32
    %105 = vector.broadcast %cst_40 : f32 to vector<2x4x4xf32>
    %106 = arith.mulf %105, %104 : vector<2x4x4xf32>
    %107 = arith.addf %103, %106 : vector<2x4x4xf32>
    %108 = vector.extract_strided_slice %100 {offsets = [0, 2, 0], sizes = [2, 4, 4], strides = [1, 1, 1]} : vector<2x6x4xf32> to vector<2x4x4xf32>
    %109 = arith.addf %107, %108 : vector<2x4x4xf32>
    %110 = vector.extract_strided_slice %102 {offsets = [0, 0, 0], sizes = [2, 4, 4], strides = [1, 1, 1]} : vector<2x5x4xf32> to vector<2x4x4xf32>
    %cst_41 = arith.constant 4.000000e+00 : f32
    %111 = vector.broadcast %cst_41 : f32 to vector<2x4x4xf32>
    %112 = arith.mulf %111, %110 : vector<2x4x4xf32>
    %113 = arith.addf %109, %112 : vector<2x4x4xf32>
    %114 = vector.extract_strided_slice %102 {offsets = [0, 1, 0], sizes = [2, 4, 4], strides = [1, 1, 1]} : vector<2x5x4xf32> to vector<2x4x4xf32>
    %cst_42 = arith.constant 4.000000e+00 : f32
    %115 = vector.broadcast %cst_42 : f32 to vector<2x4x4xf32>
    %116 = arith.mulf %115, %114 : vector<2x4x4xf32>
    %117 = arith.addf %113, %116 : vector<2x4x4xf32>
    %118 = vector.extract_strided_slice %97 {offsets = [0, 0, 1], sizes = [2, 4, 1], strides = [1, 1, 1]} : vector<2x4x4xf32> to vector<2x4x1xf32>
    %119 = vector.extract_strided_slice %97 {offsets = [0, 0, 3], sizes = [2, 4, 1], strides = [1, 1, 1]} : vector<2x4x4xf32> to vector<2x4x1xf32>
    %120 = tpu.concatenate %118, %97, %119 in 2 : vector<2x4x1xf32>, vector<2x4x4xf32>, vector<2x4x1xf32> -> vector<2x4x6xf32>
    %121 = vector.extract_strided_slice %117 {offsets = [0, 0, 0], sizes = [2, 4, 1], strides = [1, 1, 1]} : vector<2x4x4xf32> to vector<2x4x1xf32>
    %122 = tpu.concatenate %121, %117 in 2 : vector<2x4x1xf32>, vector<2x4x4xf32> -> vector<2x4x5xf32>
    %123 = vector.extract_strided_slice %120 {offsets = [0, 0, 0], sizes = [2, 4, 4], strides = [1, 1, 1]} : vector<2x4x6xf32> to vector<2x4x4xf32>
    %124 = vector.extract_strided_slice %120 {offsets = [0, 0, 1], sizes = [2, 4, 4], strides = [1, 1, 1]} : vector<2x4x6xf32> to vector<2x4x4xf32>
    %cst_43 = arith.constant 6.000000e+00 : f32
    %125 = vector.broadcast %cst_43 : f32 to vector<2x4x4xf32>
    %126 = arith.mulf %125, %124 : vector<2x4x4xf32>
    %127 = arith.addf %123, %126 : vector<2x4x4xf32>
    %128 = vector.extract_strided_slice %120 {offsets = [0, 0, 2], sizes = [2, 4, 4], strides = [1, 1, 1]} : vector<2x4x6xf32> to vector<2x4x4xf32>
    %129 = arith.addf %127, %128 : vector<2x4x4xf32>
    %130 = vector.extract_strided_slice %122 {offsets = [0, 0, 0], sizes = [2, 4, 4], strides = [1, 1, 1]} : vector<2x4x5xf32> to vector<2x4x4xf32>
    %cst_44 = arith.constant 4.000000e+00 : f32
    %131 = vector.broadcast %cst_44 : f32 to vector<2x4x4xf32>
    %132 = arith.mulf %131, %130 : vector<2x4x4xf32>
    %133 = arith.addf %129, %132 : vector<2x4x4xf32>
    %134 = vector.extract_strided_slice %122 {offsets = [0, 0, 1], sizes = [2, 4, 4], strides = [1, 1, 1]} : vector<2x4x5xf32> to vector<2x4x4xf32>
    %cst_45 = arith.constant 4.000000e+00 : f32
    %135 = vector.broadcast %cst_45 : f32 to vector<2x4x4xf32>
    %136 = arith.mulf %135, %134 : vector<2x4x4xf32>
    %137 = arith.addf %133, %136 : vector<2x4x4xf32>
    %cst_46 = arith.constant 3.906250e-03 : f32
    %138 = vector.broadcast %cst_46 : f32 to vector<2x4x4xf32>
    %139 = arith.mulf %137, %138 : vector<2x4x4xf32>
    %c0_47 = arith.constant 0 : index
    %c0_48 = arith.constant 0 : index
    %c0_49 = arith.constant 0 : index
    %140 = vector.load %arg3[%c0_47, %c0_48, %c0_49] : memref<2x4x4xf32, #tpu.memory_space<vmem>>, vector<2x4x4xf32>
    tpu.vector_store %arg3[%c0_47, %c0_48, %c0_49], %77 {strides = array<i32>} : memref<2x4x4xf32, #tpu.memory_space<vmem>>, vector<2x4x4xf32>,
    %c0_50 = arith.constant 0 : index
    %c0_51 = arith.constant 0 : index
    %c0_52 = arith.constant 0 : index
    %141 = vector.load %arg4[%c0_50, %c0_51, %c0_52] : memref<2x4x4xf32, #tpu.memory_space<vmem>>, vector<2x4x4xf32>
    tpu.vector_store %arg4[%c0_50, %c0_51, %c0_52], %139 {strides = array<i32>} : memref<2x4x4xf32, #tpu.memory_space<vmem>>, vector<2x4x4xf32>,
    %142 = arith.subf %77, %139 : vector<2x4x4xf32>
    %143 = vector.extract_strided_slice %142 {offsets = [0, 1, 0], sizes = [2, 1, 4], strides = [1, 1, 1]} : vector<2x4x4xf32> to vector<2x1x4xf32>
    %144 = vector.extract_strided_slice %142 {offsets = [0, 3, 0], sizes = [2, 1, 4], strides = [1, 1, 1]} : vector<2x4x4xf32> to vector<2x1x4xf32>
    %145 = tpu.concatenate %143, %142, %144 in 1 : vector<2x1x4xf32>, vector<2x4x4xf32>, vector<2x1x4xf32> -> vector<2x6x4xf32>
    %146 = vector.extract_strided_slice %145 {offsets = [0, 0, 0], sizes = [2, 4, 4], strides = [1, 1, 1]} : vector<2x6x4xf32> to vector<2x4x4xf32>
    %147 = vector.extract_strided_slice %145 {offsets = [0, 1, 0], sizes = [2, 4, 4], strides = [1, 1, 1]} : vector<2x6x4xf32> to vector<2x4x4xf32>
    %cst_53 = arith.constant 6.000000e+00 : f32
    %148 = vector.broadcast %cst_53 : f32 to vector<2x4x4xf32>
    %149 = arith.mulf %148, %147 : vector<2x4x4xf32>
    %150 = arith.addf %146, %149 : vector<2x4x4xf32>
    %151 = vector.extract_strided_slice %145 {offsets = [0, 2, 0], sizes = [2, 4, 4], strides = [1, 1, 1]} : vector<2x6x4xf32> to vector<2x4x4xf32>
    %152 = arith.addf %150, %151 : vector<2x4x4xf32>
    %cst_54 = arith.constant 1.250000e-01 : f32
    %153 = vector.broadcast %cst_54 : f32 to vector<2x4x4xf32>
    %154 = arith.mulf %152, %153 : vector<2x4x4xf32>
    %155 = vector.extract_strided_slice %145 {offsets = [0, 1, 0], sizes = [2, 4, 4], strides = [1, 1, 1]} : vector<2x6x4xf32> to vector<2x4x4xf32>
    %156 = vector.extract_strided_slice %145 {offsets = [0, 2, 0], sizes = [2, 4, 4], strides = [1, 1, 1]} : vector<2x6x4xf32> to vector<2x4x4xf32>
    %157 = arith.addf %155, %156 : vector<2x4x4xf32>
    %cst_55 = arith.constant 5.000000e-01 : f32
    %158 = vector.broadcast %cst_55 : f32 to vector<2x4x4xf32>
    %159 = arith.mulf %157, %158 : vector<2x4x4xf32>
    %160 = vector.extract_strided_slice %154 {offsets = [0, 0, 1], sizes = [2, 4, 1], strides = [1, 1, 1]} : vector<2x4x4xf32> to vector<2x4x1xf32>
    %161 = vector.extract_strided_slice %154 {offsets = [0, 0, 3], sizes = [2, 4, 1], strides = [1, 1, 1]} : vector<2x4x4xf32> to vector<2x4x1xf32>
    %162 = tpu.concatenate %160, %154, %161 in 2 : vector<2x4x1xf32>, vector<2x4x4xf32>, vector<2x4x1xf32> -> vector<2x4x6xf32>
    %163 = vector.extract_strided_slice %159 {offsets = [0, 0, 1], sizes = [2, 4, 1], strides = [1, 1, 1]} : vector<2x4x4xf32> to vector<2x4x1xf32>
    %164 = vector.extract_strided_slice %159 {offsets = [0, 0, 3], sizes = [2, 4, 1], strides = [1, 1, 1]} : vector<2x4x4xf32> to vector<2x4x1xf32>
    %165 = tpu.concatenate %163, %159, %164 in 2 : vector<2x4x1xf32>, vector<2x4x4xf32>, vector<2x4x1xf32> -> vector<2x4x6xf32>
    %166 = vector.extract_strided_slice %162 {offsets = [0, 0, 0], sizes = [2, 4, 4], strides = [1, 1, 1]} : vector<2x4x6xf32> to vector<2x4x4xf32>
    %167 = vector.extract_strided_slice %162 {offsets = [0, 0, 1], sizes = [2, 4, 4], strides = [1, 1, 1]} : vector<2x4x6xf32> to vector<2x4x4xf32>
    %cst_56 = arith.constant 6.000000e+00 : f32
    %168 = vector.broadcast %cst_56 : f32 to vector<2x4x4xf32>
    %169 = arith.mulf %168, %167 : vector<2x4x4xf32>
    %170 = arith.addf %166, %169 : vector<2x4x4xf32>
    %171 = vector.extract_strided_slice %162 {offsets = [0, 0, 2], sizes = [2, 4, 4], strides = [1, 1, 1]} : vector<2x4x6xf32> to vector<2x4x4xf32>
    %172 = arith.addf %170, %171 : vector<2x4x4xf32>
    %cst_57 = arith.constant 1.250000e-01 : f32
    %173 = vector.broadcast %cst_57 : f32 to vector<2x4x4xf32>
    %174 = arith.mulf %172, %173 : vector<2x4x4xf32>
    %175 = vector.extract_strided_slice %162 {offsets = [0, 0, 1], sizes = [2, 4, 4], strides = [1, 1, 1]} : vector<2x4x6xf32> to vector<2x4x4xf32>
    %176 = vector.extract_strided_slice %162 {offsets = [0, 0, 2], sizes = [2, 4, 4], strides = [1, 1, 1]} : vector<2x4x6xf32> to vector<2x4x4xf32>
    %177 = arith.addf %175, %176 : vector<2x4x4xf32>
    %cst_58 = arith.constant 5.000000e-01 : f32
    %178 = vector.broadcast %cst_58 : f32 to vector<2x4x4xf32>
    %179 = arith.mulf %177, %178 : vector<2x4x4xf32>
    %180 = vector.extract_strided_slice %165 {offsets = [0, 0, 0], sizes = [2, 4, 4], strides = [1, 1, 1]} : vector<2x4x6xf32> to vector<2x4x4xf32>
    %181 = vector.extract_strided_slice %165 {offsets = [0, 0, 1], sizes = [2, 4, 4], strides = [1, 1, 1]} : vector<2x4x6xf32> to vector<2x4x4xf32>
    %cst_59 = arith.constant 6.000000e+00 : f32
    %182 = vector.broadcast %cst_59 : f32 to vector<2x4x4xf32>
    %183 = arith.mulf %182, %181 : vector<2x4x4xf32>
    %184 = arith.addf %180, %183 : vector<2x4x4xf32>
    %185 = vector.extract_strided_slice %165 {offsets = [0, 0, 2], sizes = [2, 4, 4], strides = [1, 1, 1]} : vector<2x4x6xf32> to vector<2x4x4xf32>
    %186 = arith.addf %184, %185 : vector<2x4x4xf32>
    %cst_60 = arith.constant 1.250000e-01 : f32
    %187 = vector.broadcast %cst_60 : f32 to vector<2x4x4xf32>
    %188 = arith.mulf %186, %187 : vector<2x4x4xf32>
    %189 = vector.extract_strided_slice %165 {offsets = [0, 0, 1], sizes = [2, 4, 4], strides = [1, 1, 1]} : vector<2x4x6xf32> to vector<2x4x4xf32>
    %190 = vector.extract_strided_slice %165 {offsets = [0, 0, 2], sizes = [2, 4, 4], strides = [1, 1, 1]} : vector<2x4x6xf32> to vector<2x4x4xf32>
    %191 = arith.addf %189, %190 : vector<2x4x4xf32>
    %cst_61 = arith.constant 5.000000e-01 : f32
    %192 = vector.broadcast %cst_61 : f32 to vector<2x4x4xf32>
    %193 = arith.mulf %191, %192 : vector<2x4x4xf32>
    %194 = arith.subf %1, %9 : vector<2x4x4xf32>
    %195 = arith.subf %194, %174 : vector<2x4x4xf32>
    %196 = math.absf %195 : vector<2x4x4xf32>
    %197 = arith.subf %3, %11 : vector<2x4x4xf32>
    %198 = arith.subf %197, %179 : vector<2x4x4xf32>
    %199 = math.absf %198 : vector<2x4x4xf32>
    %200 = arith.addf %196, %199 : vector<2x4x4xf32>
    %201 = arith.subf %5, %13 : vector<2x4x4xf32>
    %202 = arith.subf %201, %188 : vector<2x4x4xf32>
    %203 = math.absf %202 : vector<2x4x4xf32>
    %204 = arith.addf %200, %203 : vector<2x4x4xf32>
    %205 = arith.subf %7, %15 : vector<2x4x4xf32>
    %206 = arith.subf %205, %193 : vector<2x4x4xf32>
    %207 = math.absf %206 : vector<2x4x4xf32>
    %208 = arith.addf %204, %207 : vector<2x4x4xf32>
    %209 = vector.shape_cast %208 : vector<2x4x4xf32> to vector<1x2x4x4xf32>
    %cst_62 = arith.constant dense<0.000000e+00> : vector<1xf32>
    %210 = vector.multi_reduction <add>, %209, %cst_62 [1, 2, 3] : vector<1x2x4x4xf32> to vector<1xf32>
    %211 = vector.shape_cast %210 : vector<1xf32> to vector<1x1x1x1xf32>
    %212 = vector.extract %211[0, 0, 0, 0] : f32 from vector<1x1x1x1xf32>
    %213 = vector.broadcast %212 : f32 to vector<1x8x128xf32>
    %c0_63 = arith.constant 0 : index
    %c0_64 = arith.constant 0 : index
    %c0_65 = arith.constant 0 : index
    %214 = vector.load %arg5[%c0_63, %c0_64, %c0_65] : memref<1x8x128xf32, #tpu.memory_space<vmem>>, vector<1x8x128xf32>
    tpu.vector_store %arg5[%c0_63, %c0_64, %c0_65], %213 {strides = array<i32>} : memref<1x8x128xf32, #tpu.memory_space<vmem>>, vector<1x8x128xf32>,
    return
  }
  func.func @transform_0(%arg0: i32) -> (i32, i32, i32, i32) {
    %c0_i32 = arith.constant 0 : i32
    %c0_i32_0 = arith.constant 0 : i32
    %c0_i32_1 = arith.constant 0 : i32
    %c0_i32_2 = arith.constant 0 : i32
    return %c0_i32, %arg0, %c0_i32_0, %c0_i32_1 : i32, i32, i32, i32
  }
  func.func @transform_1(%arg0: i32) -> (i32, i32, i32, i32) {
    %c0_i32 = arith.constant 0 : i32
    %c0_i32_0 = arith.constant 0 : i32
    %c0_i32_1 = arith.constant 0 : i32
    %c0_i32_2 = arith.constant 0 : i32
    return %c0_i32, %arg0, %c0_i32_0, %c0_i32_1 : i32, i32, i32, i32
  }
  func.func @transform_2(%arg0: i32) -> (i32, i32, i32) {
    %c0_i32 = arith.constant 0 : i32
    %c0_i32_0 = arith.constant 0 : i32
    %c0_i32_1 = arith.constant 0 : i32
    return %arg0, %c0_i32, %c0_i32_0 : i32, i32, i32
  }
  func.func @transform_3(%arg0: i32) -> (i32, i32, i32) {
    %c0_i32 = arith.constant 0 : i32
    %c0_i32_0 = arith.constant 0 : i32
    %c0_i32_1 = arith.constant 0 : i32
    return %arg0, %c0_i32, %c0_i32_0 : i32, i32, i32
  }
  func.func @transform_4(%arg0: i32) -> (i32, i32, i32) {
    %c0_i32 = arith.constant 0 : i32
    %c0_i32_0 = arith.constant 0 : i32
    %c0_i32_1 = arith.constant 0 : i32
    return %arg0, %c0_i32, %c0_i32_0 : i32, i32, i32
  }
}

module attributes {stable_mosaic.version = 11 : i64} {
  func.func @_lap_level_kernel(%arg0: i32, %arg1: memref<4x2x2x2xf32, #tpu.memory_space<vmem>>, %arg2: memref<4x2x2x2xf32, #tpu.memory_space<vmem>>, %arg3: memref<2x2x2xf32, #tpu.memory_space<vmem>>, %arg4: memref<2x2x2xf32, #tpu.memory_space<vmem>>, %arg5: memref<1x8x128xf32, #tpu.memory_space<vmem>>) attributes {dimension_semantics = [#tpu.dimension_semantics<parallel>], iteration_bounds = array<i64: 4>, scalar_prefetch = 0 : i64, scratch_operands = 0 : i64, tpu.core_type = #tpu.core_type<tc>, window_params = [{transform_indices = @transform_0, window_bounds = array<i64: 4, 2, 2, 2>}, {transform_indices = @transform_1, window_bounds = array<i64: 4, 2, 2, 2>}, {transform_indices = @transform_2, window_bounds = array<i64: 2, 2, 2>}, {transform_indices = @transform_3, window_bounds = array<i64: 2, 2, 2>}, {transform_indices = @transform_4, window_bounds = array<i64: 1, 8, 128>}]} {
    %c0 = arith.constant 0 : index
    %c0_0 = arith.constant 0 : index
    %c0_1 = arith.constant 0 : index
    %c0_2 = arith.constant 0 : index
    %0 = vector.load %arg1[%c0, %c0_0, %c0_1, %c0_2] : memref<4x2x2x2xf32, #tpu.memory_space<vmem>>, vector<1x2x2x2xf32>
    %1 = vector.shape_cast %0 : vector<1x2x2x2xf32> to vector<2x2x2xf32>
    %c1 = arith.constant 1 : index
    %c0_3 = arith.constant 0 : index
    %c0_4 = arith.constant 0 : index
    %c0_5 = arith.constant 0 : index
    %2 = vector.load %arg1[%c1, %c0_3, %c0_4, %c0_5] : memref<4x2x2x2xf32, #tpu.memory_space<vmem>>, vector<1x2x2x2xf32>
    %3 = vector.shape_cast %2 : vector<1x2x2x2xf32> to vector<2x2x2xf32>
    %c2 = arith.constant 2 : index
    %c0_6 = arith.constant 0 : index
    %c0_7 = arith.constant 0 : index
    %c0_8 = arith.constant 0 : index
    %4 = vector.load %arg1[%c2, %c0_6, %c0_7, %c0_8] : memref<4x2x2x2xf32, #tpu.memory_space<vmem>>, vector<1x2x2x2xf32>
    %5 = vector.shape_cast %4 : vector<1x2x2x2xf32> to vector<2x2x2xf32>
    %c3 = arith.constant 3 : index
    %c0_9 = arith.constant 0 : index
    %c0_10 = arith.constant 0 : index
    %c0_11 = arith.constant 0 : index
    %6 = vector.load %arg1[%c3, %c0_9, %c0_10, %c0_11] : memref<4x2x2x2xf32, #tpu.memory_space<vmem>>, vector<1x2x2x2xf32>
    %7 = vector.shape_cast %6 : vector<1x2x2x2xf32> to vector<2x2x2xf32>
    %c0_12 = arith.constant 0 : index
    %c0_13 = arith.constant 0 : index
    %c0_14 = arith.constant 0 : index
    %c0_15 = arith.constant 0 : index
    %8 = vector.load %arg2[%c0_12, %c0_13, %c0_14, %c0_15] : memref<4x2x2x2xf32, #tpu.memory_space<vmem>>, vector<1x2x2x2xf32>
    %9 = vector.shape_cast %8 : vector<1x2x2x2xf32> to vector<2x2x2xf32>
    %c1_16 = arith.constant 1 : index
    %c0_17 = arith.constant 0 : index
    %c0_18 = arith.constant 0 : index
    %c0_19 = arith.constant 0 : index
    %10 = vector.load %arg2[%c1_16, %c0_17, %c0_18, %c0_19] : memref<4x2x2x2xf32, #tpu.memory_space<vmem>>, vector<1x2x2x2xf32>
    %11 = vector.shape_cast %10 : vector<1x2x2x2xf32> to vector<2x2x2xf32>
    %c2_20 = arith.constant 2 : index
    %c0_21 = arith.constant 0 : index
    %c0_22 = arith.constant 0 : index
    %c0_23 = arith.constant 0 : index
    %12 = vector.load %arg2[%c2_20, %c0_21, %c0_22, %c0_23] : memref<4x2x2x2xf32, #tpu.memory_space<vmem>>, vector<1x2x2x2xf32>
    %13 = vector.shape_cast %12 : vector<1x2x2x2xf32> to vector<2x2x2xf32>
    %c3_24 = arith.constant 3 : index
    %c0_25 = arith.constant 0 : index
    %c0_26 = arith.constant 0 : index
    %c0_27 = arith.constant 0 : index
    %14 = vector.load %arg2[%c3_24, %c0_25, %c0_26, %c0_27] : memref<4x2x2x2xf32, #tpu.memory_space<vmem>>, vector<1x2x2x2xf32>
    %15 = vector.shape_cast %14 : vector<1x2x2x2xf32> to vector<2x2x2xf32>
    %16 = vector.extract_strided_slice %1 {offsets = [0, 1, 0], sizes = [2, 1, 2], strides = [1, 1, 1]} : vector<2x2x2xf32> to vector<2x1x2xf32>
    %17 = vector.extract_strided_slice %1 {offsets = [0, 1, 0], sizes = [2, 1, 2], strides = [1, 1, 1]} : vector<2x2x2xf32> to vector<2x1x2xf32>
    %18 = tpu.concatenate %16, %1, %17 in 1 : vector<2x1x2xf32>, vector<2x2x2xf32>, vector<2x1x2xf32> -> vector<2x4x2xf32>
    %19 = vector.extract_strided_slice %5 {offsets = [0, 0, 0], sizes = [2, 1, 2], strides = [1, 1, 1]} : vector<2x2x2xf32> to vector<2x1x2xf32>
    %20 = tpu.concatenate %19, %5 in 1 : vector<2x1x2xf32>, vector<2x2x2xf32> -> vector<2x3x2xf32>
    %21 = vector.extract_strided_slice %18 {offsets = [0, 0, 0], sizes = [2, 2, 2], strides = [1, 1, 1]} : vector<2x4x2xf32> to vector<2x2x2xf32>
    %22 = vector.extract_strided_slice %18 {offsets = [0, 1, 0], sizes = [2, 2, 2], strides = [1, 1, 1]} : vector<2x4x2xf32> to vector<2x2x2xf32>
    %cst = arith.constant 6.000000e+00 : f32
    %23 = vector.broadcast %cst : f32 to vector<2x2x2xf32>
    %24 = arith.mulf %23, %22 : vector<2x2x2xf32>
    %25 = arith.addf %21, %24 : vector<2x2x2xf32>
    %26 = vector.extract_strided_slice %18 {offsets = [0, 2, 0], sizes = [2, 2, 2], strides = [1, 1, 1]} : vector<2x4x2xf32> to vector<2x2x2xf32>
    %27 = arith.addf %25, %26 : vector<2x2x2xf32>
    %28 = vector.extract_strided_slice %20 {offsets = [0, 0, 0], sizes = [2, 2, 2], strides = [1, 1, 1]} : vector<2x3x2xf32> to vector<2x2x2xf32>
    %cst_28 = arith.constant 4.000000e+00 : f32
    %29 = vector.broadcast %cst_28 : f32 to vector<2x2x2xf32>
    %30 = arith.mulf %29, %28 : vector<2x2x2xf32>
    %31 = arith.addf %27, %30 : vector<2x2x2xf32>
    %32 = vector.extract_strided_slice %20 {offsets = [0, 1, 0], sizes = [2, 2, 2], strides = [1, 1, 1]} : vector<2x3x2xf32> to vector<2x2x2xf32>
    %cst_29 = arith.constant 4.000000e+00 : f32
    %33 = vector.broadcast %cst_29 : f32 to vector<2x2x2xf32>
    %34 = arith.mulf %33, %32 : vector<2x2x2xf32>
    %35 = arith.addf %31, %34 : vector<2x2x2xf32>
    %36 = vector.extract_strided_slice %3 {offsets = [0, 1, 0], sizes = [2, 1, 2], strides = [1, 1, 1]} : vector<2x2x2xf32> to vector<2x1x2xf32>
    %37 = vector.extract_strided_slice %3 {offsets = [0, 1, 0], sizes = [2, 1, 2], strides = [1, 1, 1]} : vector<2x2x2xf32> to vector<2x1x2xf32>
    %38 = tpu.concatenate %36, %3, %37 in 1 : vector<2x1x2xf32>, vector<2x2x2xf32>, vector<2x1x2xf32> -> vector<2x4x2xf32>
    %39 = vector.extract_strided_slice %7 {offsets = [0, 0, 0], sizes = [2, 1, 2], strides = [1, 1, 1]} : vector<2x2x2xf32> to vector<2x1x2xf32>
    %40 = tpu.concatenate %39, %7 in 1 : vector<2x1x2xf32>, vector<2x2x2xf32> -> vector<2x3x2xf32>
    %41 = vector.extract_strided_slice %38 {offsets = [0, 0, 0], sizes = [2, 2, 2], strides = [1, 1, 1]} : vector<2x4x2xf32> to vector<2x2x2xf32>
    %42 = vector.extract_strided_slice %38 {offsets = [0, 1, 0], sizes = [2, 2, 2], strides = [1, 1, 1]} : vector<2x4x2xf32> to vector<2x2x2xf32>
    %cst_30 = arith.constant 6.000000e+00 : f32
    %43 = vector.broadcast %cst_30 : f32 to vector<2x2x2xf32>
    %44 = arith.mulf %43, %42 : vector<2x2x2xf32>
    %45 = arith.addf %41, %44 : vector<2x2x2xf32>
    %46 = vector.extract_strided_slice %38 {offsets = [0, 2, 0], sizes = [2, 2, 2], strides = [1, 1, 1]} : vector<2x4x2xf32> to vector<2x2x2xf32>
    %47 = arith.addf %45, %46 : vector<2x2x2xf32>
    %48 = vector.extract_strided_slice %40 {offsets = [0, 0, 0], sizes = [2, 2, 2], strides = [1, 1, 1]} : vector<2x3x2xf32> to vector<2x2x2xf32>
    %cst_31 = arith.constant 4.000000e+00 : f32
    %49 = vector.broadcast %cst_31 : f32 to vector<2x2x2xf32>
    %50 = arith.mulf %49, %48 : vector<2x2x2xf32>
    %51 = arith.addf %47, %50 : vector<2x2x2xf32>
    %52 = vector.extract_strided_slice %40 {offsets = [0, 1, 0], sizes = [2, 2, 2], strides = [1, 1, 1]} : vector<2x3x2xf32> to vector<2x2x2xf32>
    %cst_32 = arith.constant 4.000000e+00 : f32
    %53 = vector.broadcast %cst_32 : f32 to vector<2x2x2xf32>
    %54 = arith.mulf %53, %52 : vector<2x2x2xf32>
    %55 = arith.addf %51, %54 : vector<2x2x2xf32>
    %56 = vector.extract_strided_slice %35 {offsets = [0, 0, 1], sizes = [2, 2, 1], strides = [1, 1, 1]} : vector<2x2x2xf32> to vector<2x2x1xf32>
    %57 = vector.extract_strided_slice %35 {offsets = [0, 0, 1], sizes = [2, 2, 1], strides = [1, 1, 1]} : vector<2x2x2xf32> to vector<2x2x1xf32>
    %58 = tpu.concatenate %56, %35, %57 in 2 : vector<2x2x1xf32>, vector<2x2x2xf32>, vector<2x2x1xf32> -> vector<2x2x4xf32>
    %59 = vector.extract_strided_slice %55 {offsets = [0, 0, 0], sizes = [2, 2, 1], strides = [1, 1, 1]} : vector<2x2x2xf32> to vector<2x2x1xf32>
    %60 = tpu.concatenate %59, %55 in 2 : vector<2x2x1xf32>, vector<2x2x2xf32> -> vector<2x2x3xf32>
    %61 = vector.extract_strided_slice %58 {offsets = [0, 0, 0], sizes = [2, 2, 2], strides = [1, 1, 1]} : vector<2x2x4xf32> to vector<2x2x2xf32>
    %62 = vector.extract_strided_slice %58 {offsets = [0, 0, 1], sizes = [2, 2, 2], strides = [1, 1, 1]} : vector<2x2x4xf32> to vector<2x2x2xf32>
    %cst_33 = arith.constant 6.000000e+00 : f32
    %63 = vector.broadcast %cst_33 : f32 to vector<2x2x2xf32>
    %64 = arith.mulf %63, %62 : vector<2x2x2xf32>
    %65 = arith.addf %61, %64 : vector<2x2x2xf32>
    %66 = vector.extract_strided_slice %58 {offsets = [0, 0, 2], sizes = [2, 2, 2], strides = [1, 1, 1]} : vector<2x2x4xf32> to vector<2x2x2xf32>
    %67 = arith.addf %65, %66 : vector<2x2x2xf32>
    %68 = vector.extract_strided_slice %60 {offsets = [0, 0, 0], sizes = [2, 2, 2], strides = [1, 1, 1]} : vector<2x2x3xf32> to vector<2x2x2xf32>
    %cst_34 = arith.constant 4.000000e+00 : f32
    %69 = vector.broadcast %cst_34 : f32 to vector<2x2x2xf32>
    %70 = arith.mulf %69, %68 : vector<2x2x2xf32>
    %71 = arith.addf %67, %70 : vector<2x2x2xf32>
    %72 = vector.extract_strided_slice %60 {offsets = [0, 0, 1], sizes = [2, 2, 2], strides = [1, 1, 1]} : vector<2x2x3xf32> to vector<2x2x2xf32>
    %cst_35 = arith.constant 4.000000e+00 : f32
    %73 = vector.broadcast %cst_35 : f32 to vector<2x2x2xf32>
    %74 = arith.mulf %73, %72 : vector<2x2x2xf32>
    %75 = arith.addf %71, %74 : vector<2x2x2xf32>
    %cst_36 = arith.constant 3.906250e-03 : f32
    %76 = vector.broadcast %cst_36 : f32 to vector<2x2x2xf32>
    %77 = arith.mulf %75, %76 : vector<2x2x2xf32>
    %78 = vector.extract_strided_slice %9 {offsets = [0, 1, 0], sizes = [2, 1, 2], strides = [1, 1, 1]} : vector<2x2x2xf32> to vector<2x1x2xf32>
    %79 = vector.extract_strided_slice %9 {offsets = [0, 1, 0], sizes = [2, 1, 2], strides = [1, 1, 1]} : vector<2x2x2xf32> to vector<2x1x2xf32>
    %80 = tpu.concatenate %78, %9, %79 in 1 : vector<2x1x2xf32>, vector<2x2x2xf32>, vector<2x1x2xf32> -> vector<2x4x2xf32>
    %81 = vector.extract_strided_slice %13 {offsets = [0, 0, 0], sizes = [2, 1, 2], strides = [1, 1, 1]} : vector<2x2x2xf32> to vector<2x1x2xf32>
    %82 = tpu.concatenate %81, %13 in 1 : vector<2x1x2xf32>, vector<2x2x2xf32> -> vector<2x3x2xf32>
    %83 = vector.extract_strided_slice %80 {offsets = [0, 0, 0], sizes = [2, 2, 2], strides = [1, 1, 1]} : vector<2x4x2xf32> to vector<2x2x2xf32>
    %84 = vector.extract_strided_slice %80 {offsets = [0, 1, 0], sizes = [2, 2, 2], strides = [1, 1, 1]} : vector<2x4x2xf32> to vector<2x2x2xf32>
    %cst_37 = arith.constant 6.000000e+00 : f32
    %85 = vector.broadcast %cst_37 : f32 to vector<2x2x2xf32>
    %86 = arith.mulf %85, %84 : vector<2x2x2xf32>
    %87 = arith.addf %83, %86 : vector<2x2x2xf32>
    %88 = vector.extract_strided_slice %80 {offsets = [0, 2, 0], sizes = [2, 2, 2], strides = [1, 1, 1]} : vector<2x4x2xf32> to vector<2x2x2xf32>
    %89 = arith.addf %87, %88 : vector<2x2x2xf32>
    %90 = vector.extract_strided_slice %82 {offsets = [0, 0, 0], sizes = [2, 2, 2], strides = [1, 1, 1]} : vector<2x3x2xf32> to vector<2x2x2xf32>
    %cst_38 = arith.constant 4.000000e+00 : f32
    %91 = vector.broadcast %cst_38 : f32 to vector<2x2x2xf32>
    %92 = arith.mulf %91, %90 : vector<2x2x2xf32>
    %93 = arith.addf %89, %92 : vector<2x2x2xf32>
    %94 = vector.extract_strided_slice %82 {offsets = [0, 1, 0], sizes = [2, 2, 2], strides = [1, 1, 1]} : vector<2x3x2xf32> to vector<2x2x2xf32>
    %cst_39 = arith.constant 4.000000e+00 : f32
    %95 = vector.broadcast %cst_39 : f32 to vector<2x2x2xf32>
    %96 = arith.mulf %95, %94 : vector<2x2x2xf32>
    %97 = arith.addf %93, %96 : vector<2x2x2xf32>
    %98 = vector.extract_strided_slice %11 {offsets = [0, 1, 0], sizes = [2, 1, 2], strides = [1, 1, 1]} : vector<2x2x2xf32> to vector<2x1x2xf32>
    %99 = vector.extract_strided_slice %11 {offsets = [0, 1, 0], sizes = [2, 1, 2], strides = [1, 1, 1]} : vector<2x2x2xf32> to vector<2x1x2xf32>
    %100 = tpu.concatenate %98, %11, %99 in 1 : vector<2x1x2xf32>, vector<2x2x2xf32>, vector<2x1x2xf32> -> vector<2x4x2xf32>
    %101 = vector.extract_strided_slice %15 {offsets = [0, 0, 0], sizes = [2, 1, 2], strides = [1, 1, 1]} : vector<2x2x2xf32> to vector<2x1x2xf32>
    %102 = tpu.concatenate %101, %15 in 1 : vector<2x1x2xf32>, vector<2x2x2xf32> -> vector<2x3x2xf32>
    %103 = vector.extract_strided_slice %100 {offsets = [0, 0, 0], sizes = [2, 2, 2], strides = [1, 1, 1]} : vector<2x4x2xf32> to vector<2x2x2xf32>
    %104 = vector.extract_strided_slice %100 {offsets = [0, 1, 0], sizes = [2, 2, 2], strides = [1, 1, 1]} : vector<2x4x2xf32> to vector<2x2x2xf32>
    %cst_40 = arith.constant 6.000000e+00 : f32
    %105 = vector.broadcast %cst_40 : f32 to vector<2x2x2xf32>
    %106 = arith.mulf %105, %104 : vector<2x2x2xf32>
    %107 = arith.addf %103, %106 : vector<2x2x2xf32>
    %108 = vector.extract_strided_slice %100 {offsets = [0, 2, 0], sizes = [2, 2, 2], strides = [1, 1, 1]} : vector<2x4x2xf32> to vector<2x2x2xf32>
    %109 = arith.addf %107, %108 : vector<2x2x2xf32>
    %110 = vector.extract_strided_slice %102 {offsets = [0, 0, 0], sizes = [2, 2, 2], strides = [1, 1, 1]} : vector<2x3x2xf32> to vector<2x2x2xf32>
    %cst_41 = arith.constant 4.000000e+00 : f32
    %111 = vector.broadcast %cst_41 : f32 to vector<2x2x2xf32>
    %112 = arith.mulf %111, %110 : vector<2x2x2xf32>
    %113 = arith.addf %109, %112 : vector<2x2x2xf32>
    %114 = vector.extract_strided_slice %102 {offsets = [0, 1, 0], sizes = [2, 2, 2], strides = [1, 1, 1]} : vector<2x3x2xf32> to vector<2x2x2xf32>
    %cst_42 = arith.constant 4.000000e+00 : f32
    %115 = vector.broadcast %cst_42 : f32 to vector<2x2x2xf32>
    %116 = arith.mulf %115, %114 : vector<2x2x2xf32>
    %117 = arith.addf %113, %116 : vector<2x2x2xf32>
    %118 = vector.extract_strided_slice %97 {offsets = [0, 0, 1], sizes = [2, 2, 1], strides = [1, 1, 1]} : vector<2x2x2xf32> to vector<2x2x1xf32>
    %119 = vector.extract_strided_slice %97 {offsets = [0, 0, 1], sizes = [2, 2, 1], strides = [1, 1, 1]} : vector<2x2x2xf32> to vector<2x2x1xf32>
    %120 = tpu.concatenate %118, %97, %119 in 2 : vector<2x2x1xf32>, vector<2x2x2xf32>, vector<2x2x1xf32> -> vector<2x2x4xf32>
    %121 = vector.extract_strided_slice %117 {offsets = [0, 0, 0], sizes = [2, 2, 1], strides = [1, 1, 1]} : vector<2x2x2xf32> to vector<2x2x1xf32>
    %122 = tpu.concatenate %121, %117 in 2 : vector<2x2x1xf32>, vector<2x2x2xf32> -> vector<2x2x3xf32>
    %123 = vector.extract_strided_slice %120 {offsets = [0, 0, 0], sizes = [2, 2, 2], strides = [1, 1, 1]} : vector<2x2x4xf32> to vector<2x2x2xf32>
    %124 = vector.extract_strided_slice %120 {offsets = [0, 0, 1], sizes = [2, 2, 2], strides = [1, 1, 1]} : vector<2x2x4xf32> to vector<2x2x2xf32>
    %cst_43 = arith.constant 6.000000e+00 : f32
    %125 = vector.broadcast %cst_43 : f32 to vector<2x2x2xf32>
    %126 = arith.mulf %125, %124 : vector<2x2x2xf32>
    %127 = arith.addf %123, %126 : vector<2x2x2xf32>
    %128 = vector.extract_strided_slice %120 {offsets = [0, 0, 2], sizes = [2, 2, 2], strides = [1, 1, 1]} : vector<2x2x4xf32> to vector<2x2x2xf32>
    %129 = arith.addf %127, %128 : vector<2x2x2xf32>
    %130 = vector.extract_strided_slice %122 {offsets = [0, 0, 0], sizes = [2, 2, 2], strides = [1, 1, 1]} : vector<2x2x3xf32> to vector<2x2x2xf32>
    %cst_44 = arith.constant 4.000000e+00 : f32
    %131 = vector.broadcast %cst_44 : f32 to vector<2x2x2xf32>
    %132 = arith.mulf %131, %130 : vector<2x2x2xf32>
    %133 = arith.addf %129, %132 : vector<2x2x2xf32>
    %134 = vector.extract_strided_slice %122 {offsets = [0, 0, 1], sizes = [2, 2, 2], strides = [1, 1, 1]} : vector<2x2x3xf32> to vector<2x2x2xf32>
    %cst_45 = arith.constant 4.000000e+00 : f32
    %135 = vector.broadcast %cst_45 : f32 to vector<2x2x2xf32>
    %136 = arith.mulf %135, %134 : vector<2x2x2xf32>
    %137 = arith.addf %133, %136 : vector<2x2x2xf32>
    %cst_46 = arith.constant 3.906250e-03 : f32
    %138 = vector.broadcast %cst_46 : f32 to vector<2x2x2xf32>
    %139 = arith.mulf %137, %138 : vector<2x2x2xf32>
    %c0_47 = arith.constant 0 : index
    %c0_48 = arith.constant 0 : index
    %c0_49 = arith.constant 0 : index
    %140 = vector.load %arg3[%c0_47, %c0_48, %c0_49] : memref<2x2x2xf32, #tpu.memory_space<vmem>>, vector<2x2x2xf32>
    tpu.vector_store %arg3[%c0_47, %c0_48, %c0_49], %77 {strides = array<i32>} : memref<2x2x2xf32, #tpu.memory_space<vmem>>, vector<2x2x2xf32>,
    %c0_50 = arith.constant 0 : index
    %c0_51 = arith.constant 0 : index
    %c0_52 = arith.constant 0 : index
    %141 = vector.load %arg4[%c0_50, %c0_51, %c0_52] : memref<2x2x2xf32, #tpu.memory_space<vmem>>, vector<2x2x2xf32>
    tpu.vector_store %arg4[%c0_50, %c0_51, %c0_52], %139 {strides = array<i32>} : memref<2x2x2xf32, #tpu.memory_space<vmem>>, vector<2x2x2xf32>,
    %142 = arith.subf %77, %139 : vector<2x2x2xf32>
    %143 = vector.extract_strided_slice %142 {offsets = [0, 1, 0], sizes = [2, 1, 2], strides = [1, 1, 1]} : vector<2x2x2xf32> to vector<2x1x2xf32>
    %144 = vector.extract_strided_slice %142 {offsets = [0, 1, 0], sizes = [2, 1, 2], strides = [1, 1, 1]} : vector<2x2x2xf32> to vector<2x1x2xf32>
    %145 = tpu.concatenate %143, %142, %144 in 1 : vector<2x1x2xf32>, vector<2x2x2xf32>, vector<2x1x2xf32> -> vector<2x4x2xf32>
    %146 = vector.extract_strided_slice %145 {offsets = [0, 0, 0], sizes = [2, 2, 2], strides = [1, 1, 1]} : vector<2x4x2xf32> to vector<2x2x2xf32>
    %147 = vector.extract_strided_slice %145 {offsets = [0, 1, 0], sizes = [2, 2, 2], strides = [1, 1, 1]} : vector<2x4x2xf32> to vector<2x2x2xf32>
    %cst_53 = arith.constant 6.000000e+00 : f32
    %148 = vector.broadcast %cst_53 : f32 to vector<2x2x2xf32>
    %149 = arith.mulf %148, %147 : vector<2x2x2xf32>
    %150 = arith.addf %146, %149 : vector<2x2x2xf32>
    %151 = vector.extract_strided_slice %145 {offsets = [0, 2, 0], sizes = [2, 2, 2], strides = [1, 1, 1]} : vector<2x4x2xf32> to vector<2x2x2xf32>
    %152 = arith.addf %150, %151 : vector<2x2x2xf32>
    %cst_54 = arith.constant 1.250000e-01 : f32
    %153 = vector.broadcast %cst_54 : f32 to vector<2x2x2xf32>
    %154 = arith.mulf %152, %153 : vector<2x2x2xf32>
    %155 = vector.extract_strided_slice %145 {offsets = [0, 1, 0], sizes = [2, 2, 2], strides = [1, 1, 1]} : vector<2x4x2xf32> to vector<2x2x2xf32>
    %156 = vector.extract_strided_slice %145 {offsets = [0, 2, 0], sizes = [2, 2, 2], strides = [1, 1, 1]} : vector<2x4x2xf32> to vector<2x2x2xf32>
    %157 = arith.addf %155, %156 : vector<2x2x2xf32>
    %cst_55 = arith.constant 5.000000e-01 : f32
    %158 = vector.broadcast %cst_55 : f32 to vector<2x2x2xf32>
    %159 = arith.mulf %157, %158 : vector<2x2x2xf32>
    %160 = vector.extract_strided_slice %154 {offsets = [0, 0, 1], sizes = [2, 2, 1], strides = [1, 1, 1]} : vector<2x2x2xf32> to vector<2x2x1xf32>
    %161 = vector.extract_strided_slice %154 {offsets = [0, 0, 1], sizes = [2, 2, 1], strides = [1, 1, 1]} : vector<2x2x2xf32> to vector<2x2x1xf32>
    %162 = tpu.concatenate %160, %154, %161 in 2 : vector<2x2x1xf32>, vector<2x2x2xf32>, vector<2x2x1xf32> -> vector<2x2x4xf32>
    %163 = vector.extract_strided_slice %159 {offsets = [0, 0, 1], sizes = [2, 2, 1], strides = [1, 1, 1]} : vector<2x2x2xf32> to vector<2x2x1xf32>
    %164 = vector.extract_strided_slice %159 {offsets = [0, 0, 1], sizes = [2, 2, 1], strides = [1, 1, 1]} : vector<2x2x2xf32> to vector<2x2x1xf32>
    %165 = tpu.concatenate %163, %159, %164 in 2 : vector<2x2x1xf32>, vector<2x2x2xf32>, vector<2x2x1xf32> -> vector<2x2x4xf32>
    %166 = vector.extract_strided_slice %162 {offsets = [0, 0, 0], sizes = [2, 2, 2], strides = [1, 1, 1]} : vector<2x2x4xf32> to vector<2x2x2xf32>
    %167 = vector.extract_strided_slice %162 {offsets = [0, 0, 1], sizes = [2, 2, 2], strides = [1, 1, 1]} : vector<2x2x4xf32> to vector<2x2x2xf32>
    %cst_56 = arith.constant 6.000000e+00 : f32
    %168 = vector.broadcast %cst_56 : f32 to vector<2x2x2xf32>
    %169 = arith.mulf %168, %167 : vector<2x2x2xf32>
    %170 = arith.addf %166, %169 : vector<2x2x2xf32>
    %171 = vector.extract_strided_slice %162 {offsets = [0, 0, 2], sizes = [2, 2, 2], strides = [1, 1, 1]} : vector<2x2x4xf32> to vector<2x2x2xf32>
    %172 = arith.addf %170, %171 : vector<2x2x2xf32>
    %cst_57 = arith.constant 1.250000e-01 : f32
    %173 = vector.broadcast %cst_57 : f32 to vector<2x2x2xf32>
    %174 = arith.mulf %172, %173 : vector<2x2x2xf32>
    %175 = vector.extract_strided_slice %162 {offsets = [0, 0, 1], sizes = [2, 2, 2], strides = [1, 1, 1]} : vector<2x2x4xf32> to vector<2x2x2xf32>
    %176 = vector.extract_strided_slice %162 {offsets = [0, 0, 2], sizes = [2, 2, 2], strides = [1, 1, 1]} : vector<2x2x4xf32> to vector<2x2x2xf32>
    %177 = arith.addf %175, %176 : vector<2x2x2xf32>
    %cst_58 = arith.constant 5.000000e-01 : f32
    %178 = vector.broadcast %cst_58 : f32 to vector<2x2x2xf32>
    %179 = arith.mulf %177, %178 : vector<2x2x2xf32>
    %180 = vector.extract_strided_slice %165 {offsets = [0, 0, 0], sizes = [2, 2, 2], strides = [1, 1, 1]} : vector<2x2x4xf32> to vector<2x2x2xf32>
    %181 = vector.extract_strided_slice %165 {offsets = [0, 0, 1], sizes = [2, 2, 2], strides = [1, 1, 1]} : vector<2x2x4xf32> to vector<2x2x2xf32>
    %cst_59 = arith.constant 6.000000e+00 : f32
    %182 = vector.broadcast %cst_59 : f32 to vector<2x2x2xf32>
    %183 = arith.mulf %182, %181 : vector<2x2x2xf32>
    %184 = arith.addf %180, %183 : vector<2x2x2xf32>
    %185 = vector.extract_strided_slice %165 {offsets = [0, 0, 2], sizes = [2, 2, 2], strides = [1, 1, 1]} : vector<2x2x4xf32> to vector<2x2x2xf32>
    %186 = arith.addf %184, %185 : vector<2x2x2xf32>
    %cst_60 = arith.constant 1.250000e-01 : f32
    %187 = vector.broadcast %cst_60 : f32 to vector<2x2x2xf32>
    %188 = arith.mulf %186, %187 : vector<2x2x2xf32>
    %189 = vector.extract_strided_slice %165 {offsets = [0, 0, 1], sizes = [2, 2, 2], strides = [1, 1, 1]} : vector<2x2x4xf32> to vector<2x2x2xf32>
    %190 = vector.extract_strided_slice %165 {offsets = [0, 0, 2], sizes = [2, 2, 2], strides = [1, 1, 1]} : vector<2x2x4xf32> to vector<2x2x2xf32>
    %191 = arith.addf %189, %190 : vector<2x2x2xf32>
    %cst_61 = arith.constant 5.000000e-01 : f32
    %192 = vector.broadcast %cst_61 : f32 to vector<2x2x2xf32>
    %193 = arith.mulf %191, %192 : vector<2x2x2xf32>
    %194 = arith.subf %1, %9 : vector<2x2x2xf32>
    %195 = arith.subf %194, %174 : vector<2x2x2xf32>
    %196 = math.absf %195 : vector<2x2x2xf32>
    %197 = arith.subf %3, %11 : vector<2x2x2xf32>
    %198 = arith.subf %197, %179 : vector<2x2x2xf32>
    %199 = math.absf %198 : vector<2x2x2xf32>
    %200 = arith.addf %196, %199 : vector<2x2x2xf32>
    %201 = arith.subf %5, %13 : vector<2x2x2xf32>
    %202 = arith.subf %201, %188 : vector<2x2x2xf32>
    %203 = math.absf %202 : vector<2x2x2xf32>
    %204 = arith.addf %200, %203 : vector<2x2x2xf32>
    %205 = arith.subf %7, %15 : vector<2x2x2xf32>
    %206 = arith.subf %205, %193 : vector<2x2x2xf32>
    %207 = math.absf %206 : vector<2x2x2xf32>
    %208 = arith.addf %204, %207 : vector<2x2x2xf32>
    %209 = vector.shape_cast %208 : vector<2x2x2xf32> to vector<1x2x2x2xf32>
    %cst_62 = arith.constant dense<0.000000e+00> : vector<1xf32>
    %210 = vector.multi_reduction <add>, %209, %cst_62 [1, 2, 3] : vector<1x2x2x2xf32> to vector<1xf32>
    %211 = vector.shape_cast %210 : vector<1xf32> to vector<1x1x1x1xf32>
    %212 = vector.extract %211[0, 0, 0, 0] : f32 from vector<1x1x1x1xf32>
    %213 = vector.broadcast %212 : f32 to vector<1x8x128xf32>
    %c0_63 = arith.constant 0 : index
    %c0_64 = arith.constant 0 : index
    %c0_65 = arith.constant 0 : index
    %214 = vector.load %arg5[%c0_63, %c0_64, %c0_65] : memref<1x8x128xf32, #tpu.memory_space<vmem>>, vector<1x8x128xf32>
    tpu.vector_store %arg5[%c0_63, %c0_64, %c0_65], %213 {strides = array<i32>} : memref<1x8x128xf32, #tpu.memory_space<vmem>>, vector<1x8x128xf32>,
    return
  }
  func.func @transform_0(%arg0: i32) -> (i32, i32, i32, i32) {
    %c0_i32 = arith.constant 0 : i32
    %c0_i32_0 = arith.constant 0 : i32
    %c0_i32_1 = arith.constant 0 : i32
    %c0_i32_2 = arith.constant 0 : i32
    return %c0_i32, %arg0, %c0_i32_0, %c0_i32_1 : i32, i32, i32, i32
  }
  func.func @transform_1(%arg0: i32) -> (i32, i32, i32, i32) {
    %c0_i32 = arith.constant 0 : i32
    %c0_i32_0 = arith.constant 0 : i32
    %c0_i32_1 = arith.constant 0 : i32
    %c0_i32_2 = arith.constant 0 : i32
    return %c0_i32, %arg0, %c0_i32_0, %c0_i32_1 : i32, i32, i32, i32
  }
  func.func @transform_2(%arg0: i32) -> (i32, i32, i32) {
    %c0_i32 = arith.constant 0 : i32
    %c0_i32_0 = arith.constant 0 : i32
    %c0_i32_1 = arith.constant 0 : i32
    return %arg0, %c0_i32, %c0_i32_0 : i32, i32, i32
  }
  func.func @transform_3(%arg0: i32) -> (i32, i32, i32) {
    %c0_i32 = arith.constant 0 : i32
    %c0_i32_0 = arith.constant 0 : i32
    %c0_i32_1 = arith.constant 0 : i32
    return %arg0, %c0_i32, %c0_i32_0 : i32, i32, i32
  }
  func.func @transform_4(%arg0: i32) -> (i32, i32, i32) {
    %c0_i32 = arith.constant 0 : i32
    %c0_i32_0 = arith.constant 0 : i32
    %c0_i32_1 = arith.constant 0 : i32
    return %arg0, %c0_i32, %c0_i32_0 : i32, i32, i32
  }
}

</mosaic_0001>

<bundles_post_ra>
// kernel: lap_loss.3
= control target key start
LH: loop header
LB: loop body
LE: loop exit
PB: predicated region body
PF: predicated region fallthrough
CT: control target
= control target key end

     0   :  { %s2257_s0 = inlined_call_operand.hbm [shape: f32[4,8,8,8], index: 0, kind: input, shape index: {}]   ;;  %s2258_s1 = inlined_call_operand.hbm [shape: f32[4,8,8,8], index: 1, kind: input, shape index: {}]   ;;  %s2259_s2 = inlined_call_operand.hbm [shape: f32[8,8,8], index: 2, kind: output, shape index: {0}]   ;;  %s2260_s3 = inlined_call_operand.hbm [shape: f32[8,8,8], index: 3, kind: output, shape index: {1}]   ;;  %s2261_s4 = inlined_call_operand.hbm [shape: f32[4,8,128], index: 4, kind: output, shape index: {2}]  }
   0x1   :  { %2263 = sst [smem:[#allocation21_spill]] %s2257_s0 }
   0x2   :  { %10 = vsyncpa [#allocation3], 0 }
   0x3   :  { %12 = vsyncpa [#allocation3 + $0x1], 0 }
   0x4   :  { %13 = vsyncpa [#allocation6], 0 }
   0x5   :  { %15 = vsyncpa [#allocation6 + $0x1], 0 }
   0x6   :  { %16 = vsyncpa [#allocation4], 0 }
   0x7   :  { %18 = vsyncpa [#allocation4 + $0x1], 0 }
   0x8   :  { %19 = vsyncpa [#allocation9], 0 }
   0x9   :  { %21 = vsyncpa [#allocation9 + $0x1], 0  ;;  %s1662_s15 = smov 0   ;;  %s1664_s16 = smov 0  }
   0xa   :  { %s1666_s17 = smov 0   ;;  %s1668_s18 = smov 0  }
   0xb LB: > { %s1683_s19 = sadd.s32 4294967295, %s1614_s18   ;;  %s2262_s20 = sadd.s32 4294967294, %s1614_s18   ;;  %s1614_s18 = sphi %s1668_s18, %s2273_s18   ;;  %s1610_s17 = sphi %s1666_s17, %s2272_s17   ;;  %s1606_s16 = sphi %s1664_s16, %s2271_s16   ;;  %s1602_s15 = sphi %s1662_s15, %s2270_s15  }
   0xc   : > { %s1687_s21 = sadd.s32 1, %s1614_s18   ;;  %s34_s22 = sadd.s32 1, %s1610_s17 }
   0xd   : > { %s31_s23 = ssub.s32 %s1614_s18, %s1687_s21  ;;  %p41_p0 = scmp.ne.s32.totalorder %s1610_s17, %s1606_s16 }
   0xe   : > { %p32_p1 = scmp.eq.s32.totalorder %s31_s23, 0  ;;  %p42_p2 = scmp.eq.s32.totalorder %s1614_s18, 0 }
   0xf   : > { %p47_p3 = scmp.ne.s32.totalorder %s1606_s16, %s1602_s15  ;;  %p48_p4 = scmp.eq.s32.totalorder %s1683_s19, 0 }
  0x10   : > { %s1699_s24 = scalar_select %p32_p1, %s1610_s17, %s34_s22  }
  0x11   : > { %p1701_p5 = por %p42_p2, %p41_p0  ;;  %p1705_p6 = por %p48_p4, %p47_p3 }
  0x12   : > { %p97_p7 = scmp.eq.s32.totalorder %s1683_s19, 3  ;;  %p103_p8 = scmp.eq.s32.totalorder %s2262_s20, 3 }
  0x13   : > { %p1354_p11 = scmp.ge.s32.totalorder %s1614_s18, 4 }
  0x14   : > { %p1712_p9 = por %p97_p7, %p41_p0  ;;  %p1716_p10 = por %p103_p8, %p47_p3 }
  0x15   : > { %171 = sbr.rel (%p1354_p11) target bundleno = 54 (0x36), region = 16 }
  0x1c   : > { %s1722_s29 = sand.u32 1, %s1610_s17   ;;  %s1393_s30 = sshll.u32 %s1614_s18, 8 }
  0x1d   : > { %s1355_s5 = sshll.u32 %s1722_s29, 6  ;;  %s2268_s0 = sld [smem:[#allocation21_spill]] }
  0x1e   : > { %s1399_s9 = scalar_select %p1701_p5, [#allocation0], [#allocation15] }
  0x1f   : > { %s179_s10 = scalar_lea.vmem [#allocation2], %s1355_s5  ;;  %s1616_s13 = smov 1024  }
  0x20   : > { %s198_s11 = sshll.u32 %s179_s10, 4  ;;  %s190_s12 = sld [smem:[%s1399_s9]]   ;;  %s199_s11 = int_to_ptr.vmem [resolvable:$true] %s198_s11 }
  0x21   : > { %1400 = sst [smem:[#allocation12]] (%p1701_p5), %s1616_s13  ;;  %s1617_s14 = smov 256  }
  0x22   : > { %1401 = sst [smem:[#allocation12 + $0x1]] (%p1701_p5), %s1617_s14  ;;  %s1618_s22 = smov 2  }
  0x23   : > { %s185_s8 = scalar_lea.hbm %s2268_s0, %s1393_s30  ;;  %1402 = sst [smem:[#allocation12 + $0x2]] (%p1701_p5), %s1618_s22 }
  0x24   : > { %s1619_s23 = smov 128   ;;  %s1620_s7 = smov 8  }
  0x25   : > { %1403 = sst [smem:[#allocation12 + $0x3]] (%p1701_p5), %s1619_s23  ;;  %s176_s10 = scalar_lea.sflag [#allocation3], %s1722_s29 }
  0x26   : > { %1404 = sst [smem:[#allocation12 + $0x4]] (%p1701_p5), %s1619_s23  ;;  %s1358_s6 = sshll.u32 %s190_s12, 26 }
  0x27   : > { %1405 = sst [smem:[#allocation12 + $0x5]] (%p1701_p5), %s1620_s7  ;;  %s1359_s9 = sadd.s32 134217728, %s1358_s6 }
  0x28   : > { %s1621_s20 = smov [#allocation11]  }
  0x29   : > { %1406 = dma.general (%p1701_p5), %s185_s8, 1024, %s199_s11, %s176_s10, %s1621_s20, [#allocation12], %s1359_s9, 0  }
  0x2a   : > { %s231_s14 = scalar_lea.hbm %s2258_s1, %s1393_s30  ;;  %s225_s22 = scalar_lea.vmem [#allocation5], %s1355_s5 }
  0x2b   : > { %s1407_s12 = scalar_select %p1701_p5, [#allocation0], [#allocation16] }
  0x2c   : > { %s244_s23 = sshll.u32 %s225_s22, 4  ;;  %s1622_s7 = smov 1024   ;;  %s245_s23 = int_to_ptr.vmem [resolvable:$true] %s244_s23 }
  0x2d   : > { %s236_s6 = sld [smem:[%s1407_s12]]   ;;  %s1623_s20 = smov 256  }
  0x2e   : > { %1408 = sst [smem:[#allocation14]] (%p1701_p5), %s1622_s7  ;;  %s1624_s0 = smov 2  }
  0x2f   : > { %1409 = sst [smem:[#allocation14 + $0x1]] (%p1701_p5), %s1623_s20  ;;  %s1625_s8 = smov 128  }
  0x30   : > { %1410 = sst [smem:[#allocation14 + $0x2]] (%p1701_p5), %s1624_s0  ;;  %s1626_s5 = smov 8  }
  0x31   : > { %1411 = sst [smem:[#allocation14 + $0x3]] (%p1701_p5), %s1625_s8  ;;  %s222_s9 = scalar_lea.sflag [#allocation6], %s1722_s29 }
  0x32   : > { %1412 = sst [smem:[#allocation14 + $0x4]] (%p1701_p5), %s1625_s8  ;;  %s1627_s10 = smov [#allocation13]  }
  0x33   : > { %s1363_s30 = sshll.u32 %s236_s6, 26  ;;  %1413 = sst [smem:[#allocation14 + $0x5]] (%p1701_p5), %s1626_s5 }
  0x34   : > { %s1364_s11 = sadd.s32 134217728, %s1363_s30 }
  0x35   : > { %1414 = dma.general (%p1701_p5), %s231_s14, 1024, %s245_s23, %s222_s9, %s1627_s10, [#allocation14], %s1364_s11, 0  }
  0x36 PF: > { %p1365_p12 = scmp.ge.s32.totalorder %s1614_s18, 1  ;;  %p265_p13 = scmp.lt.s32.totalorder %s1614_s18, 5 }
  0x38   : > { %p266_p0 = pnand %p1365_p12, %p265_p13 }
  0x39   : > { %s1769_s13 = sand.u32 (!%p266_p0), 1, %s1606_s16  }
  0x3a   : > { %269 = sbr.rel (%p266_p0) target bundleno = 989 (0x3dd), region = 28  ;;  %s1366_s12 = sshll.u32 (!%p266_p0), %s1769_s13, 6 }
  0x3b   : > { %s272_s22 = scalar_lea.sflag (!%p266_p0), [#allocation3], %s1769_s13  ;;  %s1773_s6 = scalar_lea.vmem (!%p266_p0), [#allocation2], %s1366_s12 }
  0x41   : > { %1585 = dma.done.wait (%p1705_p6), %s272_s22, 1024  }
  0x42   : > { %1587 = vsyncadd (%p1705_p6), %s272_s22, 4294966272  ;;  %s281_s25 = scalar_lea.sflag [#allocation6], %s1769_s13  ;;  %s1780_s29 = scalar_lea.vmem [#allocation5], %s1366_s12 }
  0x43   : > { %1589 = dma.done.wait (%p1705_p6), %s281_s25, 1024  }
  0x44   : > { %1591 = vsyncadd (%p1705_p6), %s281_s25, 4294966272  ;;  %v1787_v0 = vld [vmem:[%s1773_s6] sm:$0xff]  ;;  %vm364_vm0 = vcmask 1040384   ;;  %vm385_vm1 = vcmask 1046528   ;;  %vm400_vm2 = vcmask 1045504   ;;  %v1793_v2 = vld [vmem:[%s1773_s6 + $0x8] sm:$0xff] }
  0x45   : > { %v1790_v1 = vld [vmem:[%s1773_s6 + $0x20] sm:$0xff]  ;;  %v352_v3 = vrot.slane %v1787_v0, 1  ;;  %v356_v4 = vrot.slane %v1787_v0, 7  ;;  %v360_v5 = vrot.slane %v1787_v0, 6  ;;  %v1800_v7 = vld [vmem:[%s1773_s6 + $0x28] sm:$0xff]  ;;  %v353_v8 = vrot.slane %v1793_v2, 1 }
  0x46   : > { %v371_v6 = vrot.slane %v1790_v1, 7  ;;  %v357_v9 = vrot.slane %v1793_v2, 7  ;;  %v361_v10 = vrot.slane %v1793_v2, 6  ;;  %v372_v11 = vrot.slane %v1800_v7, 7  ;;  %v1816_v32 = vld [vmem:[%s1780_s29 + $0x8] sm:$0xff]  ;;  %v1824_v42 = vld [vmem:[%s1780_s29] sm:$0xff] }
  0x47   : > { %v365_v12 = vsel %vm364_vm0, %v352_v3, %v356_v4  ;;  %v367_v13 = vsel %vm364_vm0, %v356_v4, %v360_v5  ;;  %v1821_v41 = vld [vmem:[%s1780_s29 + $0x28] sm:$0xff]  ;;  %v586_v46 = vrot.slane %v1816_v32, 1  ;;  %v590_v49 = vrot.slane %v1816_v32, 7  ;;  %s1628_s26 = smov 1   ;;  %s1629_s14 = smov 127  }
  0x48   : > { %v375_v14 = vsel %vm364_vm0, %v1790_v1, %v371_v6  ;;  %v415_v15 = vmul.f32 4.0, %v371_v6  ;;  %v377_v16 = vmul.f32 6.0, %v365_v12  ;;  %v378_v17 = vmul.f32 6.0, %v367_v13  ;;  %v1842_v6 = vld [vmem:[%s1780_s29 + $0x20] sm:$0xff]  ;;  %s1630_s23 = smov 2   ;;  %s1631_s7 = smov 126  }
  0x49   : > { %v401_v18 = vrot.slane %v365_v12, 2  ;;  %v402_v19 = vrot.slane %v367_v13, 2  ;;  %v411_v20 = vmul.f32 4.0, %v375_v14  ;;  %v366_v22 = vsel %vm364_vm0, %v353_v8, %v357_v9  ;;  %s1368_s20 = sshll.u32 %s1769_s13, 4  ;;  %s1147_s30 = sand.u32 1, %s1683_s19  }
  0x4a   : > { %v422_v21 = vrot.slane %v415_v15, 1  ;;  %v368_v23 = vsel %vm364_vm0, %v357_v9, %v361_v10  ;;  %v386_v24 = vrot.slane %v377_v16, 1  ;;  %v387_v25 = vrot.slane %v378_v17, 1  ;;  %s1991_s0 = scalar_lea.vmem [#allocation7], %s1368_s20  ;;  %s1995_s8 = scalar_lea.vmem [#allocation8], %s1368_s20 }
  0x4b   : > { %v403_v26 = vsel %vm400_vm2, %v401_v18, %v402_v19  ;;  %v376_v27 = vsel %vm364_vm0, %v1800_v7, %v372_v11  ;;  %v421_v28 = vrot.slane %v411_v20, 1  ;;  %v379_v29 = vmul.f32 6.0, %v366_v22  ;;  %s1395_s5 = sshll.u32 %s1683_s19, 8  ;;  %s1166_s11 = sshll.u32 %s1991_s0, 4  ;;  %s2178_s11 = int_to_ptr.vmem [resolvable:$true] %s1166_s11 }
  0x4c   : > { %v380_v30 = vmul.f32 6.0, %v368_v23  ;;  %v404_v31 = vrot.slane %v366_v22, 2  ;;  %v388_v33 = vsel %vm385_vm1, %v386_v24, %v387_v25  ;;  %v405_v34 = vrot.slane %v368_v23, 2  ;;  %v1857_v24 = vld [vmem:[%s1773_s6 + $0x18] sm:$0xff]  ;;  %s1182_s9 = sshll.u32 %s1995_s8, 4  ;;  %s2138_s22 = scalar_lea.hbm %s2260_s3, %s1395_s5  ;;  %s2140_s9 = int_to_ptr.vmem [resolvable:$true] %s1182_s9 }
  0x4d   : > { %v412_v35 = vmul.f32 4.0, %v376_v27  ;;  %v416_v36 = vmul.f32 4.0, %v372_v11  ;;  %v394_v37 = vadd.f32 %v388_v33, %v365_v12  ;;  %v423_v38 = vsel %vm385_vm1, %v421_v28, %v422_v21  ;;  %s1484_s25 = scalar_lea.vmem %s2140_s9, 256 }
  0x4e   : > { %v389_v39 = vrot.slane %v379_v29, 1  ;;  %v390_v40 = vrot.slane %v380_v30, 1  ;;  %v406_v43 = vsel %vm400_vm2, %v404_v31, %v405_v34  ;;  %v594_v50 = vrot.slane %v1816_v32, 6  ;;  %v1867_v34 = vld [vmem:[%s1773_s6 + $0x38] sm:$0xff]  ;;  %p1485_p1 = scmp.ne.s32.totalorder %s2140_s9, %s1484_s25 }
  0x4f   : > { %v424_v44 = vrot.slane %v412_v35, 1  ;;  %v425_v45 = vrot.slane %v416_v36, 1  ;;  %v409_v47 = vadd.f32 %v403_v26, %v394_v37  ;;  %v604_v53 = vrot.slane %v1821_v41, 7 }
  0x50   : > { %v391_v48 = vsel %vm385_vm1, %v389_v39, %v390_v40  ;;  %v585_v54 = vrot.slane %v1824_v42, 1  ;;  %v598_v56 = vsel %vm364_vm0, %v586_v46, %v590_v49  ;;  %v600_v57 = vsel %vm364_vm0, %v590_v49, %v594_v50  ;;  %p1486_p2 = pnand %p1485_p1, %p1712_p9 }
  0x51   : > { %v395_v51 = vadd.f32 %v391_v48, %v366_v22  ;;  %v426_v52 = vsel %vm385_vm1, %v424_v44, %v425_v45  ;;  %v413_v55 = vadd.f32 %v411_v20, %v409_v47  ;;  %v589_v58 = vrot.slane %v1824_v42, 7 }
  0x52   : > { %v608_v60 = vsel %vm364_vm0, %v1821_v41, %v604_v53  ;;  %v611_v61 = vmul.f32 6.0, %v598_v56  ;;  %v612_v62 = vmul.f32 6.0, %v600_v57  ;;  %v634_v3 = vrot.slane %v598_v56, 2  ;;  %p1487_p3 = pneg %p1486_p2 }
  0x53   : > { %v410_v59 = vadd.f32 %v406_v43, %v395_v51  ;;  %v1839_v63 = vadd.f32 %v423_v38, %v413_v55  ;;  %v635_v4 = vrot.slane %v600_v57, 2  ;;  %v642_v5 = vmul.f32 4.0, %v608_v60 }
  0x54   : > { %v620_v9 = vrot.slane %v611_v61, 1  ;;  %v621_v10 = vrot.slane %v612_v62, 1  ;;  %v646_v11 = vmul.f32 4.0, %v604_v53  ;;  %v593_v14 = vrot.slane %v1824_v42, 6  ;;  %v1889_v62 = vld [vmem:[%s1773_s6 + $0x30] sm:$0xff] }
  0x55   : > { %v414_v8 = vadd.f32 %v412_v35, %v410_v59  ;;  %517 = vrot.lane.b32.xlu1 %v1839_v63, %s1628_s26  ;;  %511 = vrot.lane.b32.xlu0 %v1839_v63, %s1629_s14  ;;  %v636_v12 = vsel %vm400_vm2, %v634_v3, %v635_v4  ;;  %v654_v13 = vrot.slane %v642_v5, 1  ;;  %v597_v15 = vsel %vm364_vm0, %v585_v54, %v589_v58  ;;  %v1870_v35 = vld [vmem:[%s1773_s6 + $0x10] sm:$0xff]  ;;  %s2142_s6 = scalar_lea.sflag [#allocation9], %s1147_s30 }
  0x56   : > { %v622_v17 = vsel %vm385_vm1, %v620_v9, %v621_v10  ;;  %v655_v18 = vrot.slane %v646_v11, 1  ;;  %v603_v19 = vrot.slane %v1842_v6, 7  ;;  %v599_v21 = vsel %vm364_vm0, %v589_v58, %v593_v14 }
  0x57   : > { %v1851_v16 = vadd.f32 %v426_v52, %v414_v8  ;;  %v626_v20 = vadd.f32 %v622_v17, %v598_v56  ;;  %v609_v22 = vmul.f32 6.0, %v597_v15  ;;  %v631_v23 = vrot.slane %v597_v15, 2 }
  0x58   : > { %v656_v25 = vsel %vm385_vm1, %v654_v13, %v655_v18  ;;  %v607_v26 = vsel %vm364_vm0, %v1842_v6, %v603_v19  ;;  %v610_v27 = vmul.f32 6.0, %v599_v21  ;;  %v632_v28 = vrot.slane %v599_v21, 2 }
  0x59   : > { %519 = vrot.lane.b32.xlu1 %v1851_v16, %s1628_s26  ;;  %513 = vrot.lane.b32.xlu0 %v1851_v16, %s1629_s14  ;;  %v640_v29 = vadd.f32 %v636_v12, %v626_v20  ;;  %v617_v30 = vrot.slane %v609_v22, 1  ;;  %v641_v31 = vmul.f32 4.0, %v607_v26  ;;  %v645_v33 = vmul.f32 4.0, %v603_v19  ;;  %v1904_v22 = vld [vmem:[%s1780_s29 + $0x18] sm:$0xff] }
  0x5a   : > { %v618_v36 = vrot.slane %v610_v27, 1  ;;  %v633_v37 = vsel %vm400_vm2, %v631_v23, %v632_v28  ;;  %v434_v38 = vrot.slane %v1857_v24, 1  ;;  %v438_v39 = vrot.slane %v1857_v24, 7 }
  0x5b   : > { %v644_v40 = vadd.f32 %v642_v5, %v640_v29  ;;  %v651_v43 = vrot.slane %v641_v31, 1  ;;  %v652_v44 = vrot.slane %v645_v33, 1  ;;  %v442_v45 = vrot.slane %v1857_v24, 6  ;;  %v1911_v33 = vld [vmem:[%s1780_s29 + $0x38] sm:$0xff] }
  0x5c   : > { %v619_v46 = vsel %vm385_vm1, %v617_v30, %v618_v36  ;;  %v446_v47 = vsel %vm364_vm0, %v434_v38, %v438_v39  ;;  %v452_v48 = vrot.slane %v1867_v34, 7  ;;  %v433_v49 = vrot.slane %v1870_v35, 1  ;;  %v1914_v36 = vld [vmem:[%s1780_s29 + $0x10] sm:$0xff] }
  0x5d   : > { %v1880_v50 = vadd.f32 %v656_v25, %v644_v40  ;;  %v625_v51 = vadd.f32 %v619_v46, %v597_v15  ;;  %v653_v52 = vsel %vm385_vm1, %v651_v43, %v652_v44  ;;  %v448_v53 = vsel %vm364_vm0, %v438_v39, %v442_v45 }
  0x5e   : > { %v456_v54 = vsel %vm364_vm0, %v1867_v34, %v452_v48  ;;  %v459_v55 = vmul.f32 6.0, %v446_v47  ;;  %v460_v56 = vmul.f32 6.0, %v448_v53  ;;  %v482_v57 = vrot.slane %v446_v47, 2 }
  0x5f   : > { %743 = vrot.lane.b32.xlu1 %v1880_v50, %s1629_s14  ;;  %v639_v58 = vadd.f32 %v633_v37, %v625_v51  ;;  %v483_v59 = vrot.slane %v448_v53, 2  ;;  %v490_v60 = vmul.f32 4.0, %v456_v54  ;;  %v494_v61 = vmul.f32 4.0, %v452_v48 }
  0x60   : > { %v468_v3 = vrot.slane %v459_v55, 1  ;;  %v469_v4 = vrot.slane %v460_v56, 1  ;;  %v437_v5 = vrot.slane %v1870_v35, 7  ;;  %v441_v8 = vrot.slane %v1870_v35, 6 }
  0x61   : > { %v643_v9 = vadd.f32 %v641_v31, %v639_v58  ;;  %v484_v10 = vsel %vm400_vm2, %v482_v57, %v483_v59  ;;  %v502_v11 = vrot.slane %v490_v60, 1  ;;  %v503_v12 = vrot.slane %v494_v61, 1 }
  0x62   : > { %v470_v13 = vsel %vm385_vm1, %v468_v3, %v469_v4  ;;  %v445_v14 = vsel %vm364_vm0, %v433_v49, %v437_v5  ;;  %v447_v15 = vsel %vm364_vm0, %v437_v5, %v441_v8  ;;  %v451_v17 = vrot.slane %v1889_v62, 7  ;;  %v1937_v4 = vld [vmem:[%s1780_s29 + $0x30] sm:$0xff]  ;;  %s1632_s29 = smov [#allocation8]  }
  0x63   : > { %v1898_v18 = vadd.f32 %v653_v52, %v643_v9  ;;  %749 = vrot.lane.b32.xlu1 %v1880_v50, %s1628_s26  ;;  %v474_v19 = vadd.f32 %v470_v13, %v446_v47  ;;  %v504_v20 = vsel %vm385_vm1, %v502_v11, %v503_v12  ;;  %v457_v21 = vmul.f32 6.0, %v445_v14 }
  0x64   : > { %v455_v23 = vsel %vm364_vm0, %v1889_v62, %v451_v17  ;;  %v458_v25 = vmul.f32 6.0, %v447_v15  ;;  %v479_v26 = vrot.slane %v445_v14, 2  ;;  %v480_v27 = vrot.slane %v447_v15, 2 }
  0x65   : > { %741 = vrot.lane.b32.xlu0 %v1898_v18, %s1629_s14  ;;  %v488_v28 = vadd.f32 %v484_v10, %v474_v19  ;;  %v465_v29 = vrot.slane %v457_v21, 1  ;;  %v489_v30 = vmul.f32 4.0, %v455_v23  ;;  %v493_v31 = vmul.f32 4.0, %v451_v17 }
  0x66   : > { %v466_v37 = vrot.slane %v458_v25, 1  ;;  %v481_v38 = vsel %vm400_vm2, %v479_v26, %v480_v27  ;;  %v664_v39 = vrot.slane %v1904_v22, 1  ;;  %v668_v40 = vrot.slane %v1904_v22, 7 }
  0x67   : > { %525 = vrot.lane.b32.xlu1 %v1851_v16, %s1630_s23  ;;  %v492_v43 = vadd.f32 %v490_v60, %v488_v28  ;;  %v499_v44 = vrot.slane %v489_v30, 1  ;;  %v500_v45 = vrot.slane %v493_v31, 1  ;;  %v672_v46 = vrot.slane %v1904_v22, 6 }
  0x68   : > { %v467_v47 = vsel %vm385_vm1, %v465_v29, %v466_v37  ;;  %v676_v48 = vsel %vm364_vm0, %v664_v39, %v668_v40  ;;  %v682_v49 = vrot.slane %v1911_v33, 7  ;;  %v663_v51 = vrot.slane %v1914_v36, 1 }
  0x69   : > { %747 = vrot.lane.b32.xlu0 %v1898_v18, %s1628_s26  ;;  %v1928_v52 = vadd.f32 %v504_v20, %v492_v43  ;;  %v473_v16 = vadd.f32 %v467_v47, %v445_v14  ;;  %v501_v53 = vsel %vm385_vm1, %v499_v44, %v500_v45  ;;  %v678_v54 = vsel %vm364_vm0, %v668_v40, %v672_v46 }
  0x6a   : > { %v686_v55 = vsel %vm364_vm0, %v1911_v33, %v682_v49  ;;  %v689_v56 = vmul.f32 6.0, %v676_v48  ;;  %v690_v57 = vmul.f32 6.0, %v678_v54  ;;  %v712_v58 = vrot.slane %v676_v48, 2 }
  0x6b   : > { %755 = vrot.lane.b32.xlu1 %v1880_v50, %s1630_s23  ;;  %v487_v59 = vadd.f32 %v481_v38, %v473_v16  ;;  %v713_v60 = vrot.slane %v678_v54, 2  ;;  %v720_v61 = vmul.f32 4.0, %v686_v55  ;;  %v724_v3 = vmul.f32 4.0, %v682_v49 }
  0x6c   : > { %v698_v5 = vrot.slane %v689_v56, 1  ;;  %v699_v8 = vrot.slane %v690_v57, 1  ;;  %v667_v9 = vrot.slane %v1914_v36, 7  ;;  %v671_v10 = vrot.slane %v1914_v36, 6 }
  0x6d   : > { %523 = vrot.lane.b32.xlu0 %v1839_v63, %s1630_s23  ;;  %v491_v11 = vadd.f32 %v489_v30, %v487_v59  ;;  %v714_v12 = vsel %vm400_vm2, %v712_v58, %v713_v60  ;;  %v732_v13 = vrot.slane %v720_v61, 1  ;;  %v733_v50 = vrot.slane %v724_v3, 1 }
  0x6e   : > { %v700_v14 = vsel %vm385_vm1, %v698_v5, %v699_v8  ;;  %v675_v15 = vsel %vm364_vm0, %v663_v51, %v667_v9  ;;  %v677_v17 = vsel %vm364_vm0, %v667_v9, %v671_v10  ;;  %v681_v19 = vrot.slane %v1937_v4, 7 }
  0x6f   : > { %539 = vrot.lane.b32.xlu1 %v1928_v52, %s1628_s26  ;;  %v1950_v20 = vadd.f32 %v501_v53, %v491_v11  ;;  %v704_v21 = vadd.f32 %v700_v14, %v676_v48  ;;  %v687_v63 = vmul.f32 6.0, %v675_v15  ;;  %v688_v25 = vmul.f32 6.0, %v677_v17 }
  0x70   : > { %v685_v23 = vsel %vm364_vm0, %v1937_v4, %v681_v19  ;;  %v709_v26 = vrot.slane %v675_v15, 2  ;;  %v710_v27 = vrot.slane %v677_v17, 2  ;;  %v723_v31 = vmul.f32 4.0, %v681_v19 }
  0x71   : > { %753 = vrot.lane.b32.xlu0 %v1898_v18, %s1630_s23  ;;  %v718_v28 = vadd.f32 %v714_v12, %v704_v21  ;;  %v695_v29 = vrot.slane %v687_v63, 1  ;;  %v719_v30 = vmul.f32 4.0, %v685_v23  ;;  %v734_v37 = vsel %vm385_vm1, %v732_v13, %v733_v50 }
  0x72   : > { %v696_v38 = vrot.slane %v688_v25, 1  ;;  %v711_v43 = vsel %vm400_vm2, %v709_v26, %v710_v27  ;;  %v730_v45 = vrot.slane %v723_v31, 1  ;;  %vm532_vm3 = vcmask 72704  }
  0x73   : > { %v722_v39 = vadd.f32 %v720_v61, %v718_v28  ;;  %v729_v44 = vrot.slane %v719_v30, 1  ;;  %vm529_vm4 = vcmask 7168   ;;  %vm811_vm5 = vcmask 64512  }
  0x74   : > { %v697_v40 = vsel %vm385_vm1, %v695_v29, %v696_v38 }
  0x75   : > { %537 = vrot.lane.b32.xlu0 %v1950_v20, %s1628_s26  ;;  %v738_v46 = vadd.f32 %v734_v37, %v722_v39  ;;  %v703_v47 = vadd.f32 %v697_v40, %v675_v15  ;;  %v731_v48 = vsel %vm385_vm1, %v729_v44, %v730_v45 }
  0x77   : > { %767 = vrot.lane.b32.xlu1 %v738_v46, %s1628_s26  ;;  %v717_v18 = vadd.f32 %v711_v43, %v703_v47 }
  0x79   : > { %v721_v49 = vadd.f32 %v719_v30, %v717_v18 }
  0x7b   : > { %v737_v51 = vadd.f32 %v731_v48, %v721_v49 }
  0x7d   : > { %765 = vrot.lane.b32.xlu0 %v737_v51, %s1628_s26 }
  0xc7   : > { %v518_v16 = vpop.permute.xlu1 %517  ;;  %v512_v53 = vpop.permute.xlu0 %511 }
  0xc8   : > { %v530_v10 = vsel %vm529_vm4, %v512_v53, %v518_v16 }
  0xcb   : > { %v520_v54 = vpop.permute.xlu1 %519  ;;  %v514_v55 = vpop.permute.xlu0 %513 }
  0xcc   : > { %v531_v59 = vsel %vm529_vm4, %v514_v55, %v520_v54 }
  0xd1   : > { %v744_v56 = vpop.permute.xlu1 %743 }
  0xd5   : > { %v750_v57 = vpop.permute.xlu1 %749 }
  0xd6   : > { %v760_v5 = vsel %vm529_vm4, %v744_v56, %v750_v57 }
  0xd7   : > { %v742_v58 = vpop.permute.xlu0 %741 }
  0xd9   : > { %v526_v60 = vpop.permute.xlu1 %525 }
  0xda   : > { %v534_v61 = vsel %vm532_vm3, %v531_v59, %v526_v60 }
  0xdb   : > { %v748_v3 = vpop.permute.xlu0 %747  ;;  %561 = vrot.lane.b32.xlu1 %v534_v61, %s1631_s7  ;;  %v546_v13 = vmul.f32 6.0, %v534_v61 }
  0xdc   : > { %v759_v14 = vsel %vm529_vm4, %v742_v58, %v748_v3 }
  0xdd   : > { %v756_v8 = vpop.permute.xlu1 %755 }
  0xde   : > { %v762_v9 = vsel %vm532_vm3, %v760_v5, %v756_v8 }
  0xdf   : > { %v524_v11 = vpop.permute.xlu0 %523  ;;  %789 = vrot.lane.b32.xlu1 %v762_v9, %s1631_s7  ;;  %v774_v21 = vmul.f32 6.0, %v762_v9 }
  0xe0   : > { %v533_v12 = vsel %vm532_vm3, %v530_v10, %v524_v11 }
  0xe1   : > { %559 = vrot.lane.b32.xlu0 %v533_v12, %s1631_s7  ;;  %v540_v50 = vpop.permute.xlu1 %539  ;;  %v545_v63 = vmul.f32 6.0, %v533_v12 }
  0xe2   : > { %v544_v19 = vsel %vm529_vm4, %v1928_v52, %v540_v50 }
  0xe3   : > { %v754_v15 = vpop.permute.xlu0 %753  ;;  %551 = vrot.lane.b32.xlu1 %v546_v13, %s1629_s14  ;;  %v568_v23 = vmul.f32 4.0, %v544_v19 }
  0xe4   : > { %v761_v17 = vsel %vm532_vm3, %v759_v14, %v754_v15 }
  0xe5   : > { %787 = vrot.lane.b32.xlu0 %v761_v17, %s1631_s7  ;;  %v773_v29 = vmul.f32 6.0, %v761_v17 }
  0xe7   : > { %779 = vrot.lane.b32.xlu1 %v774_v21, %s1629_s14  ;;  %v538_v25 = vpop.permute.xlu0 %537 }
  0xe8   : > { %v543_v27 = vsel %vm529_vm4, %v1950_v20, %v538_v25 }
  0xe9   : > { %549 = vrot.lane.b32.xlu0 %v545_v63, %s1629_s14  ;;  %v768_v26 = vpop.permute.xlu1 %767  ;;  %v567_v52 = vmul.f32 4.0, %v543_v27 }
  0xea   : > { %v772_v28 = vsel %vm529_vm4, %v738_v46, %v768_v26 }
  0xeb   : > { %v796_v30 = vmul.f32 4.0, %v772_v28  ;;  %575 = vrot.lane.b32.xlu1 %v568_v23, %s1629_s14 }
  0xed   : > { %777 = vrot.lane.b32.xlu0 %v773_v29, %s1629_s14 }
  0xef   : > { %v766_v31 = vpop.permute.xlu0 %765  ;;  %803 = vrot.lane.b32.xlu1 %v796_v30, %s1629_s14 }
  0xf0   : > { %v771_v37 = vsel %vm529_vm4, %v737_v51, %v766_v31 }
  0xf1   : > { %573 = vrot.lane.b32.xlu0 %v567_v52, %s1629_s14  ;;  %v795_v38 = vmul.f32 4.0, %v771_v37 }
  0xf5   : > { %801 = vrot.lane.b32.xlu0 %v795_v38, %s1629_s14 }
 0x14d   : > { %v562_v20 = vpop.permute.xlu1 %561 }
 0x151   : > { %v790_v39 = vpop.permute.xlu1 %789 }
 0x153   : > { %v560_v40 = vpop.permute.xlu0 %559 }
 0x155   : > { %v552_v43 = vpop.permute.xlu1 %551 }
 0x156   : > { %v556_v44 = vadd.f32 %v552_v43, %v534_v61 }
 0x157   : > { %v788_v45 = vpop.permute.xlu0 %787 }
 0x158   : > { %v566_v46 = vadd.f32 %v562_v20, %v556_v44 }
 0x159   : > { %v780_v47 = vpop.permute.xlu1 %779 }
 0x15a   : > { %v784_v18 = vadd.f32 %v780_v47, %v762_v9  ;;  %v570_v51 = vadd.f32 %v568_v23, %v566_v46 }
 0x15b   : > { %v550_v48 = vpop.permute.xlu0 %549 }
 0x15c   : > { %v555_v49 = vadd.f32 %v550_v48, %v533_v12  ;;  %v794_v16 = vadd.f32 %v790_v39, %v784_v18 }
 0x15d   : > { %v576_v53 = vpop.permute.xlu1 %575 }
 0x15e   : > { %v565_v54 = vadd.f32 %v560_v40, %v555_v49  ;;  %v580_v55 = vadd.f32 %v576_v53, %v570_v51  ;;  %v798_v59 = vadd.f32 %v796_v30, %v794_v16 }
 0x15f   : > { %v778_v56 = vpop.permute.xlu0 %777 }
 0x160   : > { %v783_v57 = vadd.f32 %v778_v56, %v761_v17  ;;  %v582_v58 = vmul.f32 0.00390625, %v580_v55  ;;  %v569_v61 = vadd.f32 %v567_v52, %v565_v54 }
 0x161   : > { %v804_v60 = vpop.permute.xlu1 %803 }
 0x162   : > { %v793_v3 = vadd.f32 %v788_v45, %v783_v57  ;;  %813 = vst.msk [vmem:[%s1991_s0 + $0x8] sm:$0xff] %vm811_vm5, %v582_v58  ;;  %v808_v5 = vadd.f32 %v804_v60, %v798_v59 }
 0x163   : > { %v574_v8 = vpop.permute.xlu0 %573 }
 0x164   : > { %v579_v9 = vadd.f32 %v574_v8, %v569_v61  ;;  %v810_v10 = vmul.f32 0.00390625, %v808_v5  ;;  %v797_v13 = vadd.f32 %v795_v38, %v793_v3 }
 0x166   : > { %v581_v11 = vmul.f32 0.00390625, %v579_v9  ;;  %815 = vst.msk [vmem:[%s1995_s8 + $0x8] sm:$0xff] %vm811_vm5, %v810_v10  ;;  %v817_v12 = vsub.f32 %v582_v58, %v810_v10 }
 0x167   : > { %v802_v50 = vpop.permute.xlu0 %801 }
 0x168   : > { %812 = vst.msk [vmem:[%s1991_s0] sm:$0xff] %vm811_vm5, %v581_v11  ;;  %v821_v14 = vrot.slane %v817_v12, 1  ;;  %v825_v15 = vrot.slane %v817_v12, 7  ;;  %v829_v17 = vrot.slane %v817_v12, 6  ;;  %v807_v19 = vadd.f32 %v802_v50, %v797_v13 }
 0x16a   : > { %v809_v21 = vmul.f32 0.00390625, %v807_v19  ;;  %v835_v23 = vsel %vm364_vm0, %v825_v15, %v829_v17  ;;  %v833_v25 = vsel %vm364_vm0, %v821_v14, %v825_v15 }
 0x16b   : > { %v874_v29 = vrot.slane %v835_v23, 1  ;;  %v873_v30 = vrot.slane %v833_v25, 1  ;;  %v838_v18 = vmul.f32 6.0, %v833_v25  ;;  %v839_v48 = vmul.f32 6.0, %v835_v23 }
 0x16c   : > { %814 = vst.msk [vmem:[%s1995_s8] sm:$0xff] %vm811_vm5, %v809_v21  ;;  %v816_v63 = vsub.f32 %v581_v11, %v809_v21  ;;  %v861_v60 = vrot.slane %v833_v25, 2  ;;  %v862_v3 = vrot.slane %v835_v23, 2 }
 0x16d   : > { %v875_v40 = vsel %vm385_vm1, %v873_v30, %v874_v29  ;;  %v883_v45 = vadd.f32 %v874_v29, %v835_v23  ;;  %v847_v54 = vrot.slane %v838_v18, 1  ;;  %v848_v55 = vrot.slane %v839_v48, 1 }
 0x16e   : > { %v820_v26 = vrot.slane %v816_v63, 1  ;;  %v824_v27 = vrot.slane %v816_v63, 7  ;;  %v828_v28 = vrot.slane %v816_v63, 6  ;;  %v882_v47 = vadd.f32 %v875_v40, %v833_v25 }
 0x16f   : > { %v887_v51 = vmul.f32 0.5, %v883_v45  ;;  %v849_v58 = vsel %vm385_vm1, %v847_v54, %v848_v55  ;;  %v863_v10 = vsel %vm400_vm2, %v861_v60, %v862_v3 }
 0x170   : > { %v834_v52 = vsel %vm364_vm0, %v824_v27, %v828_v28  ;;  %v832_v31 = vsel %vm364_vm0, %v820_v26, %v824_v27  ;;  %v886_v53 = vmul.f32 0.5, %v882_v47  ;;  %v853_v61 = vadd.f32 %v849_v58, %v833_v25 }
 0x171   : > { %v871_v37 = vrot.slane %v834_v52, 1  ;;  %v870_v38 = vrot.slane %v832_v31, 1  ;;  %v836_v49 = vmul.f32 6.0, %v832_v31  ;;  %v837_v16 = vmul.f32 6.0, %v834_v52 }
 0x172   : > { %v858_v5 = vrot.slane %v832_v31, 2  ;;  %v859_v8 = vrot.slane %v834_v52, 2  ;;  %v867_v11 = vadd.f32 %v863_v10, %v853_v61 }
 0x173   : > { %v881_v20 = vadd.f32 %v871_v37, %v834_v52  ;;  %v872_v39 = vsel %vm385_vm1, %v870_v38, %v871_v37  ;;  %v844_v56 = vrot.slane %v836_v49, 1  ;;  %v845_v57 = vrot.slane %v837_v16, 1 }
 0x174   : > { %v880_v43 = vadd.f32 %v872_v39, %v832_v31  ;;  %v860_v12 = vsel %vm400_vm2, %v858_v5, %v859_v8  ;;  %v869_v50 = vmul.f32 0.125, %v867_v11 }
 0x175   : > { %v885_v44 = vmul.f32 0.5, %v881_v20  ;;  %v846_v59 = vsel %vm385_vm1, %v844_v56, %v845_v57 }
 0x176   : > { %v884_v46 = vmul.f32 0.5, %v880_v43  ;;  %v852_v9 = vadd.f32 %v846_v59, %v832_v31 }
 0x177   : > { %918 = vrot.lane.b32.xlu1 %v885_v44, %s1629_s14 }
 0x178   : > { %916 = vrot.lane.b32.xlu0 %v884_v46, %s1629_s14  ;;  %v866_v13 = vadd.f32 %v860_v12, %v852_v9 }
 0x17a   : > { %v868_v14 = vmul.f32 0.125, %v866_v13 }
 0x17b   : > { %922 = vrot.lane.b32.xlu1 %v887_v51, %s1629_s14 }
 0x17c   : > { %920 = vrot.lane.b32.xlu0 %v886_v53, %s1629_s14 }
 0x17f   : > { %930 = vrot.lane.b32.xlu1 %v885_v44, %s1628_s26 }
 0x180   : > { %928 = vrot.lane.b32.xlu0 %v884_v46, %s1628_s26 }
 0x183   : > { %934 = vrot.lane.b32.xlu1 %v887_v51, %s1628_s26 }
 0x184   : > { %932 = vrot.lane.b32.xlu0 %v886_v53, %s1628_s26 }
 0x187   : > { %942 = vrot.lane.b32.xlu1 %v885_v44, %s1630_s23 }
 0x188   : > { %940 = vrot.lane.b32.xlu0 %v884_v46, %s1630_s23 }
 0x18b   : > { %892 = vrot.lane.b32.xlu1 %v869_v50, %s1629_s14 }
 0x18c   : > { %890 = vrot.lane.b32.xlu0 %v868_v14, %s1629_s14 }
 0x18f   : > { %898 = vrot.lane.b32.xlu1 %v869_v50, %s1628_s26 }
 0x190   : > { %896 = vrot.lane.b32.xlu0 %v868_v14, %s1628_s26  ;;  %s1488_s26 = sshll.u32 %s1632_s29, 4  ;;  %s1489_s26 = int_to_ptr.vmem [resolvable:$false] %s1488_s26 }
 0x191   : > { %p1491_p4 = scmp.lt.s32.totalorder %s2140_s9, %s1489_s26 }
 0x193   : > { %904 = vrot.lane.b32.xlu1 %v869_v50, %s1630_s23 }
 0x194   : > { %902 = vrot.lane.b32.xlu0 %v868_v14, %s1630_s23 }
 0x197   : > { %946 = vrot.lane.b32.xlu1 %v887_v51, %s1630_s23 }
 0x198   : > { %944 = vrot.lane.b32.xlu0 %v886_v53, %s1630_s23 }
 0x1e9   : > { %v919_v15 = vpop.permute.xlu1 %918 }
 0x1ea   : > { %v917_v17 = vpop.permute.xlu0 %916 }
 0x1ed   : > { %v923_v19 = vpop.permute.xlu1 %922 }
 0x1ee   : > { %v921_v21 = vpop.permute.xlu0 %920 }
 0x1f1   : > { %v931_v63 = vpop.permute.xlu1 %930 }
 0x1f2   : > { %v929_v23 = vpop.permute.xlu0 %928  ;;  %v953_v27 = vsel %vm529_vm4, %v919_v15, %v931_v63 }
 0x1f3   : > { %v952_v29 = vsel %vm529_vm4, %v917_v17, %v929_v23 }
 0x1f5   : > { %v935_v25 = vpop.permute.xlu1 %934 }
 0x1f6   : > { %v933_v26 = vpop.permute.xlu0 %932  ;;  %v955_v18 = vsel %vm529_vm4, %v923_v19, %v935_v25 }
 0x1f7   : > { %v954_v49 = vsel %vm529_vm4, %v921_v21, %v933_v26 }
 0x1f9   : > { %v943_v28 = vpop.permute.xlu1 %942 }
 0x1fa   : > { %v2034_v30 = vsel %vm532_vm3, %v953_v27, %v943_v28  ;;  %v941_v52 = vpop.permute.xlu0 %940 }
 0x1fb   : > { %v2037_v31 = vsel %vm532_vm3, %v952_v29, %v941_v52  ;;  %1044 = vrot.lane.b32.xlu1 %v2034_v30, %s1629_s14  ;;  %v995_v54 = vmul.f32 6.0, %v2034_v30 }
 0x1fc   : > { %1042 = vrot.lane.b32.xlu0 %v2037_v31, %s1629_s14  ;;  %v994_v55 = vmul.f32 6.0, %v2037_v31 }
 0x1fd   : > { %v893_v37 = vpop.permute.xlu1 %892 }
 0x1fe   : > { %v891_v38 = vpop.permute.xlu0 %890 }
 0x201   : > { %v899_v20 = vpop.permute.xlu1 %898 }
 0x202   : > { %v897_v39 = vpop.permute.xlu0 %896  ;;  %v909_v40 = vsel %vm529_vm4, %v893_v37, %v899_v20 }
 0x203   : > { %v908_v44 = vsel %vm529_vm4, %v891_v38, %v897_v39 }
 0x205   : > { %v905_v43 = vpop.permute.xlu1 %904 }
 0x206   : > { %v2046_v45 = vsel %vm532_vm3, %v909_v40, %v905_v43  ;;  %v903_v46 = vpop.permute.xlu0 %902 }
 0x207   : > { %v2049_v47 = vsel %vm532_vm3, %v908_v44, %v903_v46  ;;  %986 = vrot.lane.b32.xlu1 %v2046_v45, %s1629_s14  ;;  %v961_v58 = vmul.f32 6.0, %v2046_v45 }
 0x208   : > { %984 = vrot.lane.b32.xlu0 %v2049_v47, %s1629_s14  ;;  %v960_v59 = vmul.f32 6.0, %v2049_v47 }
 0x209   : > { %v947_v48 = vpop.permute.xlu1 %946 }
 0x20a   : > { %v2058_v16 = vsel %vm532_vm3, %v955_v18, %v947_v48  ;;  %v945_v51 = vpop.permute.xlu0 %944 }
 0x20b   : > { %v2061_v53 = vsel %vm532_vm3, %v954_v49, %v945_v51  ;;  %1048 = vrot.lane.b32.xlu1 %v2058_v16, %s1629_s14  ;;  %v997_v56 = vmul.f32 6.0, %v2058_v16 }
 0x20c   : > { %1046 = vrot.lane.b32.xlu0 %v2061_v53, %s1629_s14  ;;  %v996_v57 = vmul.f32 6.0, %v2061_v53 }
 0x20f   : > { %1004 = vrot.lane.b32.xlu1 %v995_v54, %s1629_s14 }
 0x210   : > { %1002 = vrot.lane.b32.xlu0 %v994_v55, %s1629_s14 }
 0x213   : > { %1008 = vrot.lane.b32.xlu1 %v997_v56, %s1629_s14 }
 0x214   : > { %1006 = vrot.lane.b32.xlu0 %v996_v57, %s1629_s14 }
 0x217   : > { %1024 = vrot.lane.b32.xlu1 %v2034_v30, %s1631_s7 }
 0x218   : > { %1022 = vrot.lane.b32.xlu0 %v2037_v31, %s1631_s7 }
 0x21b   : > { %1028 = vrot.lane.b32.xlu1 %v2058_v16, %s1631_s7 }
 0x21c   : > { %1026 = vrot.lane.b32.xlu0 %v2061_v53, %s1631_s7 }
 0x21f   : > { %966 = vrot.lane.b32.xlu1 %v961_v58, %s1629_s14 }
 0x220   : > { %964 = vrot.lane.b32.xlu0 %v960_v59, %s1629_s14 }
 0x223   : > { %976 = vrot.lane.b32.xlu1 %v2046_v45, %s1631_s7 }
 0x224   : > { %974 = vrot.lane.b32.xlu0 %v2049_v47, %s1631_s7 }
 0x26d   : > { %v1045_v60 = vpop.permute.xlu1 %1044 }
 0x26e   : > { %v1043_v3 = vpop.permute.xlu0 %1042  ;;  %v1055_v61 = vadd.f32 %v1045_v60, %v2034_v30 }
 0x26f   : > { %v1054_v5 = vadd.f32 %v1043_v3, %v2037_v31 }
 0x270   : > { %v1059_v9 = vmul.f32 0.5, %v1055_v61 }
 0x271   : > { %v1058_v10 = vmul.f32 0.5, %v1054_v5 }
 0x272   : > { %v1111_v17 = vrot.slane %v1059_v9, 1 }
 0x273   : > { %v1110_v19 = vrot.slane %v1058_v10, 1 }
 0x275   : > { %v1112_v28 = vsel %vm385_vm1, %v1110_v19, %v1111_v17  ;;  %v1068_v19 = vsub.f32 %v1870_v35, %v1914_v36 }
 0x279   : > { %v987_v8 = vpop.permute.xlu1 %986 }
 0x27a   : > { %v991_v11 = vadd.f32 %v987_v8, %v2046_v45  ;;  %v985_v12 = vpop.permute.xlu0 %984 }
 0x27b   : > { %v990_v13 = vadd.f32 %v985_v12, %v2049_v47 }
 0x27c   : > { %v993_v50 = vmul.f32 0.5, %v991_v11 }
 0x27d   : > { %v992_v14 = vmul.f32 0.5, %v990_v13  ;;  %v1049_v15 = vpop.permute.xlu1 %1048 }
 0x27e   : > { %v1057_v21 = vadd.f32 %v1049_v15, %v2058_v16  ;;  %1074 = vrot.lane.b32.xlu1 %v993_v50, %s1629_s14  ;;  %v1047_v63 = vpop.permute.xlu0 %1046  ;;  %v1063_v50 = vsub.f32 %v1793_v2, %v1816_v32 }
 0x27f   : > { %v1056_v23 = vadd.f32 %v1047_v63, %v2061_v53  ;;  %1072 = vrot.lane.b32.xlu0 %v992_v14, %s1629_s14 }
 0x280   : > { %v1061_v25 = vmul.f32 0.5, %v1057_v21 }
 0x281   : > { %v1060_v26 = vmul.f32 0.5, %v1056_v23  ;;  %v1005_v38 = vpop.permute.xlu1 %1004 }
 0x282   : > { %v1114_v27 = vrot.slane %v1061_v25, 1  ;;  %v1003_v37 = vpop.permute.xlu0 %1002  ;;  %v1015_v49 = vadd.f32 %v1005_v38, %v2034_v30 }
 0x283   : > { %v1113_v29 = vrot.slane %v1060_v26, 1  ;;  %1116 = vrot.lane.b32.xlu0 %v1112_v28, %s1629_s14  ;;  %v1014_v51 = vadd.f32 %v1003_v37, %v2037_v31 }
 0x285   : > { %v1115_v52 = vsel %vm385_vm1, %v1113_v29, %v1114_v27  ;;  %v1009_v39 = vpop.permute.xlu1 %1008  ;;  %v1105_v29 = vsub.f32 %v1867_v34, %v1911_v33 }
 0x286   : > { %1118 = vrot.lane.b32.xlu1 %v1115_v52, %s1629_s14  ;;  %v1007_v20 = vpop.permute.xlu0 %1006  ;;  %v1017_v56 = vadd.f32 %v1009_v39, %v2058_v16  ;;  %v1062_v16 = vsub.f32 %v1787_v0, %v1824_v42  ;;  %v1085_v42 = vsub.f32 %v1800_v7, %v1821_v41  ;;  %s1490_s14 = scalar_lea.vmem %s1489_s26, 512 }
 0x287   : > { %v1016_v57 = vadd.f32 %v1007_v20, %v2061_v53  ;;  %p1492_p5 = scmp.lt.s32.totalorder %s1490_s14, %s1484_s25 }
 0x289   : > { %v1025_v43 = vpop.permute.xlu1 %1024  ;;  %p1493_p6 = por %p1492_p5, %p1491_p4 }
 0x28a   : > { %v1023_v40 = vpop.permute.xlu0 %1022  ;;  %v1035_v54 = vadd.f32 %v1025_v43, %v1015_v49 }
 0x28b   : > { %v1034_v55 = vadd.f32 %v1023_v40, %v1014_v51  ;;  %p1494_p7 = pnand %p1493_p6, %p1487_p3 }
 0x28c   : > { %v1039_v5 = vmul.f32 0.125, %v1035_v54 }
 0x28d   : > { %v1029_v46 = vpop.permute.xlu1 %1028  ;;  %v1038_v8 = vmul.f32 0.125, %v1034_v55 }
 0x28e   : > { %v1027_v44 = vpop.permute.xlu0 %1026  ;;  %v1037_v59 = vadd.f32 %v1029_v46, %v1017_v56  ;;  %v1091_v12 = vrot.slane %v1039_v5, 1 }
 0x28f   : > { %v1036_v60 = vadd.f32 %v1027_v44, %v1016_v57  ;;  %v1090_v13 = vrot.slane %v1038_v8, 1 }
 0x290   : > { %v1041_v11 = vmul.f32 0.125, %v1037_v59 }
 0x291   : > { %v967_v48 = vpop.permute.xlu1 %966  ;;  %v1040_v31 = vmul.f32 0.125, %v1036_v60  ;;  %v1092_v21 = vsel %vm385_vm1, %v1090_v13, %v1091_v12 }
 0x292   : > { %v965_v18 = vpop.permute.xlu0 %964  ;;  %v971_v9 = vadd.f32 %v967_v48, %v2046_v45  ;;  %v1084_v45 = vsub.f32 %v1790_v1, %v1842_v6  ;;  %v1094_v15 = vrot.slane %v1041_v11, 1  ;;  %v1104_v1 = vsub.f32 %v1889_v62, %v1937_v4 }
 0x293   : > { %v970_v3 = vadd.f32 %v965_v18, %v2049_v47  ;;  %v1069_v47 = vsub.f32 %v1857_v24, %v1904_v22  ;;  %v1093_v17 = vrot.slane %v1040_v31, 1 }
 0x294   : > { %v1098_v25 = vsub.f32 %v1084_v45, %v1092_v21 }
 0x295   : > { %v977_v61 = vpop.permute.xlu1 %976  ;;  %v1095_v24 = vsel %vm385_vm1, %v1093_v17, %v1094_v15 }
 0x296   : > { %v975_v58 = vpop.permute.xlu0 %974  ;;  %v981_v30 = vadd.f32 %v977_v61, %v971_v9  ;;  %v1099_v36 = vsub.f32 %v1085_v42, %v1095_v24  ;;  %v1100_v41 = vand.u32 2147483647, %v1098_v25 }
 0x297   : > { %v980_v10 = vadd.f32 %v975_v58, %v970_v3 }
 0x298   : > { %v983_v14 = vmul.f32 0.125, %v981_v30  ;;  %v1101_v4 = vand.u32 2147483647, %v1099_v36 }
 0x299   : > { %v982_v53 = vmul.f32 0.125, %v980_v10 }
 0x29a   : > { %v1065_v2 = vsub.f32 %v1063_v50, %v983_v14 }
 0x29b   : > { %v1064_v63 = vsub.f32 %v1062_v16, %v982_v53 }
 0x29c   : > { %v1067_v27 = vand.u32 2147483647, %v1065_v2 }
 0x29d   : > { %v1066_v26 = vand.u32 2147483647, %v1064_v63 }
 0x2f0   : > { %v1075_v0 = vpop.permute.xlu1 %1074 }
 0x2f1   : > { %v1079_v32 = vsub.f32 %v1069_v47, %v1075_v0  ;;  %v1073_v23 = vpop.permute.xlu0 %1072 }
 0x2f2   : > { %v1078_v22 = vsub.f32 %v1068_v19, %v1073_v23 }
 0x2f3   : > { %v1081_v6 = vand.u32 2147483647, %v1079_v32 }
 0x2f4   : > { %v1080_v35 = vand.u32 2147483647, %v1078_v22 }
 0x2f5   : > { %v1117_v28 = vpop.permute.xlu0 %1116  ;;  %v1083_v37 = vadd.f32 %v1081_v6, %v1067_v27 }
 0x2f6   : > { %v1082_v7 = vadd.f32 %v1080_v35, %v1066_v26  ;;  %v1122_v52 = vsub.f32 %v1104_v1, %v1117_v28 }
 0x2f7   : > { %v1103_v43 = vadd.f32 %v1101_v4, %v1083_v37 }
 0x2f8   : > { %v1102_v38 = vadd.f32 %v1100_v41, %v1082_v7  ;;  %v1124_v20 = vand.u32 2147483647, %v1122_v52  ;;  %v1119_v62 = vpop.permute.xlu1 %1118 }
 0x2f9   : > { %v1123_v39 = vsub.f32 %v1105_v29, %v1119_v62 }
 0x2fa   : > { %v1126_v40 = vadd.f32 %v1124_v20, %v1102_v38 }
 0x2fb   : > { %v1125_v44 = vand.u32 2147483647, %v1123_v39 }
 0x2fc   : > { %v1128_v34 = vsel %vm811_vm5, %v1126_v40, 0.0 }
 0x2fd   : > { %v1127_v46 = vadd.f32 %v1125_v44, %v1103_v43 }
 0x2ff   : > { %v1129_v33 = vsel %vm811_vm5, %v1127_v46, 0.0 }
 0x300   : > { %v1130_v18 = vadd.f32 %v1129_v33, %v1128_v34 }
 0x302   : > { %1131 = vadd.xlane.f32.xlu0 %v1130_v18 }
 0x303   : > { %1497 = shalt.err (!%p1494_p7)
}
 0x304   : > { %s1498_s23 = scalar_lea.hbm %s2138_s22, 256  ;;  %s1502_s8 = scalar_lea.hbm %s2260_s3, 1024 }
 0x305   : > { %p1499_p8 = scmp.ne.s32.totalorder %s2138_s22, %s1498_s23  ;;  %p1503_p13 = scmp.lt.u32.totalorder %s2138_s22, %s2260_s3 }
 0x306   : > { %p1504_p0 = scmp.lt.u32.totalorder %s1502_s8, %s1498_s23  ;;  %p1506_p2 = scmp.lt.u32.totalorder %s1498_s23, %s2138_s22 }
 0x307   : > { %p1500_p11 = pnand %p1499_p8, %p1712_p9 }
 0x308   : > { %p1505_p1 = por %p1504_p0, %p1503_p13 }
 0x309   : > { %p1501_p12 = pneg %p1500_p11 }
 0x30a   : > { %p1507_p3 = por %p1506_p2, %p1505_p1 }
 0x30c   : > { %p1508_p4 = pnand %p1507_p3, %p1501_p12 }
 0x30e   : > { %1511 = shalt.err (!%p1508_p4)
}
 0x30f   : > { %s1633_s12 = smov 128   ;;  %s1634_s25 = smov 8  }
 0x310   : > { %1418 = dma.vmem_to_hbm [thread:$0]  (%p1712_p9), %s2140_s9, 256, %s2138_s22, %s2142_s6, %s1633_s12, %s1633_s12, %s1634_s25  }
 0x311   : > { %s2174_s14 = scalar_lea.hbm %s2259_s2, %s1395_s5  ;;  %s1143_s23 = scalar_lea.sflag [#allocation4], %s1769_s13 }
 0x312   : > { %s1512_s7 = scalar_lea.vmem %s2178_s11, 256  ;;  %s1635_s20 = smov [#allocation7]  }
 0x313   : > { %p1513_p5 = scmp.ne.s32.totalorder %s2178_s11, %s1512_s7  ;;  %s1516_s9 = sshll.u32 %s1635_s20, 4  ;;  %s1517_s9 = int_to_ptr.vmem [resolvable:$false] %s1516_s9 }
 0x314   : > { %s1518_s22 = scalar_lea.vmem %s1517_s9, 512  ;;  %p1519_p8 = scmp.lt.s32.totalorder %s2178_s11, %s1517_s9 }
 0x315   : > { %p1514_p6 = pnand %p1513_p5, %p1712_p9  ;;  %p1520_p11 = scmp.lt.s32.totalorder %s1518_s22, %s1512_s7 }
 0x317   : > { %p1515_p7 = pneg %p1514_p6  ;;  %p1521_p12 = por %p1520_p11, %p1519_p8 }
 0x319   : > { %p1522_p13 = pnand %p1521_p12, %p1515_p7 }
 0x31b   : > { %1525 = shalt.err (!%p1522_p13)
}
 0x31c   : > { %s1526_s0 = scalar_lea.hbm %s2174_s14, 256  ;;  %s1530_s30 = scalar_lea.hbm %s2259_s2, 1024 }
 0x31d   : > { %p1527_p0 = scmp.ne.s32.totalorder %s2174_s14, %s1526_s0  ;;  %p1531_p3 = scmp.lt.u32.totalorder %s2174_s14, %s2259_s2 }
 0x31e   : > { %p1532_p4 = scmp.lt.u32.totalorder %s1530_s30, %s1526_s0  ;;  %p1534_p6 = scmp.lt.u32.totalorder %s1526_s0, %s2174_s14 }
 0x31f   : > { %p1528_p1 = pnand %p1527_p0, %p1712_p9 }
 0x320   : > { %p1533_p5 = por %p1532_p4, %p1531_p3 }
 0x321   : > { %p1529_p2 = pneg %p1528_p1 }
 0x322   : > { %p1535_p7 = por %p1534_p6, %p1533_p5 }
 0x324   : > { %p1536_p8 = pnand %p1535_p7, %p1529_p2 }
 0x326   : > { %1539 = shalt.err (!%p1536_p8)
}
 0x327   : > { %1417 = dma.vmem_to_hbm [thread:$0]  (%p1712_p9), %s2178_s11, 256, %s2174_s14, %s1143_s23, %s1633_s12, %s1633_s12, %s1634_s25  }
 0x328   : > { %s1370_s26 = sshll.u32 %s1769_s13, 3  ;;  %s1390_s9 = sshll.u32 %s1683_s19, 7 }
 0x329   : > { %s323_s7 = scalar_lea.vmem [#allocation10], %s1370_s26  ;;  %s2214_s25 = scalar_lea.hbm %s2261_s4, %s1390_s9 }
 0x32a   : > { %s1198_s20 = sshll.u32 %s323_s7, 4  ;;  %s1636_s13 = smov [#allocation10]   ;;  %s2209_s20 = int_to_ptr.vmem [resolvable:$true] %s1198_s20 }
 0x32b   : > { %s1540_s14 = scalar_lea.vmem %s2209_s20, 128  ;;  %s1544_s19 = sshll.u32 %s1636_s13, 4  ;;  %s1545_s19 = int_to_ptr.vmem [resolvable:$false] %s1544_s19 }
 0x32c   : > { %p1541_p11 = scmp.ne.s32.totalorder %s2209_s20, %s1540_s14  ;;  %s1546_s23 = scalar_lea.vmem %s1545_s19, 256 }
 0x32d   : > { %p1547_p0 = scmp.lt.s32.totalorder %s2209_s20, %s1545_s19  ;;  %p1548_p1 = scmp.lt.s32.totalorder %s1546_s23, %s1540_s14 }
 0x32e   : > { %p1542_p12 = pnand %p1541_p11, %p1712_p9 }
 0x32f   : > { %p1549_p2 = por %p1548_p1, %p1547_p0 }
 0x330   : > { %p1543_p13 = pneg %p1542_p12 }
 0x332   : > { %p1550_p3 = pnand %p1549_p2, %p1543_p13 }
 0x38f   : > { %v1132_v48 = vpop.xlane.xlu0 %1131 }
 0x390   : > { %v1133_v49 = vrot.slane %v1132_v48, 4 }
 0x392   : > { %v1134_v51 = vadd.f32 %v1133_v49, %v1132_v48 }
 0x394   : > { %v1135_v54 = vrot.slane %v1134_v51, 2 }
 0x396   : > { %v1136_v55 = vadd.f32 %v1135_v54, %v1134_v51 }
 0x398   : > { %v1137_v56 = vrot.slane %v1136_v55, 1 }
 0x39a   : > { %v1138_v57 = vadd.f32 %v1137_v56, %v1136_v55 }
 0x39c   : > { %1397 = vpush %v1138_v57 }
 0x3cd   : > { %s1398_s22 = spop %1397 }
 0x3ce   : > { %v1140_v58 = vstv %s1398_s22 }
 0x3cf   : > { %1141 = vst [vmem:[%s323_s7] sm:$0xff] %v1140_v58 }
 0x3d0   : > { %1553 = shalt.err (!%p1550_p3)
}
 0x3d1   : > { %s1554_s0 = scalar_lea.hbm %s2214_s25, 128  ;;  %s1558_s30 = scalar_lea.hbm %s2261_s4, 512 }
 0x3d2   : > { %p1555_p4 = scmp.ne.s32.totalorder %s2214_s25, %s1554_s0  ;;  %p1559_p7 = scmp.lt.u32.totalorder %s2214_s25, %s2261_s4 }
 0x3d3   : > { %p1560_p8 = scmp.lt.u32.totalorder %s1558_s30, %s1554_s0  ;;  %p1562_p12 = scmp.lt.u32.totalorder %s1554_s0, %s2214_s25 }
 0x3d4   : > { %p1556_p5 = pnand %p1555_p4, %p1712_p9 }
 0x3d5   : > { %p1561_p11 = por %p1560_p8, %p1559_p7 }
 0x3d6   : > { %p1557_p6 = pneg %p1556_p5 }
 0x3d7   : > { %p1563_p13 = por %p1562_p12, %p1561_p11 }
 0x3d9   : > { %p1564_p0 = pnand %p1563_p13, %p1557_p6 }
 0x3db   : > { %1567 = shalt.err (!%p1564_p0)
}
 0x3dc   : > { %1419 = dma.vmem_to_hbm [thread:$0]  (%p1712_p9), %s2209_s20, 128, %s2214_s25, %s2142_s6  }
 0x3dd PF: > { %p1433_p1 = scmp.ge.s32.totalorder %s1614_s18, 2  ;;  %s1210_s26 = sand.u32 1, %s1602_s15  }
 0x3de   : > { %s1211_s7 = scalar_lea.sflag [#allocation4], %s1210_s26 }
 0x3df   : > { %p1424_p2 = pnand %p1433_p1, %p1716_p10 }
 0x3e1   : > { %1593 = dma.done.wait (!%p1424_p2), %s1211_s7, 256  }
 0x3e2   : > { %1595 = vsyncadd (!%p1424_p2), %s1211_s7, 4294967040  ;;  %s2269_s9 = sadd.s32 4294967294, %s1614_s18  }
 0x3e3   : > { %s1219_s22 = sand.u32 1, %s2269_s9  }
 0x3e4   : > { %s1220_s11 = scalar_lea.sflag [#allocation9], %s1219_s22 }
 0x3e5   : > { %1597 = dma.done.wait (!%p1424_p2), %s1220_s11, 384  }
 0x3e6   : > { %1599 = vsyncadd (!%p1424_p2), %s1220_s11, 4294966912  ;;  %p24_p9 = scmp.ge.s32.totalorder %s1687_s21, 6   ;;  %s2270_s15 = smov %s1606_s16 }
 0x3e7   : > { %s2271_s16 = smov %s1610_s17  ;;  %s2272_s17 = smov %s1699_s24 }
 0x3e8   : > { %s2273_s18 = smov %s1687_s21  ;;  %26 = sbr.rel (!%p24_p9) target bundleno = 11 (0xb), region = 134 }
 0x3ef   :  { %1234 = vsyncpa [#allocation3], 1 }
 0x3f0   :  { %1236 = vsyncpa [#allocation3 + $0x1], 1 }
 0x3f1   :  { %1237 = vsyncpa [#allocation6], 1 }
 0x3f2   :  { %1239 = vsyncpa [#allocation6 + $0x1], 1 }
 0x3f3   :  { %1240 = vsyncpa [#allocation4], 1 }
 0x3f4   :  { %1242 = vsyncpa [#allocation4 + $0x1], 1 }
 0x3f5   :  { %1243 = vsyncpa [#allocation9], 1 }
 0x3f6   :  { %1245 = vsyncpa [#allocation9 + $0x1], 1 }

// kernel: lap_loss.4
= control target key start
LH: loop header
LB: loop body
LE: loop exit
PB: predicated region body
PF: predicated region fallthrough
CT: control target
= control target key end

     0   :  { %s1966_s0 = inlined_call_operand.hbm [shape: f32[4,8,4,4], index: 0, kind: input, shape index: {}]   ;;  %s1967_s1 = inlined_call_operand.hbm [shape: f32[4,8,4,4], index: 1, kind: input, shape index: {}]   ;;  %s1968_s2 = inlined_call_operand.hbm [shape: f32[8,4,4], index: 2, kind: output, shape index: {0}]   ;;  %s1969_s3 = inlined_call_operand.hbm [shape: f32[8,4,4], index: 3, kind: output, shape index: {1}]   ;;  %s1970_s4 = inlined_call_operand.hbm [shape: f32[4,8,128], index: 4, kind: output, shape index: {2}]  }
   0x1   :  { %1972 = sst [smem:[#allocation21_spill]] %s1966_s0 }
   0x2   :  { %10 = vsyncpa [#allocation3], 0 }
   0x3   :  { %12 = vsyncpa [#allocation3 + $0x1], 0 }
   0x4   :  { %13 = vsyncpa [#allocation6], 0 }
   0x5   :  { %15 = vsyncpa [#allocation6 + $0x1], 0 }
   0x6   :  { %16 = vsyncpa [#allocation4], 0 }
   0x7   :  { %18 = vsyncpa [#allocation4 + $0x1], 0 }
   0x8   :  { %19 = vsyncpa [#allocation9], 0 }
   0x9   :  { %21 = vsyncpa [#allocation9 + $0x1], 0  ;;  %s1479_s15 = smov 0   ;;  %s1481_s16 = smov 0  }
   0xa   :  { %s1483_s17 = smov 0   ;;  %s1485_s18 = smov 0  }
   0xb LB: > { %s1500_s19 = sadd.s32 4294967295, %s1431_s18   ;;  %s1971_s20 = sadd.s32 4294967294, %s1431_s18   ;;  %s1431_s18 = sphi %s1485_s18, %s1982_s18   ;;  %s1427_s17 = sphi %s1483_s17, %s1981_s17   ;;  %s1423_s16 = sphi %s1481_s16, %s1980_s16   ;;  %s1419_s15 = sphi %s1479_s15, %s1979_s15  }
   0xc   : > { %s1504_s21 = sadd.s32 1, %s1431_s18   ;;  %s34_s22 = sadd.s32 1, %s1427_s17 }
   0xd   : > { %s31_s23 = ssub.s32 %s1431_s18, %s1504_s21  ;;  %p41_p0 = scmp.ne.s32.totalorder %s1427_s17, %s1423_s16 }
   0xe   : > { %p32_p1 = scmp.eq.s32.totalorder %s31_s23, 0  ;;  %p42_p2 = scmp.eq.s32.totalorder %s1431_s18, 0 }
   0xf   : > { %p47_p3 = scmp.ne.s32.totalorder %s1423_s16, %s1419_s15  ;;  %p48_p4 = scmp.eq.s32.totalorder %s1500_s19, 0 }
  0x10   : > { %s1516_s24 = scalar_select %p32_p1, %s1427_s17, %s34_s22  }
  0x11   : > { %p1518_p5 = por %p42_p2, %p41_p0  ;;  %p1522_p6 = por %p48_p4, %p47_p3 }
  0x12   : > { %p97_p7 = scmp.eq.s32.totalorder %s1500_s19, 3  ;;  %p103_p8 = scmp.eq.s32.totalorder %s1971_s20, 3 }
  0x13   : > { %p1171_p11 = scmp.ge.s32.totalorder %s1431_s18, 4 }
  0x14   : > { %p1529_p9 = por %p97_p7, %p41_p0  ;;  %p1533_p10 = por %p103_p8, %p47_p3 }
  0x15   : > { %171 = sbr.rel (%p1171_p11) target bundleno = 54 (0x36), region = 16 }
  0x1c   : > { %s1539_s29 = sand.u32 1, %s1427_s17   ;;  %s1210_s30 = sshll.u32 %s1431_s18, 7 }
  0x1d   : > { %s1172_s5 = sshll.u32 %s1539_s29, 5  ;;  %s1977_s0 = sld [smem:[#allocation21_spill]] }
  0x1e   : > { %s1216_s9 = scalar_select %p1518_p5, [#allocation0], [#allocation15] }
  0x1f   : > { %s179_s10 = scalar_lea.vmem [#allocation2], %s1172_s5  ;;  %s1433_s13 = smov 512  }
  0x20   : > { %s198_s11 = sshll.u32 %s179_s10, 4  ;;  %s190_s12 = sld [smem:[%s1216_s9]]   ;;  %s199_s11 = int_to_ptr.vmem [resolvable:$true] %s198_s11 }
  0x21   : > { %1217 = sst [smem:[#allocation12]] (%p1518_p5), %s1433_s13  ;;  %s1434_s14 = smov 128  }
  0x22   : > { %1218 = sst [smem:[#allocation12 + $0x1]] (%p1518_p5), %s1434_s14  ;;  %s1435_s22 = smov 2  }
  0x23   : > { %s185_s8 = scalar_lea.hbm %s1977_s0, %s1210_s30  ;;  %1219 = sst [smem:[#allocation12 + $0x2]] (%p1518_p5), %s1435_s22 }
  0x24   : > { %s1436_s23 = smov 64   ;;  %s1437_s7 = smov 4  }
  0x25   : > { %1220 = sst [smem:[#allocation12 + $0x3]] (%p1518_p5), %s1436_s23  ;;  %s176_s10 = scalar_lea.sflag [#allocation3], %s1539_s29 }
  0x26   : > { %1221 = sst [smem:[#allocation12 + $0x4]] (%p1518_p5), %s1436_s23  ;;  %s1175_s6 = sshll.u32 %s190_s12, 26 }
  0x27   : > { %1222 = sst [smem:[#allocation12 + $0x5]] (%p1518_p5), %s1437_s7  ;;  %s1176_s9 = sadd.s32 134217728, %s1175_s6 }
  0x28   : > { %s1438_s20 = smov [#allocation11]  }
  0x29   : > { %1223 = dma.general (%p1518_p5), %s185_s8, 512, %s199_s11, %s176_s10, %s1438_s20, [#allocation12], %s1176_s9, 0  }
  0x2a   : > { %s231_s14 = scalar_lea.hbm %s1967_s1, %s1210_s30  ;;  %s225_s22 = scalar_lea.vmem [#allocation5], %s1172_s5 }
  0x2b   : > { %s1224_s12 = scalar_select %p1518_p5, [#allocation0], [#allocation16] }
  0x2c   : > { %s244_s23 = sshll.u32 %s225_s22, 4  ;;  %s1439_s7 = smov 512   ;;  %s245_s23 = int_to_ptr.vmem [resolvable:$true] %s244_s23 }
  0x2d   : > { %s236_s6 = sld [smem:[%s1224_s12]]   ;;  %s1440_s20 = smov 128  }
  0x2e   : > { %1225 = sst [smem:[#allocation14]] (%p1518_p5), %s1439_s7  ;;  %s1441_s0 = smov 2  }
  0x2f   : > { %1226 = sst [smem:[#allocation14 + $0x1]] (%p1518_p5), %s1440_s20  ;;  %s1442_s8 = smov 64  }
  0x30   : > { %1227 = sst [smem:[#allocation14 + $0x2]] (%p1518_p5), %s1441_s0  ;;  %s1443_s5 = smov 4  }
  0x31   : > { %1228 = sst [smem:[#allocation14 + $0x3]] (%p1518_p5), %s1442_s8  ;;  %s222_s9 = scalar_lea.sflag [#allocation6], %s1539_s29 }
  0x32   : > { %1229 = sst [smem:[#allocation14 + $0x4]] (%p1518_p5), %s1442_s8  ;;  %s1444_s10 = smov [#allocation13]  }
  0x33   : > { %s1180_s30 = sshll.u32 %s236_s6, 26  ;;  %1230 = sst [smem:[#allocation14 + $0x5]] (%p1518_p5), %s1443_s5 }
  0x34   : > { %s1181_s11 = sadd.s32 134217728, %s1180_s30 }
  0x35   : > { %1231 = dma.general (%p1518_p5), %s231_s14, 512, %s245_s23, %s222_s9, %s1444_s10, [#allocation14], %s1181_s11, 0  }
  0x36 PF: > { %p1182_p12 = scmp.ge.s32.totalorder %s1431_s18, 1  ;;  %p265_p13 = scmp.lt.s32.totalorder %s1431_s18, 5 }
  0x38   : > { %p266_p0 = pnand %p1182_p12, %p265_p13 }
  0x39   : > { %s1586_s13 = sand.u32 (!%p266_p0), 1, %s1423_s16  }
  0x3a   : > { %269 = sbr.rel (%p266_p0) target bundleno = 969 (0x3c9), region = 28  ;;  %s1183_s12 = sshll.u32 (!%p266_p0), %s1586_s13, 5 }
  0x3b   : > { %s272_s22 = scalar_lea.sflag (!%p266_p0), [#allocation3], %s1586_s13  ;;  %s1590_s6 = scalar_lea.vmem (!%p266_p0), [#allocation2], %s1183_s12 }
  0x41   : > { %1402 = dma.done.wait (%p1522_p6), %s272_s22, 512  }
  0x42   : > { %1404 = vsyncadd (%p1522_p6), %s272_s22, 4294966784  ;;  %s281_s25 = scalar_lea.sflag [#allocation6], %s1586_s13  ;;  %s1597_s29 = scalar_lea.vmem [#allocation5], %s1183_s12 }
  0x43   : > { %1406 = dma.done.wait (%p1522_p6), %s281_s25, 512  }
  0x44   : > { %1408 = vsyncadd (%p1522_p6), %s281_s25, 4294966784  ;;  %vm364_vm0 = vcmask 1040384   ;;  %vm367_vm1 = vcmask 1044480   ;;  %v1604_v0 = vld [vmem:[%s1590_s6] sm:$0xf]  ;;  %s1445_s26 = smov 1  }
  0x45   : > { %v1607_v1 = vld [vmem:[%s1590_s6 + $0x10] sm:$0xf]  ;;  %v1610_v2 = vld [vmem:[%s1590_s6 + $0x4] sm:$0xf]  ;;  %v352_v3 = vrot.slane %v1604_v0, 1  ;;  %v356_v4 = vrot.slane %v1604_v0, 7 }
  0x46   : > { %v360_v5 = vrot.slane %v1604_v0, 6  ;;  %v372_v6 = vrot.slane %v1607_v1, 7  ;;  %v1617_v7 = vld [vmem:[%s1590_s6 + $0x14] sm:$0xf]  ;;  %v353_v8 = vrot.slane %v1610_v2, 1  ;;  %v357_v9 = vrot.slane %v1610_v2, 7 }
  0x47   : > { %v361_v10 = vrot.slane %v1610_v2, 6  ;;  %v373_v11 = vrot.slane %v1617_v7, 7  ;;  %v1624_v12 = vld [vmem:[%s1597_s29 + $0x4] sm:$0xf]  ;;  %v365_v13 = vsel %vm364_vm0, %v352_v3, %v356_v4  ;;  %v1636_v21 = vld [vmem:[%s1597_s29 + $0x14] sm:$0xf] }
  0x48   : > { %v376_v14 = vsel %vm364_vm0, %v1607_v1, %v372_v6  ;;  %v541_v15 = vrot.slane %v1624_v12, 1  ;;  %v545_v16 = vrot.slane %v1624_v12, 7  ;;  %v368_v17 = vsel %vm367_vm1, %v365_v13, %v360_v5  ;;  %v1640_v25 = vld [vmem:[%s1597_s29] sm:$0xf]  ;;  %v1646_v34 = vld [vmem:[%s1597_s29 + $0x10] sm:$0xf] }
  0x49   : > { %v396_v18 = vmul.f32 4.0, %v376_v14  ;;  %v366_v19 = vsel %vm364_vm0, %v353_v8, %v357_v9  ;;  %v377_v20 = vsel %vm364_vm0, %v1617_v7, %v373_v11  ;;  %v378_v22 = vmul.f32 6.0, %v368_v17  ;;  %v1652_v39 = vld [vmem:[%s1590_s6 + $0xc] sm:$0xf]  ;;  %v1669_v8 = vld [vmem:[%s1590_s6 + $0x8] sm:$0xf] }
  0x4a   : > { %v369_v23 = vsel %vm367_vm1, %v366_v19, %v361_v10  ;;  %v397_v24 = vmul.f32 4.0, %v377_v20  ;;  %v390_v26 = vrot.slane %v368_v17, 2  ;;  %v549_v29 = vrot.slane %v1624_v12, 6  ;;  %v1672_v10 = vld [vmem:[%s1590_s6 + $0x1c] sm:$0xf]  ;;  %s1446_s14 = smov 127  }
  0x4b   : > { %v402_v27 = vrot.slane %v396_v18, 1  ;;  %v379_v28 = vmul.f32 6.0, %v369_v23  ;;  %v382_v30 = vrot.slane %v378_v22, 1  ;;  %v391_v31 = vrot.slane %v369_v23, 2  ;;  %s1447_s23 = smov 2   ;;  %s1448_s7 = smov 126  }
  0x4c   : > { %v553_v32 = vsel %vm364_vm0, %v541_v15, %v545_v16  ;;  %v559_v33 = vrot.slane %v1636_v21, 7  ;;  %v540_v37 = vrot.slane %v1640_v25, 1  ;;  %v544_v38 = vrot.slane %v1640_v25, 7  ;;  %s1766_s20 = sshll.u32 %s1586_s13, 3  ;;  %s964_s5 = sand.u32 1, %s1500_s19  }
  0x4d   : > { %v383_v35 = vrot.slane %v379_v28, 1  ;;  %v555_v36 = vsel %vm367_vm1, %v553_v32, %v549_v29  ;;  %v386_v40 = vadd.f32 %v382_v30, %v368_v17  ;;  %v403_v41 = vrot.slane %v397_v24, 1  ;;  %v1682_v17 = vld [vmem:[%s1597_s29 + $0xc] sm:$0xf]  ;;  %s1769_s0 = scalar_lea.vmem [#allocation7], %s1766_s20  ;;  %s1776_s8 = scalar_lea.vmem [#allocation8], %s1766_s20 }
  0x4e   : > { %v563_v42 = vsel %vm364_vm0, %v1636_v21, %v559_v33  ;;  %v565_v43 = vmul.f32 6.0, %v555_v36  ;;  %v577_v45 = vrot.slane %v555_v36, 2  ;;  %v548_v46 = vrot.slane %v1640_v25, 6  ;;  %s999_s30 = sshll.u32 %s1776_s8, 4  ;;  %s983_s11 = sshll.u32 %s1769_s0, 4  ;;  %s1843_s30 = int_to_ptr.vmem [resolvable:$true] %s999_s30  ;;  %s1845_s11 = int_to_ptr.vmem [resolvable:$true] %s983_s11 }
  0x4f   : > { %v387_v44 = vadd.f32 %v383_v35, %v369_v23  ;;  %v552_v47 = vsel %vm364_vm0, %v540_v37, %v544_v38  ;;  %v394_v48 = vadd.f32 %v390_v26, %v386_v40  ;;  %v558_v50 = vrot.slane %v1646_v34, 7  ;;  %s1848_s9 = sshll.u32 %s1500_s19, 7  ;;  %s1301_s25 = scalar_lea.vmem %s1843_s30, 128 }
  0x50   : > { %v569_v49 = vrot.slane %v565_v43, 1  ;;  %v411_v51 = vrot.slane %v1652_v39, 1  ;;  %v583_v53 = vmul.f32 4.0, %v563_v42  ;;  %v554_v54 = vsel %vm367_vm1, %v552_v47, %v548_v46  ;;  %v1707_v43 = vld [vmem:[%s1597_s29 + $0x1c] sm:$0xf]  ;;  %s1854_s22 = scalar_lea.hbm %s1969_s3, %s1848_s9  ;;  %p1302_p1 = scmp.ne.s32.totalorder %s1843_s30, %s1301_s25 }
  0x51   : > { %v395_v52 = vadd.f32 %v391_v31, %v387_v44  ;;  %v415_v55 = vrot.slane %v1652_v39, 7  ;;  %v398_v56 = vadd.f32 %v396_v18, %v394_v48  ;;  %v562_v58 = vsel %vm364_vm0, %v1646_v34, %v558_v50  ;;  %v1685_v18 = vld [vmem:[%s1590_s6 + $0x18] sm:$0xf]  ;;  %s1856_s6 = scalar_lea.sflag [#allocation9], %s964_s5 }
  0x52   : > { %v573_v57 = vadd.f32 %v569_v49, %v555_v36  ;;  %v564_v59 = vmul.f32 6.0, %v554_v54  ;;  %v576_v61 = vrot.slane %v554_v54, 2  ;;  %v582_v62 = vmul.f32 4.0, %v562_v58  ;;  %v1701_v36 = vld [vmem:[%s1597_s29 + $0x8] sm:$0xf]  ;;  %p1303_p2 = pnand %p1302_p1, %p1529_p9 }
  0x53   : > { %v399_v60 = vadd.f32 %v397_v24, %v395_v52  ;;  %v419_v63 = vrot.slane %v1652_v39, 6  ;;  %v1665_v3 = vadd.f32 %v402_v27, %v398_v56  ;;  %v423_v6 = vsel %vm364_vm0, %v411_v51, %v415_v55  ;;  %v1712_v48 = vld [vmem:[%s1597_s29 + $0x18] sm:$0xf]  ;;  %s1449_s29 = smov [#allocation8]  }
  0x54   : > { %v581_v4 = vadd.f32 %v577_v45, %v573_v57  ;;  %v568_v5 = vrot.slane %v564_v59, 1  ;;  %v589_v9 = vrot.slane %v583_v53, 1  ;;  %v410_v19 = vrot.slane %v1669_v8, 1  ;;  %p1304_p3 = pneg %p1303_p2 }
  0x55   : > { %v425_v11 = vsel %vm367_vm1, %v423_v6, %v419_v63  ;;  %472 = vrot.lane.b32.xlu1 %v1665_v3, %s1445_s26  ;;  %466 = vrot.lane.b32.xlu0 %v1665_v3, %s1446_s14  ;;  %v1679_v13 = vadd.f32 %v403_v41, %v399_v60  ;;  %v414_v20 = vrot.slane %v1669_v8, 7  ;;  %v418_v22 = vrot.slane %v1669_v8, 6 }
  0x56   : > { %v585_v14 = vadd.f32 %v583_v53, %v581_v4  ;;  %v572_v15 = vadd.f32 %v568_v5, %v554_v54  ;;  %v435_v16 = vmul.f32 6.0, %v425_v11  ;;  %v588_v24 = vrot.slane %v582_v62, 1 }
  0x57   : > { %v429_v26 = vrot.slane %v1672_v10, 7  ;;  %v422_v28 = vsel %vm364_vm0, %v410_v19, %v414_v20  ;;  %v597_v29 = vrot.slane %v1682_v17, 1  ;;  %v601_v30 = vrot.slane %v1682_v17, 7 }
  0x58   : > { %v580_v23 = vadd.f32 %v576_v61, %v572_v15  ;;  %v439_v27 = vrot.slane %v435_v16, 1  ;;  %v593_v31 = vadd.f32 %v589_v9, %v585_v14  ;;  %v424_v33 = vsel %vm367_vm1, %v422_v28, %v418_v22 }
  0x59   : > { %474 = vrot.lane.b32.xlu1 %v1679_v13, %s1445_s26  ;;  %468 = vrot.lane.b32.xlu0 %v1679_v13, %s1446_s14  ;;  %v428_v35 = vrot.slane %v1685_v18, 7  ;;  %v434_v37 = vmul.f32 6.0, %v424_v33  ;;  %v605_v38 = vrot.slane %v1682_v17, 6  ;;  %v433_v41 = vsel %vm364_vm0, %v1672_v10, %v429_v26 }
  0x5a   : > { %v584_v32 = vadd.f32 %v582_v62, %v580_v23  ;;  %v447_v42 = vrot.slane %v425_v11, 2  ;;  %v609_v44 = vsel %vm364_vm0, %v597_v29, %v601_v30  ;;  %v443_v45 = vadd.f32 %v439_v27, %v425_v11 }
  0x5b   : > { %v438_v46 = vrot.slane %v434_v37, 1  ;;  %v611_v47 = vsel %vm367_vm1, %v609_v44, %v605_v38  ;;  %v596_v49 = vrot.slane %v1701_v36, 1  ;;  %v432_v50 = vsel %vm364_vm0, %v1685_v18, %v428_v35 }
  0x5c   : > { %v592_v40 = vadd.f32 %v588_v24, %v584_v32  ;;  %v446_v51 = vrot.slane %v424_v33, 2  ;;  %v621_v52 = vmul.f32 6.0, %v611_v47  ;;  %v615_v54 = vrot.slane %v1707_v43, 7 }
  0x5d   : > { %654 = vrot.lane.b32.xlu1 %v593_v31, %s1446_s14  ;;  %v442_v53 = vadd.f32 %v438_v46, %v424_v33  ;;  %v600_v55 = vrot.slane %v1701_v36, 7  ;;  %v604_v56 = vrot.slane %v1701_v36, 6  ;;  %v453_v57 = vmul.f32 4.0, %v433_v41 }
  0x5e   : > { %652 = vrot.lane.b32.xlu0 %v592_v40, %s1446_s14  ;;  %v625_v58 = vrot.slane %v621_v52, 1  ;;  %v614_v59 = vrot.slane %v1712_v48, 7  ;;  %v451_v60 = vadd.f32 %v447_v42, %v443_v45  ;;  %v452_v61 = vmul.f32 4.0, %v432_v50 }
  0x5f   : > { %v608_v62 = vsel %vm364_vm0, %v596_v49, %v600_v55  ;;  %v450_v63 = vadd.f32 %v446_v51, %v442_v53  ;;  %v633_v5 = vrot.slane %v611_v47, 2  ;;  %v619_v9 = vsel %vm364_vm0, %v1707_v43, %v615_v54 }
  0x60   : > { %v629_v4 = vadd.f32 %v625_v58, %v611_v47  ;;  %v610_v6 = vsel %vm367_vm1, %v608_v62, %v604_v56  ;;  %v618_v11 = vsel %vm364_vm0, %v1712_v48, %v614_v59  ;;  %v459_v15 = vrot.slane %v453_v57, 1 }
  0x61   : > { %660 = vrot.lane.b32.xlu1 %v593_v31, %s1445_s26  ;;  %v620_v14 = vmul.f32 6.0, %v610_v6  ;;  %v455_v16 = vadd.f32 %v453_v57, %v451_v60  ;;  %v458_v19 = vrot.slane %v452_v61, 1  ;;  %v632_v22 = vrot.slane %v610_v6, 2 }
  0x62   : > { %658 = vrot.lane.b32.xlu0 %v592_v40, %s1445_s26  ;;  %v454_v23 = vadd.f32 %v452_v61, %v450_v63  ;;  %v637_v24 = vadd.f32 %v633_v5, %v629_v4  ;;  %v639_v26 = vmul.f32 4.0, %v619_v9  ;;  %v638_v27 = vmul.f32 4.0, %v618_v11 }
  0x63   : > { %v624_v20 = vrot.slane %v620_v14, 1  ;;  %v463_v29 = vadd.f32 %v459_v15, %v455_v16  ;;  %vm484_vm2 = vcmask 7168   ;;  %vm487_vm3 = vcmask 39936  }
  0x64   : > { %v462_v32 = vadd.f32 %v458_v19, %v454_v23  ;;  %v641_v33 = vadd.f32 %v639_v26, %v637_v24  ;;  %v645_v35 = vrot.slane %v639_v26, 1  ;;  %v644_v37 = vrot.slane %v638_v27, 1 }
  0x65   : > { %480 = vrot.lane.b32.xlu1 %v1679_v13, %s1447_s23  ;;  %v628_v28 = vadd.f32 %v624_v20, %v610_v6  ;;  %vm722_vm4 = vcmask 27648  }
  0x66   : > { %478 = vrot.lane.b32.xlu0 %v1665_v3, %s1447_s23  ;;  %v649_v3 = vadd.f32 %v645_v35, %v641_v33 }
  0x67   : > { %v636_v30 = vadd.f32 %v632_v22, %v628_v28 }
  0x69   : > { %666 = vrot.lane.b32.xlu1 %v593_v31, %s1447_s23  ;;  %v640_v38 = vadd.f32 %v638_v27, %v636_v30 }
  0x6a   : > { %664 = vrot.lane.b32.xlu0 %v592_v40, %s1447_s23 }
  0x6b   : > { %v648_v13 = vadd.f32 %v644_v37, %v640_v38 }
  0x6d   : > { %494 = vrot.lane.b32.xlu1 %v463_v29, %s1445_s26 }
  0x6e   : > { %492 = vrot.lane.b32.xlu0 %v462_v32, %s1445_s26 }
  0x71   : > { %678 = vrot.lane.b32.xlu1 %v649_v3, %s1445_s26 }
  0x72   : > { %676 = vrot.lane.b32.xlu0 %v648_v13, %s1445_s26 }
  0xc7   : > { %v473_v41 = vpop.permute.xlu1 %472  ;;  %v467_v42 = vpop.permute.xlu0 %466 }
  0xc8   : > { %v485_v49 = vsel %vm484_vm2, %v467_v42, %v473_v41 }
  0xcb   : > { %v475_v31 = vpop.permute.xlu1 %474  ;;  %v469_v44 = vpop.permute.xlu0 %468 }
  0xcc   : > { %v486_v50 = vsel %vm484_vm2, %v469_v44, %v475_v31 }
  0xcf   : > { %v655_v40 = vpop.permute.xlu1 %654 }
  0xd0   : > { %v653_v45 = vpop.permute.xlu0 %652 }
  0xd3   : > { %v661_v46 = vpop.permute.xlu1 %660 }
  0xd4   : > { %v659_v47 = vpop.permute.xlu0 %658  ;;  %v671_v55 = vsel %vm484_vm2, %v655_v40, %v661_v46 }
  0xd5   : > { %v670_v56 = vsel %vm484_vm2, %v653_v45, %v659_v47 }
  0xd7   : > { %v481_v51 = vpop.permute.xlu1 %480 }
  0xd8   : > { %v479_v52 = vpop.permute.xlu0 %478  ;;  %v489_v53 = vsel %vm487_vm3, %v486_v50, %v481_v51 }
  0xd9   : > { %v488_v54 = vsel %vm487_vm3, %v485_v49, %v479_v52  ;;  %516 = vrot.lane.b32.xlu1 %v489_v53, %s1448_s7  ;;  %v501_v61 = vmul.f32 6.0, %v489_v53 }
  0xda   : > { %514 = vrot.lane.b32.xlu0 %v488_v54, %s1448_s7  ;;  %v500_v62 = vmul.f32 6.0, %v488_v54 }
  0xdb   : > { %v667_v57 = vpop.permute.xlu1 %666 }
  0xdc   : > { %v665_v58 = vpop.permute.xlu0 %664  ;;  %v673_v59 = vsel %vm487_vm3, %v671_v55, %v667_v57 }
  0xdd   : > { %v672_v60 = vsel %vm487_vm3, %v670_v56, %v665_v58  ;;  %700 = vrot.lane.b32.xlu1 %v673_v59, %s1448_s7  ;;  %v685_v9 = vmul.f32 6.0, %v673_v59 }
  0xde   : > { %698 = vrot.lane.b32.xlu0 %v672_v60, %s1448_s7  ;;  %v684_v11 = vmul.f32 6.0, %v672_v60 }
  0xdf   : > { %v495_v63 = vpop.permute.xlu1 %494 }
  0xe0   : > { %v493_v4 = vpop.permute.xlu0 %492  ;;  %v499_v5 = vsel %vm484_vm2, %v463_v29, %v495_v63 }
  0xe1   : > { %506 = vrot.lane.b32.xlu1 %v501_v61, %s1446_s14  ;;  %v498_v6 = vsel %vm484_vm2, %v462_v32, %v493_v4  ;;  %v523_v16 = vmul.f32 4.0, %v499_v5 }
  0xe2   : > { %504 = vrot.lane.b32.xlu0 %v500_v62, %s1446_s14  ;;  %v522_v19 = vmul.f32 4.0, %v498_v6 }
  0xe3   : > { %v679_v14 = vpop.permute.xlu1 %678 }
  0xe4   : > { %v677_v15 = vpop.permute.xlu0 %676  ;;  %v683_v20 = vsel %vm484_vm2, %v649_v3, %v679_v14 }
  0xe5   : > { %690 = vrot.lane.b32.xlu1 %v685_v9, %s1446_s14  ;;  %v682_v22 = vsel %vm484_vm2, %v648_v13, %v677_v15  ;;  %v707_v23 = vmul.f32 4.0, %v683_v20 }
  0xe6   : > { %688 = vrot.lane.b32.xlu0 %v684_v11, %s1446_s14  ;;  %v706_v24 = vmul.f32 4.0, %v682_v22 }
  0xe9   : > { %530 = vrot.lane.b32.xlu1 %v523_v16, %s1446_s14 }
  0xea   : > { %528 = vrot.lane.b32.xlu0 %v522_v19, %s1446_s14 }
  0xed   : > { %714 = vrot.lane.b32.xlu1 %v707_v23, %s1446_s14 }
  0xee   : > { %712 = vrot.lane.b32.xlu0 %v706_v24, %s1446_s14 }
 0x14b   : > { %v517_v26 = vpop.permute.xlu1 %516 }
 0x14c   : > { %v515_v27 = vpop.permute.xlu0 %514 }
 0x14f   : > { %v701_v28 = vpop.permute.xlu1 %700 }
 0x150   : > { %v699_v29 = vpop.permute.xlu0 %698 }
 0x153   : > { %v507_v30 = vpop.permute.xlu1 %506 }
 0x154   : > { %v505_v32 = vpop.permute.xlu0 %504  ;;  %v511_v33 = vadd.f32 %v507_v30, %v489_v53 }
 0x155   : > { %v510_v35 = vadd.f32 %v505_v32, %v488_v54 }
 0x156   : > { %v521_v37 = vadd.f32 %v517_v26, %v511_v33 }
 0x157   : > { %v520_v38 = vadd.f32 %v515_v27, %v510_v35  ;;  %v691_v3 = vpop.permute.xlu1 %690 }
 0x158   : > { %v689_v13 = vpop.permute.xlu0 %688  ;;  %v695_v41 = vadd.f32 %v691_v3, %v673_v59  ;;  %v525_v40 = vadd.f32 %v523_v16, %v521_v37 }
 0x159   : > { %v694_v42 = vadd.f32 %v689_v13, %v672_v60  ;;  %v524_v45 = vadd.f32 %v522_v19, %v520_v38 }
 0x15a   : > { %v705_v31 = vadd.f32 %v701_v28, %v695_v41 }
 0x15b   : > { %v704_v44 = vadd.f32 %v699_v29, %v694_v42  ;;  %v531_v46 = vpop.permute.xlu1 %530 }
 0x15c   : > { %v529_v47 = vpop.permute.xlu0 %528  ;;  %v535_v49 = vadd.f32 %v531_v46, %v525_v40  ;;  %v709_v53 = vadd.f32 %v707_v23, %v705_v31 }
 0x15d   : > { %v534_v50 = vadd.f32 %v529_v47, %v524_v45  ;;  %v708_v54 = vadd.f32 %v706_v24, %v704_v44 }
 0x15e   : > { %v537_v51 = vmul.f32 0.00390625, %v535_v49 }
 0x15f   : > { %v536_v52 = vmul.f32 0.00390625, %v534_v50  ;;  %v715_v55 = vpop.permute.xlu1 %714 }
 0x160   : > { %v713_v56 = vpop.permute.xlu0 %712  ;;  %v719_v57 = vadd.f32 %v715_v55, %v709_v53  ;;  %724 = vst.msk [vmem:[%s1769_s0 + $0x4] sm:$0xf] %vm722_vm4, %v537_v51 }
 0x161   : > { %v718_v58 = vadd.f32 %v713_v56, %v708_v54  ;;  %723 = vst.msk [vmem:[%s1769_s0] sm:$0xf] %vm722_vm4, %v536_v52 }
 0x162   : > { %v721_v59 = vmul.f32 0.00390625, %v719_v57 }
 0x163   : > { %v720_v60 = vmul.f32 0.00390625, %v718_v58 }
 0x164   : > { %v728_v61 = vsub.f32 %v537_v51, %v721_v59  ;;  %726 = vst.msk [vmem:[%s1776_s8 + $0x4] sm:$0xf] %vm722_vm4, %v721_v59 }
 0x165   : > { %v727_v62 = vsub.f32 %v536_v52, %v720_v60  ;;  %725 = vst.msk [vmem:[%s1776_s8] sm:$0xf] %vm722_vm4, %v720_v60 }
 0x166   : > { %v732_v63 = vrot.slane %v728_v61, 1  ;;  %v736_v4 = vrot.slane %v728_v61, 7  ;;  %v740_v5 = vrot.slane %v728_v61, 6 }
 0x167   : > { %v731_v6 = vrot.slane %v727_v62, 1  ;;  %v735_v9 = vrot.slane %v727_v62, 7  ;;  %v739_v11 = vrot.slane %v727_v62, 6 }
 0x168   : > { %v744_v14 = vsel %vm364_vm0, %v732_v63, %v736_v4 }
 0x169   : > { %v743_v15 = vsel %vm364_vm0, %v731_v6, %v735_v9  ;;  %v746_v16 = vsel %vm367_vm1, %v744_v14, %v740_v5 }
 0x16a   : > { %v768_v19 = vrot.slane %v746_v16, 1  ;;  %v745_v20 = vsel %vm367_vm1, %v743_v15, %v739_v11  ;;  %v748_v22 = vmul.f32 6.0, %v746_v16  ;;  %v760_v37 = vrot.slane %v746_v16, 2 }
 0x16b   : > { %v767_v23 = vrot.slane %v745_v20, 1  ;;  %v747_v24 = vmul.f32 6.0, %v745_v20  ;;  %v759_v38 = vrot.slane %v745_v20, 2 }
 0x16c   : > { %v772_v26 = vadd.f32 %v768_v19, %v746_v16  ;;  %v752_v27 = vrot.slane %v748_v22, 1 }
 0x16d   : > { %v771_v28 = vadd.f32 %v767_v23, %v745_v20  ;;  %v751_v29 = vrot.slane %v747_v24, 1 }
 0x16e   : > { %v774_v30 = vmul.f32 0.5, %v772_v26  ;;  %v756_v32 = vadd.f32 %v752_v27, %v746_v16 }
 0x16f   : > { %v773_v33 = vmul.f32 0.5, %v771_v28  ;;  %v755_v35 = vadd.f32 %v751_v29, %v745_v20 }
 0x170   : > { %803 = vrot.lane.b32.xlu1 %v774_v30, %s1446_s14  ;;  %v764_v3 = vadd.f32 %v760_v37, %v756_v32 }
 0x171   : > { %801 = vrot.lane.b32.xlu0 %v773_v33, %s1446_s14  ;;  %v763_v13 = vadd.f32 %v759_v38, %v755_v35 }
 0x172   : > { %v766_v41 = vmul.f32 0.125, %v764_v3 }
 0x173   : > { %v765_v42 = vmul.f32 0.125, %v763_v13 }
 0x174   : > { %809 = vrot.lane.b32.xlu1 %v774_v30, %s1445_s26 }
 0x175   : > { %807 = vrot.lane.b32.xlu0 %v773_v33, %s1445_s26 }
 0x178   : > { %779 = vrot.lane.b32.xlu1 %v766_v41, %s1446_s14 }
 0x179   : > { %777 = vrot.lane.b32.xlu0 %v765_v42, %s1446_s14 }
 0x17c   : > { %785 = vrot.lane.b32.xlu1 %v766_v41, %s1445_s26 }
 0x17d   : > { %783 = vrot.lane.b32.xlu0 %v765_v42, %s1445_s26  ;;  %s1305_s26 = sshll.u32 %s1449_s29, 4  ;;  %s1306_s26 = int_to_ptr.vmem [resolvable:$false] %s1305_s26 }
 0x17e   : > { %p1308_p4 = scmp.lt.s32.totalorder %s1843_s30, %s1306_s26 }
 0x180   : > { %791 = vrot.lane.b32.xlu1 %v766_v41, %s1447_s23 }
 0x181   : > { %789 = vrot.lane.b32.xlu0 %v765_v42, %s1447_s23 }
 0x184   : > { %815 = vrot.lane.b32.xlu1 %v774_v30, %s1447_s23 }
 0x185   : > { %813 = vrot.lane.b32.xlu0 %v773_v33, %s1447_s23 }
 0x1e2   : > { %v804_v31 = vpop.permute.xlu1 %803 }
 0x1e3   : > { %v802_v44 = vpop.permute.xlu0 %801 }
 0x1e6   : > { %v810_v40 = vpop.permute.xlu1 %809 }
 0x1e7   : > { %v808_v45 = vpop.permute.xlu0 %807  ;;  %v820_v57 = vsel %vm484_vm2, %v804_v31, %v810_v40 }
 0x1e8   : > { %v819_v59 = vsel %vm484_vm2, %v802_v44, %v808_v45 }
 0x1ea   : > { %v780_v46 = vpop.permute.xlu1 %779 }
 0x1eb   : > { %v778_v47 = vpop.permute.xlu0 %777 }
 0x1ee   : > { %v786_v49 = vpop.permute.xlu1 %785 }
 0x1ef   : > { %v784_v50 = vpop.permute.xlu0 %783  ;;  %v796_v51 = vsel %vm484_vm2, %v780_v46, %v786_v49  ;;  %v892_v49 = vsub.f32 %v1610_v2, %v1624_v12  ;;  %v913_v2 = vsub.f32 %v1607_v1, %v1646_v34 }
 0x1f0   : > { %v795_v53 = vsel %vm484_vm2, %v778_v47, %v784_v50 }
 0x1f2   : > { %v792_v52 = vpop.permute.xlu1 %791 }
 0x1f3   : > { %v798_v54 = vsel %vm487_vm3, %v796_v51, %v792_v52  ;;  %v790_v55 = vpop.permute.xlu0 %789  ;;  %v891_v52 = vsub.f32 %v1604_v0, %v1640_v25 }
 0x1f4   : > { %v797_v56 = vsel %vm487_vm3, %v795_v53, %v790_v55  ;;  %849 = vrot.lane.b32.xlu1 %v798_v54, %s1446_s14  ;;  %v824_v5 = vmul.f32 6.0, %v798_v54 }
 0x1f5   : > { %847 = vrot.lane.b32.xlu0 %v797_v56, %s1446_s14  ;;  %v823_v6 = vmul.f32 6.0, %v797_v56 }
 0x1f6   : > { %v816_v58 = vpop.permute.xlu1 %815 }
 0x1f7   : > { %v822_v60 = vsel %vm487_vm3, %v820_v57, %v816_v58  ;;  %v814_v61 = vpop.permute.xlu0 %813  ;;  %v914_v58 = vsub.f32 %v1617_v7, %v1636_v21  ;;  %v927_v7 = vsub.f32 %v1685_v18, %v1712_v48 }
 0x1f8   : > { %v821_v62 = vsel %vm487_vm3, %v819_v59, %v814_v61  ;;  %883 = vrot.lane.b32.xlu1 %v822_v60, %s1446_s14  ;;  %v858_v63 = vmul.f32 6.0, %v822_v60 }
 0x1f9   : > { %881 = vrot.lane.b32.xlu0 %v821_v62, %s1446_s14  ;;  %v857_v4 = vmul.f32 6.0, %v821_v62 }
 0x1fc   : > { %863 = vrot.lane.b32.xlu1 %v858_v63, %s1446_s14 }
 0x1fd   : > { %861 = vrot.lane.b32.xlu0 %v857_v4, %s1446_s14 }
 0x200   : > { %839 = vrot.lane.b32.xlu1 %v798_v54, %s1448_s7 }
 0x201   : > { %837 = vrot.lane.b32.xlu0 %v797_v56, %s1448_s7 }
 0x204   : > { %829 = vrot.lane.b32.xlu1 %v824_v5, %s1446_s14 }
 0x205   : > { %827 = vrot.lane.b32.xlu0 %v823_v6, %s1446_s14 }
 0x208   : > { %873 = vrot.lane.b32.xlu1 %v822_v60, %s1448_s7 }
 0x209   : > { %871 = vrot.lane.b32.xlu0 %v821_v62, %s1448_s7 }
 0x266   : > { %v850_v9 = vpop.permute.xlu1 %849 }
 0x267   : > { %v854_v11 = vadd.f32 %v850_v9, %v798_v54  ;;  %v848_v14 = vpop.permute.xlu0 %847 }
 0x268   : > { %v853_v15 = vadd.f32 %v848_v14, %v797_v56 }
 0x269   : > { %v856_v16 = vmul.f32 0.5, %v854_v11 }
 0x26a   : > { %v855_v19 = vmul.f32 0.5, %v853_v15  ;;  %v884_v20 = vpop.permute.xlu1 %883 }
 0x26b   : > { %v888_v22 = vadd.f32 %v884_v20, %v822_v60  ;;  %v882_v23 = vpop.permute.xlu0 %881  ;;  %903 = vrot.lane.b32.xlu1 %v856_v16, %s1446_s14 }
 0x26c   : > { %v887_v24 = vadd.f32 %v882_v23, %v821_v62  ;;  %901 = vrot.lane.b32.xlu0 %v855_v19, %s1446_s14 }
 0x26d   : > { %v890_v26 = vmul.f32 0.5, %v888_v22 }
 0x26e   : > { %v889_v27 = vmul.f32 0.5, %v887_v24  ;;  %v864_v30 = vpop.permute.xlu1 %863 }
 0x26f   : > { %v932_v28 = vrot.slane %v890_v26, 1  ;;  %v862_v32 = vpop.permute.xlu0 %861  ;;  %v868_v42 = vadd.f32 %v864_v30, %v822_v60 }
 0x270   : > { %v931_v29 = vrot.slane %v889_v27, 1  ;;  %v867_v44 = vadd.f32 %v862_v32, %v821_v62 }
 0x271   : > { %935 = vrot.lane.b32.xlu1 %v932_v28, %s1446_s14 }
 0x272   : > { %933 = vrot.lane.b32.xlu0 %v931_v29, %s1446_s14  ;;  %v840_v33 = vpop.permute.xlu1 %839  ;;  %s1307_s14 = scalar_lea.vmem %s1306_s26, 256 }
 0x273   : > { %v838_v35 = vpop.permute.xlu0 %837  ;;  %p1309_p5 = scmp.lt.s32.totalorder %s1307_s14, %s1301_s25 }
 0x275   : > { %p1310_p6 = por %p1309_p5, %p1308_p4 }
 0x276   : > { %v830_v37 = vpop.permute.xlu1 %829 }
 0x277   : > { %v828_v38 = vpop.permute.xlu0 %827  ;;  %v834_v3 = vadd.f32 %v830_v37, %v798_v54  ;;  %v898_v54 = vsub.f32 %v1652_v39, %v1682_v17  ;;  %p1311_p7 = pnand %p1310_p6, %p1304_p3 }
 0x278   : > { %v833_v13 = vadd.f32 %v828_v38, %v797_v56  ;;  %v897_v56 = vsub.f32 %v1669_v8, %v1701_v36  ;;  %v928_v8 = vsub.f32 %v1672_v10, %v1707_v43 }
 0x279   : > { %v844_v40 = vadd.f32 %v840_v33, %v834_v3 }
 0x27a   : > { %v874_v41 = vpop.permute.xlu1 %873  ;;  %v843_v46 = vadd.f32 %v838_v35, %v833_v13 }
 0x27b   : > { %v872_v31 = vpop.permute.xlu0 %871  ;;  %v878_v45 = vadd.f32 %v874_v41, %v868_v42  ;;  %v846_v50 = vmul.f32 0.125, %v844_v40 }
 0x27c   : > { %v877_v47 = vadd.f32 %v872_v31, %v867_v44  ;;  %v845_v53 = vmul.f32 0.125, %v843_v46 }
 0x27d   : > { %v880_v51 = vmul.f32 0.125, %v878_v45  ;;  %v894_v57 = vsub.f32 %v892_v49, %v846_v50 }
 0x27e   : > { %v879_v55 = vmul.f32 0.125, %v877_v47  ;;  %v893_v60 = vsub.f32 %v891_v52, %v845_v53 }
 0x27f   : > { %v918_v59 = vrot.slane %v880_v51, 1  ;;  %v896_v4 = vand.u32 2147483647, %v894_v57 }
 0x280   : > { %v917_v12 = vrot.slane %v879_v55, 1  ;;  %v895_v36 = vand.u32 2147483647, %v893_v60 }
 0x281   : > { %v922_v63 = vsub.f32 %v914_v58, %v918_v59 }
 0x282   : > { %v921_v17 = vsub.f32 %v913_v2, %v917_v12 }
 0x283   : > { %v924_v34 = vand.u32 2147483647, %v922_v63 }
 0x284   : > { %v923_v14 = vand.u32 2147483647, %v921_v17 }
 0x2dd   : > { %v904_v61 = vpop.permute.xlu1 %903 }
 0x2de   : > { %v908_v0 = vsub.f32 %v898_v54, %v904_v61  ;;  %v902_v25 = vpop.permute.xlu0 %901 }
 0x2df   : > { %v907_v62 = vsub.f32 %v897_v56, %v902_v25 }
 0x2e0   : > { %v910_v39 = vand.u32 2147483647, %v908_v0 }
 0x2e1   : > { %v909_v5 = vand.u32 2147483647, %v907_v62 }
 0x2e2   : > { %v912_v21 = vadd.f32 %v910_v39, %v896_v4 }
 0x2e3   : > { %v911_v6 = vadd.f32 %v909_v5, %v895_v36  ;;  %v936_v1 = vpop.permute.xlu1 %935 }
 0x2e4   : > { %v940_v9 = vsub.f32 %v928_v8, %v936_v1  ;;  %v934_v11 = vpop.permute.xlu0 %933  ;;  %v926_v16 = vadd.f32 %v924_v34, %v912_v21 }
 0x2e5   : > { %v939_v15 = vsub.f32 %v927_v7, %v934_v11  ;;  %v925_v43 = vadd.f32 %v923_v14, %v911_v6 }
 0x2e6   : > { %v942_v10 = vand.u32 2147483647, %v940_v9 }
 0x2e7   : > { %v941_v19 = vand.u32 2147483647, %v939_v15 }
 0x2e8   : > { %v944_v20 = vadd.f32 %v942_v10, %v926_v16 }
 0x2e9   : > { %v943_v22 = vadd.f32 %v941_v19, %v925_v43 }
 0x2ea   : > { %v946_v18 = vsel %vm722_vm4, %v944_v20, 0.0 }
 0x2eb   : > { %v945_v48 = vsel %vm722_vm4, %v943_v22, 0.0 }
 0x2ec   : > { %v947_v23 = vadd.f32 %v946_v18, %v945_v48 }
 0x2ee   : > { %948 = vadd.xlane.f32.xlu0 %v947_v23 }
 0x2ef   : > { %1314 = shalt.err (!%p1311_p7)
}
 0x2f0   : > { %s1315_s19 = scalar_lea.hbm %s1854_s22, 128  ;;  %s1319_s0 = scalar_lea.hbm %s1969_s3, 512 }
 0x2f1   : > { %p1316_p8 = scmp.ne.s32.totalorder %s1854_s22, %s1315_s19  ;;  %p1320_p13 = scmp.lt.u32.totalorder %s1854_s22, %s1969_s3 }
 0x2f2   : > { %p1321_p0 = scmp.lt.u32.totalorder %s1319_s0, %s1315_s19  ;;  %p1323_p2 = scmp.lt.u32.totalorder %s1315_s19, %s1854_s22 }
 0x2f3   : > { %p1317_p11 = pnand %p1316_p8, %p1529_p9 }
 0x2f4   : > { %p1322_p1 = por %p1321_p0, %p1320_p13 }
 0x2f5   : > { %p1318_p12 = pneg %p1317_p11 }
 0x2f6   : > { %p1324_p3 = por %p1323_p2, %p1322_p1 }
 0x2f8   : > { %p1325_p4 = pnand %p1324_p3, %p1318_p12 }
 0x2fa   : > { %1328 = shalt.err (!%p1325_p4)
}
 0x2fb   : > { %s1450_s10 = smov 64   ;;  %s1451_s12 = smov 4  }
 0x2fc   : > { %1235 = dma.vmem_to_hbm [thread:$0]  (%p1529_p9), %s1843_s30, 128, %s1854_s22, %s1856_s6, %s1450_s10, %s1450_s10, %s1451_s12  }
 0x2fd   : > { %s1887_s26 = scalar_lea.hbm %s1968_s2, %s1848_s9  ;;  %s960_s14 = scalar_lea.sflag [#allocation4], %s1586_s13 }
 0x2fe   : > { %s1329_s19 = scalar_lea.vmem %s1845_s11, 128  ;;  %s1452_s23 = smov [#allocation7]  }
 0x2ff   : > { %p1330_p5 = scmp.ne.s32.totalorder %s1845_s11, %s1329_s19  ;;  %s1333_s7 = sshll.u32 %s1452_s23, 4  ;;  %s1334_s7 = int_to_ptr.vmem [resolvable:$false] %s1333_s7 }
 0x300   : > { %s1335_s0 = scalar_lea.vmem %s1334_s7, 256  ;;  %p1336_p8 = scmp.lt.s32.totalorder %s1845_s11, %s1334_s7 }
 0x301   : > { %p1331_p6 = pnand %p1330_p5, %p1529_p9  ;;  %p1337_p11 = scmp.lt.s32.totalorder %s1335_s0, %s1329_s19 }
 0x303   : > { %p1332_p7 = pneg %p1331_p6  ;;  %p1338_p12 = por %p1337_p11, %p1336_p8 }
 0x305   : > { %p1339_p13 = pnand %p1338_p12, %p1332_p7 }
 0x307   : > { %1342 = shalt.err (!%p1339_p13)
}
 0x308   : > { %s1343_s30 = scalar_lea.hbm %s1887_s26, 128  ;;  %s1347_s5 = scalar_lea.hbm %s1968_s2, 512 }
 0x309   : > { %p1344_p0 = scmp.ne.s32.totalorder %s1887_s26, %s1343_s30  ;;  %p1348_p3 = scmp.lt.u32.totalorder %s1887_s26, %s1968_s2 }
 0x30a   : > { %p1349_p4 = scmp.lt.u32.totalorder %s1347_s5, %s1343_s30  ;;  %p1351_p6 = scmp.lt.u32.totalorder %s1343_s30, %s1887_s26 }
 0x30b   : > { %p1345_p1 = pnand %p1344_p0, %p1529_p9 }
 0x30c   : > { %p1350_p5 = por %p1349_p4, %p1348_p3 }
 0x30d   : > { %p1346_p2 = pneg %p1345_p1 }
 0x30e   : > { %p1352_p7 = por %p1351_p6, %p1350_p5 }
 0x310   : > { %p1353_p8 = pnand %p1352_p7, %p1346_p2 }
 0x312   : > { %1356 = shalt.err (!%p1353_p8)
}
 0x313   : > { %1234 = dma.vmem_to_hbm [thread:$0]  (%p1529_p9), %s1845_s11, 128, %s1887_s26, %s960_s14, %s1450_s10, %s1450_s10, %s1451_s12  }
 0x314   : > { %s323_s19 = scalar_lea.vmem [#allocation10], %s1766_s20  ;;  %s1923_s11 = scalar_lea.hbm %s1970_s4, %s1848_s9 }
 0x315   : > { %s1015_s23 = sshll.u32 %s323_s19, 4  ;;  %s1453_s20 = smov [#allocation10]   ;;  %s1917_s23 = int_to_ptr.vmem [resolvable:$true] %s1015_s23 }
 0x316   : > { %s1357_s10 = scalar_lea.vmem %s1917_s23, 128  ;;  %s1361_s12 = sshll.u32 %s1453_s20, 4  ;;  %s1362_s12 = int_to_ptr.vmem [resolvable:$false] %s1361_s12 }
 0x317   : > { %p1358_p11 = scmp.ne.s32.totalorder %s1917_s23, %s1357_s10  ;;  %s1363_s26 = scalar_lea.vmem %s1362_s12, 256 }
 0x318   : > { %p1364_p0 = scmp.lt.s32.totalorder %s1917_s23, %s1362_s12  ;;  %p1365_p1 = scmp.lt.s32.totalorder %s1363_s26, %s1357_s10 }
 0x319   : > { %p1359_p12 = pnand %p1358_p11, %p1529_p9 }
 0x31a   : > { %p1366_p2 = por %p1365_p1, %p1364_p0 }
 0x31b   : > { %p1360_p13 = pneg %p1359_p12 }
 0x31d   : > { %p1367_p3 = pnand %p1366_p2, %p1360_p13 }
 0x37b   : > { %v949_v24 = vpop.xlane.xlu0 %948 }
 0x37c   : > { %v950_v26 = vrot.slane %v949_v24, 4 }
 0x37e   : > { %v951_v27 = vadd.f32 %v950_v26, %v949_v24 }
 0x380   : > { %v952_v28 = vrot.slane %v951_v27, 2 }
 0x382   : > { %v953_v29 = vadd.f32 %v952_v28, %v951_v27 }
 0x384   : > { %v954_v30 = vrot.slane %v953_v29, 1 }
 0x386   : > { %v955_v32 = vadd.f32 %v954_v30, %v953_v29 }
 0x388   : > { %1214 = vpush %v955_v32 }
 0x3b9   : > { %s1215_s13 = spop %1214 }
 0x3ba   : > { %v957_v33 = vstv %s1215_s13 }
 0x3bb   : > { %958 = vst [vmem:[%s323_s19] sm:$0xff] %v957_v33 }
 0x3bc   : > { %1370 = shalt.err (!%p1367_p3)
}
 0x3bd   : > { %s1371_s9 = scalar_lea.hbm %s1923_s11, 128  ;;  %s1375_s22 = scalar_lea.hbm %s1970_s4, 512 }
 0x3be   : > { %p1372_p4 = scmp.ne.s32.totalorder %s1923_s11, %s1371_s9  ;;  %p1376_p7 = scmp.lt.u32.totalorder %s1923_s11, %s1970_s4 }
 0x3bf   : > { %p1377_p8 = scmp.lt.u32.totalorder %s1375_s22, %s1371_s9  ;;  %p1379_p12 = scmp.lt.u32.totalorder %s1371_s9, %s1923_s11 }
 0x3c0   : > { %p1373_p5 = pnand %p1372_p4, %p1529_p9 }
 0x3c1   : > { %p1378_p11 = por %p1377_p8, %p1376_p7 }
 0x3c2   : > { %p1374_p6 = pneg %p1373_p5 }
 0x3c3   : > { %p1380_p13 = por %p1379_p12, %p1378_p11 }
 0x3c5   : > { %p1381_p0 = pnand %p1380_p13, %p1374_p6 }
 0x3c7   : > { %1384 = shalt.err (!%p1381_p0)
}
 0x3c8   : > { %1236 = dma.vmem_to_hbm [thread:$0]  (%p1529_p9), %s1917_s23, 128, %s1923_s11, %s1856_s6  }
 0x3c9 PF: > { %p1250_p1 = scmp.ge.s32.totalorder %s1431_s18, 2  ;;  %s1027_s25 = sand.u32 1, %s1419_s15  }
 0x3ca   : > { %s1028_s29 = scalar_lea.sflag [#allocation4], %s1027_s25 }
 0x3cb   : > { %p1241_p2 = pnand %p1250_p1, %p1533_p10 }
 0x3cd   : > { %1410 = dma.done.wait (!%p1241_p2), %s1028_s29, 128  }
 0x3ce   : > { %1412 = vsyncadd (!%p1241_p2), %s1028_s29, 4294967168  ;;  %s1978_s19 = sadd.s32 4294967294, %s1431_s18  }
 0x3cf   : > { %s1036_s13 = sand.u32 1, %s1978_s19  }
 0x3d0   : > { %s1037_s7 = scalar_lea.sflag [#allocation9], %s1036_s13 }
 0x3d1   : > { %1414 = dma.done.wait (!%p1241_p2), %s1037_s7, 256  }
 0x3d2   : > { %1416 = vsyncadd (!%p1241_p2), %s1037_s7, 4294967040  ;;  %p24_p9 = scmp.ge.s32.totalorder %s1504_s21, 6   ;;  %s1979_s15 = smov %s1423_s16 }
 0x3d3   : > { %s1980_s16 = smov %s1427_s17  ;;  %s1981_s17 = smov %s1516_s24 }
 0x3d4   : > { %s1982_s18 = smov %s1504_s21  ;;  %26 = sbr.rel (!%p24_p9) target bundleno = 11 (0xb), region = 134 }
 0x3db   :  { %1051 = vsyncpa [#allocation3], 1 }
 0x3dc   :  { %1053 = vsyncpa [#allocation3 + $0x1], 1 }
 0x3dd   :  { %1054 = vsyncpa [#allocation6], 1 }
 0x3de   :  { %1056 = vsyncpa [#allocation6 + $0x1], 1 }
 0x3df   :  { %1057 = vsyncpa [#allocation4], 1 }
 0x3e0   :  { %1059 = vsyncpa [#allocation4 + $0x1], 1 }
 0x3e1   :  { %1060 = vsyncpa [#allocation9], 1 }
 0x3e2   :  { %1062 = vsyncpa [#allocation9 + $0x1], 1 }

// kernel: lap_loss.5
= control target key start
LH: loop header
LB: loop body
LE: loop exit
PB: predicated region body
PF: predicated region fallthrough
CT: control target
= control target key end

     0   :  { %10 = vsyncpa [#allocation3], 0  ;;  %s1962_s0 = inlined_call_operand.hbm [shape: f32[4,8,2,2], index: 0, kind: input, shape index: {}]   ;;  %s1963_s1 = inlined_call_operand.hbm [shape: f32[4,8,2,2], index: 1, kind: input, shape index: {}]   ;;  %s1964_s2 = inlined_call_operand.hbm [shape: f32[8,2,2], index: 2, kind: output, shape index: {0}]   ;;  %s1965_s3 = inlined_call_operand.hbm [shape: f32[8,2,2], index: 3, kind: output, shape index: {1}]   ;;  %s1966_s4 = inlined_call_operand.hbm [shape: f32[4,8,128], index: 4, kind: output, shape index: {2}]  }
   0x1   :  { %12 = vsyncpa [#allocation3 + $0x1], 0 }
   0x2   :  { %13 = vsyncpa [#allocation6], 0 }
   0x3   :  { %15 = vsyncpa [#allocation6 + $0x1], 0 }
   0x4   :  { %16 = vsyncpa [#allocation4], 0 }
   0x5   :  { %18 = vsyncpa [#allocation4 + $0x1], 0 }
   0x6   :  { %19 = vsyncpa [#allocation9], 0 }
   0x7   :  { %21 = vsyncpa [#allocation9 + $0x1], 0  ;;  %s1473_s15 = smov 0   ;;  %s1475_s16 = smov 0  }
   0x8   :  { %s1477_s17 = smov 0   ;;  %s1479_s18 = smov 0  }
   0x9 LB: > { %s1494_s19 = sadd.s32 4294967295, %s1428_s18   ;;  %s1169_s20 = sadd.s32 4294967294, %s1428_s18   ;;  %s1428_s18 = sphi %s1479_s18, %s1974_s18   ;;  %s1424_s17 = sphi %s1477_s17, %s1973_s17   ;;  %s1420_s16 = sphi %s1475_s16, %s1972_s16   ;;  %s1416_s15 = sphi %s1473_s15, %s1971_s15  }
   0xa   : > { %s1498_s21 = sadd.s32 1, %s1428_s18   ;;  %s34_s22 = sadd.s32 1, %s1424_s17 }
   0xb   : > { %s31_s23 = ssub.s32 %s1428_s18, %s1498_s21  ;;  %p41_p0 = scmp.ne.s32.totalorder %s1424_s17, %s1420_s16 }
   0xc   : > { %p32_p1 = scmp.eq.s32.totalorder %s31_s23, 0  ;;  %p42_p2 = scmp.eq.s32.totalorder %s1428_s18, 0 }
   0xd   : > { %p47_p3 = scmp.ne.s32.totalorder %s1420_s16, %s1416_s15  ;;  %p48_p4 = scmp.eq.s32.totalorder %s1494_s19, 0 }
   0xe   : > { %s1510_s24 = scalar_select %p32_p1, %s1424_s17, %s34_s22  }
   0xf   : > { %p1512_p5 = por %p42_p2, %p41_p0  ;;  %p1516_p6 = por %p48_p4, %p47_p3 }
  0x10   : > { %p97_p7 = scmp.eq.s32.totalorder %s1494_s19, 3  ;;  %p103_p8 = scmp.eq.s32.totalorder %s1169_s20, 3 }
  0x11   : > { %p1171_p11 = scmp.ge.s32.totalorder %s1428_s18, 4 }
  0x12   : > { %p1523_p9 = por %p97_p7, %p41_p0  ;;  %p1527_p10 = por %p103_p8, %p47_p3 }
  0x13   : > { %171 = sbr.rel (%p1171_p11) target bundleno = 50 (0x32), region = 16 }
  0x1a   : > { %s1533_s29 = sand.u32 1, %s1424_s17   ;;  %s1210_s5 = sshll.u32 %s1428_s18, 6 }
  0x1b   : > { %s1172_s30 = sshll.u32 %s1533_s29, 4  ;;  %s185_s9 = scalar_lea.hbm %s1962_s0, %s1210_s5 }
  0x1c   : > { %s1216_s6 = scalar_select %p1512_p5, [#allocation0], [#allocation15] }
  0x1d   : > { %s179_s11 = scalar_lea.vmem [#allocation2], %s1172_s30  ;;  %s1430_s13 = smov 256  }
  0x1e   : > { %s190_s10 = sld [smem:[%s1216_s6]]   ;;  %s198_s12 = sshll.u32 %s179_s11, 4  ;;  %s199_s12 = int_to_ptr.vmem [resolvable:$true] %s198_s12 }
  0x1f   : > { %1217 = sst [smem:[#allocation12]] (%p1512_p5), %s1430_s13  ;;  %s1431_s14 = smov 64  }
  0x20   : > { %1218 = sst [smem:[#allocation12 + $0x1]] (%p1512_p5), %s1431_s14  ;;  %s1432_s22 = smov 2  }
  0x21   : > { %1219 = sst [smem:[#allocation12 + $0x2]] (%p1512_p5), %s1432_s22  ;;  %s1433_s23 = smov 32  }
  0x22   : > { %1220 = sst [smem:[#allocation12 + $0x3]] (%p1512_p5), %s1433_s23  ;;  %s176_s8 = scalar_lea.sflag [#allocation3], %s1533_s29 }
  0x23   : > { %1221 = sst [smem:[#allocation12 + $0x4]] (%p1512_p5), %s1433_s23  ;;  %s1434_s11 = smov [#allocation11]  }
  0x24   : > { %s1175_s6 = sshll.u32 %s190_s10, 26  ;;  %1222 = sst [smem:[#allocation12 + $0x5]] (%p1512_p5), %s1432_s22 }
  0x25   : > { %s1176_s7 = sadd.s32 134217728, %s1175_s6 }
  0x26   : > { %1223 = dma.general (%p1512_p5), %s185_s9, 256, %s199_s12, %s176_s8, %s1434_s11, [#allocation12], %s1176_s7, 0  }
  0x27   : > { %s1224_s13 = scalar_select %p1512_p5, [#allocation0], [#allocation16] }
  0x28   : > { %s225_s14 = scalar_lea.vmem [#allocation5], %s1172_s30  ;;  %s1435_s22 = smov 256  }
  0x29   : > { %s244_s23 = sshll.u32 %s225_s14, 4  ;;  %s236_s10 = sld [smem:[%s1224_s13]]   ;;  %s245_s23 = int_to_ptr.vmem [resolvable:$true] %s244_s23 }
  0x2a   : > { %1225 = sst [smem:[#allocation14]] (%p1512_p5), %s1435_s22  ;;  %s1436_s6 = smov 64  }
  0x2b   : > { %1226 = sst [smem:[#allocation14 + $0x1]] (%p1512_p5), %s1436_s6  ;;  %s231_s7 = scalar_lea.hbm %s1963_s1, %s1210_s5 }
  0x2c   : > { %s1437_s8 = smov 2   ;;  %s1438_s30 = smov 32  }
  0x2d   : > { %1227 = sst [smem:[#allocation14 + $0x2]] (%p1512_p5), %s1437_s8  ;;  %s222_s14 = scalar_lea.sflag [#allocation6], %s1533_s29 }
  0x2e   : > { %1228 = sst [smem:[#allocation14 + $0x3]] (%p1512_p5), %s1438_s30  ;;  %s1439_s22 = smov [#allocation13]  }
  0x2f   : > { %1229 = sst [smem:[#allocation14 + $0x4]] (%p1512_p5), %s1438_s30  ;;  %s1180_s11 = sshll.u32 %s236_s10, 26 }
  0x30   : > { %1230 = sst [smem:[#allocation14 + $0x5]] (%p1512_p5), %s1437_s8  ;;  %s1181_s13 = sadd.s32 134217728, %s1180_s11 }
  0x31   : > { %1231 = dma.general (%p1512_p5), %s231_s7, 256, %s245_s23, %s222_s14, %s1439_s22, [#allocation14], %s1181_s13, 0  }
  0x32 PF: > { %p1182_p12 = scmp.ge.s32.totalorder %s1428_s18, 1  ;;  %p265_p13 = scmp.lt.s32.totalorder %s1428_s18, 5 }
  0x34   : > { %p266_p0 = pnand %p1182_p12, %p265_p13 }
  0x35   : > { %s1584_s5 = sand.u32 (!%p266_p0), 1, %s1420_s16  }
  0x36   : > { %269 = sbr.rel (%p266_p0) target bundleno = 965 (0x3c5), region = 28  ;;  %s1183_s10 = sshll.u32 (!%p266_p0), %s1584_s5, 4 }
  0x37   : > { %s272_s6 = scalar_lea.sflag (!%p266_p0), [#allocation3], %s1584_s5  ;;  %s1588_s9 = scalar_lea.vmem (!%p266_p0), [#allocation2], %s1183_s10 }
  0x3d   : > { %1399 = dma.done.wait (%p1516_p6), %s272_s6, 256  }
  0x3e   : > { %1401 = vsyncadd (%p1516_p6), %s272_s6, 4294967040  ;;  %s281_s25 = scalar_lea.sflag [#allocation6], %s1584_s5  ;;  %s1595_s29 = scalar_lea.vmem [#allocation5], %s1183_s10 }
  0x3f   : > { %1403 = dma.done.wait (%p1516_p6), %s281_s25, 256  }
  0x40   : > { %1405 = vsyncadd (%p1516_p6), %s281_s25, 4294967040  ;;  %vm364_vm0 = vcmask 1040384   ;;  %vm367_vm1 = vcmask 1042432   ;;  %v1602_v0 = vld [vmem:[%s1588_s9] sm:$0x3]  ;;  %s1440_s26 = smov 1  }
  0x41   : > { %v1605_v1 = vld [vmem:[%s1588_s9 + $0x8] sm:$0x3]  ;;  %v1608_v2 = vld [vmem:[%s1588_s9 + $0x2] sm:$0x3]  ;;  %v352_v3 = vrot.slane %v1602_v0, 1  ;;  %v356_v4 = vrot.slane %v1602_v0, 7 }
  0x42   : > { %v360_v5 = vrot.slane %v1602_v0, 6  ;;  %v372_v6 = vrot.slane %v1605_v1, 7  ;;  %v1615_v7 = vld [vmem:[%s1588_s9 + $0xa] sm:$0x3]  ;;  %v353_v8 = vrot.slane %v1608_v2, 1  ;;  %v357_v9 = vrot.slane %v1608_v2, 7 }
  0x43   : > { %v361_v10 = vrot.slane %v1608_v2, 6  ;;  %v373_v11 = vrot.slane %v1615_v7, 7  ;;  %v1622_v12 = vld [vmem:[%s1595_s29 + $0x2] sm:$0x3]  ;;  %v365_v13 = vsel %vm364_vm0, %v352_v3, %v356_v4  ;;  %v1634_v21 = vld [vmem:[%s1595_s29 + $0xa] sm:$0x3] }
  0x44   : > { %v376_v14 = vsel %vm364_vm0, %v1605_v1, %v372_v6  ;;  %v541_v15 = vrot.slane %v1622_v12, 1  ;;  %v545_v16 = vrot.slane %v1622_v12, 7  ;;  %v368_v17 = vsel %vm367_vm1, %v365_v13, %v360_v5  ;;  %v1638_v25 = vld [vmem:[%s1595_s29] sm:$0x3]  ;;  %v1644_v34 = vld [vmem:[%s1595_s29 + $0x8] sm:$0x3] }
  0x45   : > { %v396_v18 = vmul.f32 4.0, %v376_v14  ;;  %v366_v19 = vsel %vm364_vm0, %v353_v8, %v357_v9  ;;  %v377_v20 = vsel %vm364_vm0, %v1615_v7, %v373_v11  ;;  %v378_v22 = vmul.f32 6.0, %v368_v17  ;;  %v1650_v39 = vld [vmem:[%s1588_s9 + $0x6] sm:$0x3]  ;;  %v1667_v8 = vld [vmem:[%s1588_s9 + $0x4] sm:$0x3] }
  0x46   : > { %v369_v23 = vsel %vm367_vm1, %v366_v19, %v361_v10  ;;  %v397_v24 = vmul.f32 4.0, %v377_v20  ;;  %v390_v26 = vrot.slane %v368_v17, 2  ;;  %v549_v29 = vrot.slane %v1622_v12, 6  ;;  %v1670_v10 = vld [vmem:[%s1588_s9 + $0xe] sm:$0x3]  ;;  %s1441_s23 = smov 127  }
  0x47   : > { %v402_v27 = vrot.slane %v396_v18, 1  ;;  %v379_v28 = vmul.f32 6.0, %v369_v23  ;;  %v382_v30 = vrot.slane %v378_v22, 1  ;;  %v391_v31 = vrot.slane %v369_v23, 2  ;;  %s1442_s12 = smov 2   ;;  %s1443_s7 = smov 126  }
  0x48   : > { %v553_v32 = vsel %vm364_vm0, %v541_v15, %v545_v16  ;;  %v559_v33 = vrot.slane %v1634_v21, 7  ;;  %v540_v37 = vrot.slane %v1638_v25, 1  ;;  %v544_v38 = vrot.slane %v1638_v25, 7  ;;  %s1185_s8 = sshll.u32 %s1584_s5, 2  ;;  %s964_s14 = sand.u32 1, %s1494_s19  }
  0x49   : > { %v383_v35 = vrot.slane %v379_v28, 1  ;;  %v555_v36 = vsel %vm367_vm1, %v553_v32, %v549_v29  ;;  %v386_v40 = vadd.f32 %v382_v30, %v368_v17  ;;  %v403_v41 = vrot.slane %v397_v24, 1  ;;  %v1680_v17 = vld [vmem:[%s1595_s29 + $0x6] sm:$0x3]  ;;  %s1764_s30 = scalar_lea.vmem [#allocation7], %s1185_s8  ;;  %s1770_s11 = scalar_lea.vmem [#allocation8], %s1185_s8 }
  0x4a   : > { %v563_v42 = vsel %vm364_vm0, %v1634_v21, %v559_v33  ;;  %v565_v43 = vmul.f32 6.0, %v555_v36  ;;  %v577_v45 = vrot.slane %v555_v36, 2  ;;  %v548_v46 = vrot.slane %v1638_v25, 6  ;;  %s999_s13 = sshll.u32 %s1770_s11, 4  ;;  %s1212_s22 = sshll.u32 %s1494_s19, 6  ;;  %s1845_s13 = int_to_ptr.vmem [resolvable:$true] %s999_s13 }
  0x4b   : > { %v387_v44 = vadd.f32 %v383_v35, %v369_v23  ;;  %v552_v47 = vsel %vm364_vm0, %v540_v37, %v544_v38  ;;  %v394_v48 = vadd.f32 %v390_v26, %v386_v40  ;;  %v558_v50 = vrot.slane %v1644_v34, 7  ;;  %s983_s10 = sshll.u32 %s1764_s30, 4  ;;  %s1843_s25 = scalar_lea.hbm %s1965_s3, %s1212_s22  ;;  %s1883_s10 = int_to_ptr.vmem [resolvable:$true] %s983_s10 }
  0x4c   : > { %v569_v49 = vrot.slane %v565_v43, 1  ;;  %v411_v51 = vrot.slane %v1650_v39, 1  ;;  %v583_v53 = vmul.f32 4.0, %v563_v42  ;;  %v554_v54 = vsel %vm367_vm1, %v552_v47, %v548_v46  ;;  %v1705_v43 = vld [vmem:[%s1595_s29 + $0xe] sm:$0x3] }
  0x4d   : > { %v395_v52 = vadd.f32 %v391_v31, %v387_v44  ;;  %v415_v55 = vrot.slane %v1650_v39, 7  ;;  %v398_v56 = vadd.f32 %v396_v18, %v394_v48  ;;  %v562_v58 = vsel %vm364_vm0, %v1644_v34, %v558_v50  ;;  %v1683_v18 = vld [vmem:[%s1588_s9 + $0xc] sm:$0x3] }
  0x4e   : > { %v573_v57 = vadd.f32 %v569_v49, %v555_v36  ;;  %v564_v59 = vmul.f32 6.0, %v554_v54  ;;  %v576_v61 = vrot.slane %v554_v54, 2  ;;  %v582_v62 = vmul.f32 4.0, %v562_v58  ;;  %v1699_v36 = vld [vmem:[%s1595_s29 + $0x4] sm:$0x3] }
  0x4f   : > { %v399_v60 = vadd.f32 %v397_v24, %v395_v52  ;;  %v419_v63 = vrot.slane %v1650_v39, 6  ;;  %v1663_v3 = vadd.f32 %v402_v27, %v398_v56  ;;  %v423_v6 = vsel %vm364_vm0, %v411_v51, %v415_v55  ;;  %v1710_v48 = vld [vmem:[%s1595_s29 + $0xc] sm:$0x3]  ;;  %s1847_s29 = scalar_lea.sflag [#allocation9], %s964_s14 }
  0x50   : > { %v581_v4 = vadd.f32 %v577_v45, %v573_v57  ;;  %v568_v5 = vrot.slane %v564_v59, 1  ;;  %v589_v9 = vrot.slane %v583_v53, 1  ;;  %v410_v19 = vrot.slane %v1667_v8, 1 }
  0x51   : > { %v425_v11 = vsel %vm367_vm1, %v423_v6, %v419_v63  ;;  %472 = vrot.lane.b32.xlu1 %v1663_v3, %s1440_s26  ;;  %466 = vrot.lane.b32.xlu0 %v1663_v3, %s1441_s23  ;;  %v1677_v13 = vadd.f32 %v403_v41, %v399_v60  ;;  %v414_v20 = vrot.slane %v1667_v8, 7  ;;  %v418_v22 = vrot.slane %v1667_v8, 6 }
  0x52   : > { %v585_v14 = vadd.f32 %v583_v53, %v581_v4  ;;  %v572_v15 = vadd.f32 %v568_v5, %v554_v54  ;;  %v435_v16 = vmul.f32 6.0, %v425_v11  ;;  %v588_v24 = vrot.slane %v582_v62, 1 }
  0x53   : > { %v429_v26 = vrot.slane %v1670_v10, 7  ;;  %v422_v28 = vsel %vm364_vm0, %v410_v19, %v414_v20  ;;  %v597_v29 = vrot.slane %v1680_v17, 1  ;;  %v601_v30 = vrot.slane %v1680_v17, 7 }
  0x54   : > { %v580_v23 = vadd.f32 %v576_v61, %v572_v15  ;;  %v439_v27 = vrot.slane %v435_v16, 1  ;;  %v593_v31 = vadd.f32 %v589_v9, %v585_v14  ;;  %v424_v33 = vsel %vm367_vm1, %v422_v28, %v418_v22 }
  0x55   : > { %474 = vrot.lane.b32.xlu1 %v1677_v13, %s1440_s26  ;;  %468 = vrot.lane.b32.xlu0 %v1677_v13, %s1441_s23  ;;  %v428_v35 = vrot.slane %v1683_v18, 7  ;;  %v434_v37 = vmul.f32 6.0, %v424_v33  ;;  %v605_v38 = vrot.slane %v1680_v17, 6  ;;  %v433_v41 = vsel %vm364_vm0, %v1670_v10, %v429_v26 }
  0x56   : > { %v584_v32 = vadd.f32 %v582_v62, %v580_v23  ;;  %v447_v42 = vrot.slane %v425_v11, 2  ;;  %v609_v44 = vsel %vm364_vm0, %v597_v29, %v601_v30  ;;  %v443_v45 = vadd.f32 %v439_v27, %v425_v11 }
  0x57   : > { %v438_v46 = vrot.slane %v434_v37, 1  ;;  %v611_v47 = vsel %vm367_vm1, %v609_v44, %v605_v38  ;;  %v596_v49 = vrot.slane %v1699_v36, 1  ;;  %v432_v50 = vsel %vm364_vm0, %v1683_v18, %v428_v35 }
  0x58   : > { %v592_v40 = vadd.f32 %v588_v24, %v584_v32  ;;  %v446_v51 = vrot.slane %v424_v33, 2  ;;  %v621_v52 = vmul.f32 6.0, %v611_v47  ;;  %v615_v54 = vrot.slane %v1705_v43, 7 }
  0x59   : > { %654 = vrot.lane.b32.xlu1 %v593_v31, %s1441_s23  ;;  %v442_v53 = vadd.f32 %v438_v46, %v424_v33  ;;  %v600_v55 = vrot.slane %v1699_v36, 7  ;;  %v604_v56 = vrot.slane %v1699_v36, 6  ;;  %v453_v57 = vmul.f32 4.0, %v433_v41 }
  0x5a   : > { %652 = vrot.lane.b32.xlu0 %v592_v40, %s1441_s23  ;;  %v625_v58 = vrot.slane %v621_v52, 1  ;;  %v614_v59 = vrot.slane %v1710_v48, 7  ;;  %v451_v60 = vadd.f32 %v447_v42, %v443_v45  ;;  %v452_v61 = vmul.f32 4.0, %v432_v50 }
  0x5b   : > { %v608_v62 = vsel %vm364_vm0, %v596_v49, %v600_v55  ;;  %v450_v63 = vadd.f32 %v446_v51, %v442_v53  ;;  %v633_v5 = vrot.slane %v611_v47, 2  ;;  %v619_v9 = vsel %vm364_vm0, %v1705_v43, %v615_v54 }
  0x5c   : > { %v629_v4 = vadd.f32 %v625_v58, %v611_v47  ;;  %v610_v6 = vsel %vm367_vm1, %v608_v62, %v604_v56  ;;  %v618_v11 = vsel %vm364_vm0, %v1710_v48, %v614_v59  ;;  %v459_v15 = vrot.slane %v453_v57, 1 }
  0x5d   : > { %660 = vrot.lane.b32.xlu1 %v593_v31, %s1440_s26  ;;  %v620_v14 = vmul.f32 6.0, %v610_v6  ;;  %v455_v16 = vadd.f32 %v453_v57, %v451_v60  ;;  %v458_v19 = vrot.slane %v452_v61, 1  ;;  %v632_v22 = vrot.slane %v610_v6, 2 }
  0x5e   : > { %658 = vrot.lane.b32.xlu0 %v592_v40, %s1440_s26  ;;  %v454_v23 = vadd.f32 %v452_v61, %v450_v63  ;;  %v637_v24 = vadd.f32 %v633_v5, %v629_v4  ;;  %v639_v26 = vmul.f32 4.0, %v619_v9  ;;  %v638_v27 = vmul.f32 4.0, %v618_v11 }
  0x5f   : > { %v624_v20 = vrot.slane %v620_v14, 1  ;;  %v463_v29 = vadd.f32 %v459_v15, %v455_v16  ;;  %vm484_vm2 = vcmask 7168   ;;  %vm487_vm3 = vcmask 23552  }
  0x60   : > { %v462_v32 = vadd.f32 %v458_v19, %v454_v23  ;;  %v641_v33 = vadd.f32 %v639_v26, %v637_v24  ;;  %v645_v35 = vrot.slane %v639_v26, 1  ;;  %v644_v37 = vrot.slane %v638_v27, 1 }
  0x61   : > { %480 = vrot.lane.b32.xlu1 %v1677_v13, %s1442_s12  ;;  %v628_v28 = vadd.f32 %v624_v20, %v610_v6  ;;  %vm722_vm4 = vcmask 9216  }
  0x62   : > { %478 = vrot.lane.b32.xlu0 %v1663_v3, %s1442_s12  ;;  %v649_v3 = vadd.f32 %v645_v35, %v641_v33 }
  0x63   : > { %v636_v30 = vadd.f32 %v632_v22, %v628_v28 }
  0x65   : > { %666 = vrot.lane.b32.xlu1 %v593_v31, %s1442_s12  ;;  %v640_v38 = vadd.f32 %v638_v27, %v636_v30 }
  0x66   : > { %664 = vrot.lane.b32.xlu0 %v592_v40, %s1442_s12 }
  0x67   : > { %v648_v13 = vadd.f32 %v644_v37, %v640_v38 }
  0x69   : > { %494 = vrot.lane.b32.xlu1 %v463_v29, %s1440_s26 }
  0x6a   : > { %492 = vrot.lane.b32.xlu0 %v462_v32, %s1440_s26 }
  0x6d   : > { %678 = vrot.lane.b32.xlu1 %v649_v3, %s1440_s26 }
  0x6e   : > { %676 = vrot.lane.b32.xlu0 %v648_v13, %s1440_s26 }
  0xc3   : > { %v473_v41 = vpop.permute.xlu1 %472  ;;  %v467_v42 = vpop.permute.xlu0 %466 }
  0xc4   : > { %v485_v49 = vsel %vm484_vm2, %v467_v42, %v473_v41 }
  0xc7   : > { %v475_v31 = vpop.permute.xlu1 %474  ;;  %v469_v44 = vpop.permute.xlu0 %468 }
  0xc8   : > { %v486_v50 = vsel %vm484_vm2, %v469_v44, %v475_v31 }
  0xcb   : > { %v655_v40 = vpop.permute.xlu1 %654 }
  0xcc   : > { %v653_v45 = vpop.permute.xlu0 %652 }
  0xcf   : > { %v661_v46 = vpop.permute.xlu1 %660 }
  0xd0   : > { %v659_v47 = vpop.permute.xlu0 %658  ;;  %v671_v55 = vsel %vm484_vm2, %v655_v40, %v661_v46 }
  0xd1   : > { %v670_v56 = vsel %vm484_vm2, %v653_v45, %v659_v47 }
  0xd3   : > { %v481_v51 = vpop.permute.xlu1 %480 }
  0xd4   : > { %v479_v52 = vpop.permute.xlu0 %478  ;;  %v489_v53 = vsel %vm487_vm3, %v486_v50, %v481_v51 }
  0xd5   : > { %v488_v54 = vsel %vm487_vm3, %v485_v49, %v479_v52  ;;  %516 = vrot.lane.b32.xlu1 %v489_v53, %s1443_s7  ;;  %v501_v61 = vmul.f32 6.0, %v489_v53 }
  0xd6   : > { %514 = vrot.lane.b32.xlu0 %v488_v54, %s1443_s7  ;;  %v500_v62 = vmul.f32 6.0, %v488_v54 }
  0xd7   : > { %v667_v57 = vpop.permute.xlu1 %666 }
  0xd8   : > { %v665_v58 = vpop.permute.xlu0 %664  ;;  %v673_v59 = vsel %vm487_vm3, %v671_v55, %v667_v57 }
  0xd9   : > { %v672_v60 = vsel %vm487_vm3, %v670_v56, %v665_v58  ;;  %700 = vrot.lane.b32.xlu1 %v673_v59, %s1443_s7  ;;  %v685_v9 = vmul.f32 6.0, %v673_v59 }
  0xda   : > { %698 = vrot.lane.b32.xlu0 %v672_v60, %s1443_s7  ;;  %v684_v11 = vmul.f32 6.0, %v672_v60 }
  0xdb   : > { %v495_v63 = vpop.permute.xlu1 %494 }
  0xdc   : > { %v493_v4 = vpop.permute.xlu0 %492  ;;  %v499_v5 = vsel %vm484_vm2, %v463_v29, %v495_v63 }
  0xdd   : > { %506 = vrot.lane.b32.xlu1 %v501_v61, %s1441_s23  ;;  %v498_v6 = vsel %vm484_vm2, %v462_v32, %v493_v4  ;;  %v523_v16 = vmul.f32 4.0, %v499_v5 }
  0xde   : > { %504 = vrot.lane.b32.xlu0 %v500_v62, %s1441_s23  ;;  %v522_v19 = vmul.f32 4.0, %v498_v6 }
  0xdf   : > { %v679_v14 = vpop.permute.xlu1 %678 }
  0xe0   : > { %v677_v15 = vpop.permute.xlu0 %676  ;;  %v683_v20 = vsel %vm484_vm2, %v649_v3, %v679_v14 }
  0xe1   : > { %690 = vrot.lane.b32.xlu1 %v685_v9, %s1441_s23  ;;  %v682_v22 = vsel %vm484_vm2, %v648_v13, %v677_v15  ;;  %v707_v23 = vmul.f32 4.0, %v683_v20 }
  0xe2   : > { %688 = vrot.lane.b32.xlu0 %v684_v11, %s1441_s23  ;;  %v706_v24 = vmul.f32 4.0, %v682_v22 }
  0xe5   : > { %530 = vrot.lane.b32.xlu1 %v523_v16, %s1441_s23 }
  0xe6   : > { %528 = vrot.lane.b32.xlu0 %v522_v19, %s1441_s23 }
  0xe9   : > { %714 = vrot.lane.b32.xlu1 %v707_v23, %s1441_s23 }
  0xea   : > { %712 = vrot.lane.b32.xlu0 %v706_v24, %s1441_s23 }
 0x147   : > { %v517_v26 = vpop.permute.xlu1 %516 }
 0x148   : > { %v515_v27 = vpop.permute.xlu0 %514 }
 0x14b   : > { %v701_v28 = vpop.permute.xlu1 %700 }
 0x14c   : > { %v699_v29 = vpop.permute.xlu0 %698 }
 0x14f   : > { %v507_v30 = vpop.permute.xlu1 %506 }
 0x150   : > { %v505_v32 = vpop.permute.xlu0 %504  ;;  %v511_v33 = vadd.f32 %v507_v30, %v489_v53 }
 0x151   : > { %v510_v35 = vadd.f32 %v505_v32, %v488_v54 }
 0x152   : > { %v521_v37 = vadd.f32 %v517_v26, %v511_v33 }
 0x153   : > { %v520_v38 = vadd.f32 %v515_v27, %v510_v35  ;;  %v691_v3 = vpop.permute.xlu1 %690 }
 0x154   : > { %v689_v13 = vpop.permute.xlu0 %688  ;;  %v695_v41 = vadd.f32 %v691_v3, %v673_v59  ;;  %v525_v40 = vadd.f32 %v523_v16, %v521_v37 }
 0x155   : > { %v694_v42 = vadd.f32 %v689_v13, %v672_v60  ;;  %v524_v45 = vadd.f32 %v522_v19, %v520_v38 }
 0x156   : > { %v705_v31 = vadd.f32 %v701_v28, %v695_v41 }
 0x157   : > { %v704_v44 = vadd.f32 %v699_v29, %v694_v42  ;;  %v531_v46 = vpop.permute.xlu1 %530 }
 0x158   : > { %v529_v47 = vpop.permute.xlu0 %528  ;;  %v535_v49 = vadd.f32 %v531_v46, %v525_v40  ;;  %v709_v53 = vadd.f32 %v707_v23, %v705_v31 }
 0x159   : > { %v534_v50 = vadd.f32 %v529_v47, %v524_v45  ;;  %v708_v54 = vadd.f32 %v706_v24, %v704_v44 }
 0x15a   : > { %v537_v51 = vmul.f32 0.00390625, %v535_v49 }
 0x15b   : > { %v536_v52 = vmul.f32 0.00390625, %v534_v50  ;;  %v715_v55 = vpop.permute.xlu1 %714 }
 0x15c   : > { %v713_v56 = vpop.permute.xlu0 %712  ;;  %724 = vst.msk [vmem:[%s1764_s30 + $0x2] sm:$0x3] %vm722_vm4, %v537_v51  ;;  %v719_v57 = vadd.f32 %v715_v55, %v709_v53 }
 0x15d   : > { %723 = vst.msk [vmem:[%s1764_s30] sm:$0x3] %vm722_vm4, %v536_v52  ;;  %v718_v58 = vadd.f32 %v713_v56, %v708_v54 }
 0x15e   : > { %v721_v59 = vmul.f32 0.00390625, %v719_v57 }
 0x15f   : > { %v720_v60 = vmul.f32 0.00390625, %v718_v58 }
 0x160   : > { %726 = vst.msk [vmem:[%s1770_s11 + $0x2] sm:$0x3] %vm722_vm4, %v721_v59  ;;  %v728_v61 = vsub.f32 %v537_v51, %v721_v59 }
 0x161   : > { %725 = vst.msk [vmem:[%s1770_s11] sm:$0x3] %vm722_vm4, %v720_v60  ;;  %v727_v62 = vsub.f32 %v536_v52, %v720_v60 }
 0x162   : > { %v732_v63 = vrot.slane %v728_v61, 1  ;;  %v736_v4 = vrot.slane %v728_v61, 7  ;;  %v740_v5 = vrot.slane %v728_v61, 6 }
 0x163   : > { %v731_v6 = vrot.slane %v727_v62, 1  ;;  %v735_v9 = vrot.slane %v727_v62, 7  ;;  %v739_v11 = vrot.slane %v727_v62, 6 }
 0x164   : > { %v744_v14 = vsel %vm364_vm0, %v732_v63, %v736_v4 }
 0x165   : > { %v743_v15 = vsel %vm364_vm0, %v731_v6, %v735_v9  ;;  %v746_v16 = vsel %vm367_vm1, %v744_v14, %v740_v5 }
 0x166   : > { %v768_v19 = vrot.slane %v746_v16, 1  ;;  %v745_v20 = vsel %vm367_vm1, %v743_v15, %v739_v11  ;;  %v748_v22 = vmul.f32 6.0, %v746_v16  ;;  %v760_v37 = vrot.slane %v746_v16, 2 }
 0x167   : > { %v767_v23 = vrot.slane %v745_v20, 1  ;;  %v747_v24 = vmul.f32 6.0, %v745_v20  ;;  %v759_v38 = vrot.slane %v745_v20, 2 }
 0x168   : > { %v772_v26 = vadd.f32 %v768_v19, %v746_v16  ;;  %v752_v27 = vrot.slane %v748_v22, 1 }
 0x169   : > { %v771_v28 = vadd.f32 %v767_v23, %v745_v20  ;;  %v751_v29 = vrot.slane %v747_v24, 1 }
 0x16a   : > { %v774_v30 = vmul.f32 0.5, %v772_v26  ;;  %v756_v32 = vadd.f32 %v752_v27, %v746_v16 }
 0x16b   : > { %v773_v33 = vmul.f32 0.5, %v771_v28  ;;  %v755_v35 = vadd.f32 %v751_v29, %v745_v20 }
 0x16c   : > { %803 = vrot.lane.b32.xlu1 %v774_v30, %s1441_s23  ;;  %v764_v3 = vadd.f32 %v760_v37, %v756_v32 }
 0x16d   : > { %801 = vrot.lane.b32.xlu0 %v773_v33, %s1441_s23  ;;  %v763_v13 = vadd.f32 %v759_v38, %v755_v35 }
 0x16e   : > { %v766_v41 = vmul.f32 0.125, %v764_v3 }
 0x16f   : > { %v765_v42 = vmul.f32 0.125, %v763_v13 }
 0x170   : > { %809 = vrot.lane.b32.xlu1 %v774_v30, %s1440_s26 }
 0x171   : > { %807 = vrot.lane.b32.xlu0 %v773_v33, %s1440_s26 }
 0x174   : > { %779 = vrot.lane.b32.xlu1 %v766_v41, %s1441_s23 }
 0x175   : > { %777 = vrot.lane.b32.xlu0 %v765_v42, %s1441_s23 }
 0x178   : > { %785 = vrot.lane.b32.xlu1 %v766_v41, %s1440_s26 }
 0x179   : > { %783 = vrot.lane.b32.xlu0 %v765_v42, %s1440_s26  ;;  %s1298_s26 = scalar_lea.vmem %s1845_s13, 64 }
 0x17a   : > { %p1299_p1 = scmp.ne.s32.totalorder %s1845_s13, %s1298_s26 }
 0x17c   : > { %791 = vrot.lane.b32.xlu1 %v766_v41, %s1442_s12  ;;  %p1300_p2 = pnand %p1299_p1, %p1523_p9 }
 0x17d   : > { %789 = vrot.lane.b32.xlu0 %v765_v42, %s1442_s12 }
 0x17e   : > { %p1301_p3 = pneg %p1300_p2 }
 0x180   : > { %815 = vrot.lane.b32.xlu1 %v774_v30, %s1442_s12 }
 0x181   : > { %813 = vrot.lane.b32.xlu0 %v773_v33, %s1442_s12 }
 0x1de   : > { %v804_v31 = vpop.permute.xlu1 %803 }
 0x1df   : > { %v802_v44 = vpop.permute.xlu0 %801 }
 0x1e2   : > { %v810_v40 = vpop.permute.xlu1 %809 }
 0x1e3   : > { %v808_v45 = vpop.permute.xlu0 %807  ;;  %v820_v57 = vsel %vm484_vm2, %v804_v31, %v810_v40 }
 0x1e4   : > { %v819_v59 = vsel %vm484_vm2, %v802_v44, %v808_v45 }
 0x1e6   : > { %v780_v46 = vpop.permute.xlu1 %779 }
 0x1e7   : > { %v778_v47 = vpop.permute.xlu0 %777 }
 0x1ea   : > { %v786_v49 = vpop.permute.xlu1 %785 }
 0x1eb   : > { %v784_v50 = vpop.permute.xlu0 %783  ;;  %v796_v51 = vsel %vm484_vm2, %v780_v46, %v786_v49  ;;  %v892_v49 = vsub.f32 %v1608_v2, %v1622_v12  ;;  %v913_v2 = vsub.f32 %v1605_v1, %v1644_v34 }
 0x1ec   : > { %v795_v53 = vsel %vm484_vm2, %v778_v47, %v784_v50 }
 0x1ee   : > { %v792_v52 = vpop.permute.xlu1 %791 }
 0x1ef   : > { %v798_v54 = vsel %vm487_vm3, %v796_v51, %v792_v52  ;;  %v790_v55 = vpop.permute.xlu0 %789  ;;  %v891_v52 = vsub.f32 %v1602_v0, %v1638_v25 }
 0x1f0   : > { %v797_v56 = vsel %vm487_vm3, %v795_v53, %v790_v55  ;;  %849 = vrot.lane.b32.xlu1 %v798_v54, %s1441_s23  ;;  %v824_v5 = vmul.f32 6.0, %v798_v54 }
 0x1f1   : > { %847 = vrot.lane.b32.xlu0 %v797_v56, %s1441_s23  ;;  %v823_v6 = vmul.f32 6.0, %v797_v56 }
 0x1f2   : > { %v816_v58 = vpop.permute.xlu1 %815 }
 0x1f3   : > { %v822_v60 = vsel %vm487_vm3, %v820_v57, %v816_v58  ;;  %v814_v61 = vpop.permute.xlu0 %813  ;;  %v914_v58 = vsub.f32 %v1615_v7, %v1634_v21  ;;  %v927_v7 = vsub.f32 %v1683_v18, %v1710_v48 }
 0x1f4   : > { %v821_v62 = vsel %vm487_vm3, %v819_v59, %v814_v61  ;;  %883 = vrot.lane.b32.xlu1 %v822_v60, %s1441_s23  ;;  %v858_v63 = vmul.f32 6.0, %v822_v60 }
 0x1f5   : > { %881 = vrot.lane.b32.xlu0 %v821_v62, %s1441_s23  ;;  %v857_v4 = vmul.f32 6.0, %v821_v62 }
 0x1f8   : > { %863 = vrot.lane.b32.xlu1 %v858_v63, %s1441_s23 }
 0x1f9   : > { %861 = vrot.lane.b32.xlu0 %v857_v4, %s1441_s23 }
 0x1fc   : > { %839 = vrot.lane.b32.xlu1 %v798_v54, %s1443_s7 }
 0x1fd   : > { %837 = vrot.lane.b32.xlu0 %v797_v56, %s1443_s7 }
 0x200   : > { %829 = vrot.lane.b32.xlu1 %v824_v5, %s1441_s23 }
 0x201   : > { %827 = vrot.lane.b32.xlu0 %v823_v6, %s1441_s23 }
 0x204   : > { %873 = vrot.lane.b32.xlu1 %v822_v60, %s1443_s7 }
 0x205   : > { %871 = vrot.lane.b32.xlu0 %v821_v62, %s1443_s7 }
 0x262   : > { %v850_v9 = vpop.permute.xlu1 %849 }
 0x263   : > { %v854_v11 = vadd.f32 %v850_v9, %v798_v54  ;;  %v848_v14 = vpop.permute.xlu0 %847 }
 0x264   : > { %v853_v15 = vadd.f32 %v848_v14, %v797_v56 }
 0x265   : > { %v856_v16 = vmul.f32 0.5, %v854_v11 }
 0x266   : > { %v855_v19 = vmul.f32 0.5, %v853_v15  ;;  %v884_v20 = vpop.permute.xlu1 %883 }
 0x267   : > { %v888_v22 = vadd.f32 %v884_v20, %v822_v60  ;;  %v882_v23 = vpop.permute.xlu0 %881  ;;  %903 = vrot.lane.b32.xlu1 %v856_v16, %s1441_s23 }
 0x268   : > { %v887_v24 = vadd.f32 %v882_v23, %v821_v62  ;;  %901 = vrot.lane.b32.xlu0 %v855_v19, %s1441_s23 }
 0x269   : > { %v890_v26 = vmul.f32 0.5, %v888_v22 }
 0x26a   : > { %v889_v27 = vmul.f32 0.5, %v887_v24  ;;  %v864_v30 = vpop.permute.xlu1 %863 }
 0x26b   : > { %v932_v28 = vrot.slane %v890_v26, 1  ;;  %v862_v32 = vpop.permute.xlu0 %861  ;;  %v868_v42 = vadd.f32 %v864_v30, %v822_v60 }
 0x26c   : > { %v931_v29 = vrot.slane %v889_v27, 1  ;;  %v867_v44 = vadd.f32 %v862_v32, %v821_v62 }
 0x26d   : > { %935 = vrot.lane.b32.xlu1 %v932_v28, %s1441_s23 }
 0x26e   : > { %933 = vrot.lane.b32.xlu0 %v931_v29, %s1441_s23  ;;  %v840_v33 = vpop.permute.xlu1 %839  ;;  %s1444_s23 = smov [#allocation8]  }
 0x26f   : > { %v838_v35 = vpop.permute.xlu0 %837  ;;  %s1302_s7 = sshll.u32 %s1444_s23, 4  ;;  %s1303_s7 = int_to_ptr.vmem [resolvable:$false] %s1302_s7 }
 0x270   : > { %s1304_s8 = scalar_lea.vmem %s1303_s7, 128  ;;  %p1305_p4 = scmp.lt.s32.totalorder %s1845_s13, %s1303_s7 }
 0x271   : > { %p1306_p5 = scmp.lt.s32.totalorder %s1304_s8, %s1298_s26 }
 0x272   : > { %v830_v37 = vpop.permute.xlu1 %829 }
 0x273   : > { %v828_v38 = vpop.permute.xlu0 %827  ;;  %v834_v3 = vadd.f32 %v830_v37, %v798_v54  ;;  %v898_v54 = vsub.f32 %v1650_v39, %v1680_v17  ;;  %p1307_p6 = por %p1306_p5, %p1305_p4 }
 0x274   : > { %v833_v13 = vadd.f32 %v828_v38, %v797_v56  ;;  %v897_v56 = vsub.f32 %v1667_v8, %v1699_v36  ;;  %v928_v8 = vsub.f32 %v1670_v10, %v1705_v43 }
 0x275   : > { %v844_v40 = vadd.f32 %v840_v33, %v834_v3  ;;  %p1308_p7 = pnand %p1307_p6, %p1301_p3 }
 0x276   : > { %v874_v41 = vpop.permute.xlu1 %873  ;;  %v843_v46 = vadd.f32 %v838_v35, %v833_v13 }
 0x277   : > { %v872_v31 = vpop.permute.xlu0 %871  ;;  %v878_v45 = vadd.f32 %v874_v41, %v868_v42  ;;  %v846_v50 = vmul.f32 0.125, %v844_v40 }
 0x278   : > { %v877_v47 = vadd.f32 %v872_v31, %v867_v44  ;;  %v845_v53 = vmul.f32 0.125, %v843_v46 }
 0x279   : > { %v880_v51 = vmul.f32 0.125, %v878_v45  ;;  %v894_v57 = vsub.f32 %v892_v49, %v846_v50 }
 0x27a   : > { %v879_v55 = vmul.f32 0.125, %v877_v47  ;;  %v893_v60 = vsub.f32 %v891_v52, %v845_v53 }
 0x27b   : > { %v918_v59 = vrot.slane %v880_v51, 1  ;;  %v896_v4 = vand.u32 2147483647, %v894_v57 }
 0x27c   : > { %v917_v12 = vrot.slane %v879_v55, 1  ;;  %v895_v36 = vand.u32 2147483647, %v893_v60 }
 0x27d   : > { %v922_v63 = vsub.f32 %v914_v58, %v918_v59 }
 0x27e   : > { %v921_v17 = vsub.f32 %v913_v2, %v917_v12 }
 0x27f   : > { %v924_v34 = vand.u32 2147483647, %v922_v63 }
 0x280   : > { %v923_v14 = vand.u32 2147483647, %v921_v17 }
 0x2d9   : > { %v904_v61 = vpop.permute.xlu1 %903 }
 0x2da   : > { %v908_v0 = vsub.f32 %v898_v54, %v904_v61  ;;  %v902_v25 = vpop.permute.xlu0 %901 }
 0x2db   : > { %v907_v62 = vsub.f32 %v897_v56, %v902_v25 }
 0x2dc   : > { %v910_v39 = vand.u32 2147483647, %v908_v0 }
 0x2dd   : > { %v909_v5 = vand.u32 2147483647, %v907_v62 }
 0x2de   : > { %v912_v21 = vadd.f32 %v910_v39, %v896_v4 }
 0x2df   : > { %v911_v6 = vadd.f32 %v909_v5, %v895_v36  ;;  %v936_v1 = vpop.permute.xlu1 %935 }
 0x2e0   : > { %v940_v9 = vsub.f32 %v928_v8, %v936_v1  ;;  %v934_v11 = vpop.permute.xlu0 %933  ;;  %v926_v10 = vadd.f32 %v924_v34, %v912_v21 }
 0x2e1   : > { %v939_v15 = vsub.f32 %v927_v7, %v934_v11  ;;  %v925_v16 = vadd.f32 %v923_v14, %v911_v6 }
 0x2e2   : > { %v942_v43 = vand.u32 2147483647, %v940_v9 }
 0x2e3   : > { %v941_v19 = vand.u32 2147483647, %v939_v15 }
 0x2e4   : > { %v944_v20 = vadd.f32 %v942_v43, %v926_v10 }
 0x2e5   : > { %v943_v18 = vadd.f32 %v941_v19, %v925_v16 }
 0x2e6   : > { %v946_v48 = vsel %vm722_vm4, %v944_v20, 0.0 }
 0x2e7   : > { %v945_v22 = vsel %vm722_vm4, %v943_v18, 0.0 }
 0x2e8   : > { %v947_v23 = vadd.f32 %v946_v48, %v945_v22 }
 0x2ea   : > { %948 = vadd.xlane.f32.xlu0 %v947_v23 }
 0x2eb   : > { %1311 = shalt.err (!%p1308_p7)
}
 0x2ec   : > { %s1312_s11 = scalar_lea.hbm %s1843_s25, 64  ;;  %s1316_s9 = scalar_lea.hbm %s1965_s3, 256 }
 0x2ed   : > { %p1313_p8 = scmp.ne.s32.totalorder %s1843_s25, %s1312_s11  ;;  %p1317_p13 = scmp.lt.u32.totalorder %s1843_s25, %s1965_s3 }
 0x2ee   : > { %p1318_p0 = scmp.lt.u32.totalorder %s1316_s9, %s1312_s11  ;;  %p1320_p2 = scmp.lt.u32.totalorder %s1312_s11, %s1843_s25 }
 0x2ef   : > { %p1314_p11 = pnand %p1313_p8, %p1523_p9 }
 0x2f0   : > { %p1319_p1 = por %p1318_p0, %p1317_p13 }
 0x2f1   : > { %p1315_p12 = pneg %p1314_p11 }
 0x2f2   : > { %p1321_p3 = por %p1320_p2, %p1319_p1 }
 0x2f4   : > { %p1322_p4 = pnand %p1321_p3, %p1315_p12 }
 0x2f6   : > { %1325 = shalt.err (!%p1322_p4)
}
 0x2f7   : > { %s1445_s26 = smov 32   ;;  %s1879_s14 = scalar_lea.hbm %s1964_s2, %s1212_s22 }
 0x2f8   : > { %1235 = dma.vmem_to_hbm [thread:$0]  (%p1523_p9), %s1845_s13, 64, %s1843_s25, %s1847_s29, %s1445_s26, %s1445_s26, %s1442_s12  }
 0x2f9   : > { %s960_s6 = scalar_lea.sflag [#allocation4], %s1584_s5  ;;  %s1326_s9 = scalar_lea.vmem %s1883_s10, 64 }
 0x2fa   : > { %p1327_p5 = scmp.ne.s32.totalorder %s1883_s10, %s1326_s9  ;;  %s1446_s23 = smov [#allocation7]  }
 0x2fb   : > { %s1330_s13 = sshll.u32 %s1446_s23, 4  ;;  %s1331_s13 = int_to_ptr.vmem [resolvable:$false] %s1330_s13 }
 0x2fc   : > { %p1328_p6 = pnand %p1327_p5, %p1523_p9  ;;  %s1332_s25 = scalar_lea.vmem %s1331_s13, 128 }
 0x2fd   : > { %p1333_p8 = scmp.lt.s32.totalorder %s1883_s10, %s1331_s13  ;;  %p1334_p11 = scmp.lt.s32.totalorder %s1332_s25, %s1326_s9 }
 0x2fe   : > { %p1329_p7 = pneg %p1328_p6 }
 0x2ff   : > { %p1335_p12 = por %p1334_p11, %p1333_p8 }
 0x301   : > { %p1336_p13 = pnand %p1335_p12, %p1329_p7 }
 0x303   : > { %1339 = shalt.err (!%p1336_p13)
}
 0x304   : > { %s1340_s30 = scalar_lea.hbm %s1879_s14, 64  ;;  %s1344_s8 = scalar_lea.hbm %s1964_s2, 256 }
 0x305   : > { %p1341_p0 = scmp.ne.s32.totalorder %s1879_s14, %s1340_s30  ;;  %p1345_p3 = scmp.lt.u32.totalorder %s1879_s14, %s1964_s2 }
 0x306   : > { %p1346_p4 = scmp.lt.u32.totalorder %s1344_s8, %s1340_s30  ;;  %p1348_p6 = scmp.lt.u32.totalorder %s1340_s30, %s1879_s14 }
 0x307   : > { %p1342_p1 = pnand %p1341_p0, %p1523_p9 }
 0x308   : > { %p1347_p5 = por %p1346_p4, %p1345_p3 }
 0x309   : > { %p1343_p2 = pneg %p1342_p1 }
 0x30a   : > { %p1349_p7 = por %p1348_p6, %p1347_p5 }
 0x30c   : > { %p1350_p8 = pnand %p1349_p7, %p1343_p2 }
 0x30e   : > { %1353 = shalt.err (!%p1350_p8)
}
 0x30f   : > { %1234 = dma.vmem_to_hbm [thread:$0]  (%p1523_p9), %s1883_s10, 64, %s1879_s14, %s960_s6, %s1445_s26, %s1445_s26, %s1442_s12  }
 0x310   : > { %s1187_s9 = sshll.u32 %s1584_s5, 3  ;;  %s1207_s30 = sshll.u32 %s1494_s19, 7 }
 0x311   : > { %s323_s13 = scalar_lea.vmem [#allocation10], %s1187_s9  ;;  %s1919_s26 = scalar_lea.hbm %s1966_s4, %s1207_s30 }
 0x312   : > { %s1015_s25 = sshll.u32 %s323_s13, 4  ;;  %s1447_s5 = smov [#allocation10]   ;;  %s1914_s25 = int_to_ptr.vmem [resolvable:$true] %s1015_s25 }
 0x313   : > { %s1354_s14 = scalar_lea.vmem %s1914_s25, 128  ;;  %s1358_s19 = sshll.u32 %s1447_s5, 4  ;;  %s1359_s19 = int_to_ptr.vmem [resolvable:$false] %s1358_s19 }
 0x314   : > { %p1355_p11 = scmp.ne.s32.totalorder %s1914_s25, %s1354_s14  ;;  %s1360_s6 = scalar_lea.vmem %s1359_s19, 256 }
 0x315   : > { %p1361_p0 = scmp.lt.s32.totalorder %s1914_s25, %s1359_s19  ;;  %p1362_p1 = scmp.lt.s32.totalorder %s1360_s6, %s1354_s14 }
 0x316   : > { %p1356_p12 = pnand %p1355_p11, %p1523_p9 }
 0x317   : > { %p1363_p2 = por %p1362_p1, %p1361_p0 }
 0x318   : > { %p1357_p13 = pneg %p1356_p12 }
 0x31a   : > { %p1364_p3 = pnand %p1363_p2, %p1357_p13 }
 0x377   : > { %v949_v24 = vpop.xlane.xlu0 %948 }
 0x378   : > { %v950_v26 = vrot.slane %v949_v24, 4 }
 0x37a   : > { %v951_v27 = vadd.f32 %v950_v26, %v949_v24 }
 0x37c   : > { %v952_v28 = vrot.slane %v951_v27, 2 }
 0x37e   : > { %v953_v29 = vadd.f32 %v952_v28, %v951_v27 }
 0x380   : > { %v954_v30 = vrot.slane %v953_v29, 1 }
 0x382   : > { %v955_v32 = vadd.f32 %v954_v30, %v953_v29 }
 0x384   : > { %1214 = vpush %v955_v32 }
 0x3b5   : > { %s1215_s22 = spop %1214 }
 0x3b6   : > { %v957_v33 = vstv %s1215_s22 }
 0x3b7   : > { %958 = vst [vmem:[%s323_s13] sm:$0xff] %v957_v33 }
 0x3b8   : > { %1367 = shalt.err (!%p1364_p3)
}
 0x3b9   : > { %s1368_s7 = scalar_lea.hbm %s1919_s26, 128  ;;  %s1372_s23 = scalar_lea.hbm %s1966_s4, 512 }
 0x3ba   : > { %p1369_p4 = scmp.ne.s32.totalorder %s1919_s26, %s1368_s7  ;;  %p1373_p7 = scmp.lt.u32.totalorder %s1919_s26, %s1966_s4 }
 0x3bb   : > { %p1374_p8 = scmp.lt.u32.totalorder %s1372_s23, %s1368_s7  ;;  %p1376_p12 = scmp.lt.u32.totalorder %s1368_s7, %s1919_s26 }
 0x3bc   : > { %p1370_p5 = pnand %p1369_p4, %p1523_p9 }
 0x3bd   : > { %p1375_p11 = por %p1374_p8, %p1373_p7 }
 0x3be   : > { %p1371_p6 = pneg %p1370_p5 }
 0x3bf   : > { %p1377_p13 = por %p1376_p12, %p1375_p11 }
 0x3c1   : > { %p1378_p0 = pnand %p1377_p13, %p1371_p6 }
 0x3c3   : > { %1381 = shalt.err (!%p1378_p0)
}
 0x3c4   : > { %1236 = dma.vmem_to_hbm [thread:$0]  (%p1523_p9), %s1914_s25, 128, %s1919_s26, %s1847_s29  }
 0x3c5 PF: > { %p1250_p1 = scmp.ge.s32.totalorder %s1428_s18, 2  ;;  %s1027_s30 = sand.u32 1, %s1416_s15  }
 0x3c6   : > { %s1028_s22 = scalar_lea.sflag [#allocation4], %s1027_s30 }
 0x3c7   : > { %p1241_p2 = pnand %p1250_p1, %p1527_p10 }
 0x3c9   : > { %1407 = dma.done.wait (!%p1241_p2), %s1028_s22, 64  }
 0x3ca   : > { %1409 = vsyncadd (!%p1241_p2), %s1028_s22, 4294967232  ;;  %s1036_s12 = sand.u32 1, %s1169_s20  }
 0x3cb   : > { %s1037_s10 = scalar_lea.sflag [#allocation9], %s1036_s12 }
 0x3cc   : > { %1411 = dma.done.wait (!%p1241_p2), %s1037_s10, 192  }
 0x3cd   : > { %1413 = vsyncadd (!%p1241_p2), %s1037_s10, 4294967104  ;;  %p24_p9 = scmp.ge.s32.totalorder %s1498_s21, 6   ;;  %s1971_s15 = smov %s1420_s16 }
 0x3ce   : > { %s1972_s16 = smov %s1424_s17  ;;  %s1973_s17 = smov %s1510_s24 }
 0x3cf   : > { %s1974_s18 = smov %s1498_s21  ;;  %26 = sbr.rel (!%p24_p9) target bundleno = 9 (0x9), region = 134 }
 0x3d6   :  { %1051 = vsyncpa [#allocation3], 1 }
 0x3d7   :  { %1053 = vsyncpa [#allocation3 + $0x1], 1 }
 0x3d8   :  { %1054 = vsyncpa [#allocation6], 1 }
 0x3d9   :  { %1056 = vsyncpa [#allocation6 + $0x1], 1 }
 0x3da   :  { %1057 = vsyncpa [#allocation4], 1 }
 0x3db   :  { %1059 = vsyncpa [#allocation4 + $0x1], 1 }
 0x3dc   :  { %1060 = vsyncpa [#allocation9], 1 }
 0x3dd   :  { %1062 = vsyncpa [#allocation9 + $0x1], 1 }

</bundles_post_ra>
